<compile_context>
chip_gen: v7x
topology: tpu7x:2x2x1
jax: 0.10.0
libtpu: 0.0.40
codegen_flags: <defaults>
</compile_context>

<pallas_src>
import functools

import jax
import jax.numpy as jnp
import numpy as np
from jax import lax
from jax.experimental import pallas as pl
from jax.experimental.pallas import tpu as pltpu

_BN_EPS = 1e-5
_LANE = 128


def _round_up(x, m):
    return (x + m - 1) // m * m


def _pick_vmem_limit():
    """~64 MiB on 128 MiB chips (v5e/v6e), ~38 MiB on v7x (64 MiB physical)."""
    cap = None
    try:
        cap = getattr(pltpu.get_tpu_info(), "vmem_capacity_bytes", None)
    except Exception:
        cap = None
    if not cap:
        cap = 64 * 1024 * 1024
    return int(min(64 * 1024 * 1024, cap * 3 // 5))


def _basic_block_kernel(x_ref, w1_ref, w2_ref, s1_ref, b1_ref, s2_ref, b2_ref,
                        o_ref, xpad_ref, col_ref, acc_ref, *, H, W, Wp):
    """Fused BasicBlock (stride=1, no downsample) for one batch element.

    x_ref    : (1, H, W, Cp)        input block (Cp = lane-padded channels)
    w1_ref   : (3, 3*Cp, Cp)        conv1 weights, [dh][(dw, cin)][cout]
    w2_ref   : (3, 3*Cp, Cp)        conv2 weights (single-buffered)
    s*_/b*_  : (1, Cp) f32          folded BN scale / bias
    o_ref    : (1, H, W, Cp)        output block
    xpad_ref : (H+2, Wp+2, Cp)      VMEM scratch, padded plane (reused for h)
    col_ref  : (H*Wp, 3*Cp)         VMEM scratch, per-dh im2col patches
    acc_ref  : (H*Wp, Cp) f32       VMEM scratch, matmul accumulator
    """
    Cp = o_ref.shape[-1]
    cdtype = xpad_ref.dtype          # matmul operand dtype (bf16 or f32)

    # ---- zero only the 1-px halo border (interior is overwritten below) ----
    zrow = jnp.zeros((1, Wp + 2, Cp), cdtype)
    zright = jnp.zeros((H + 2, Wp + 1 - W, Cp), cdtype)
    xpad_ref[0:1, :, :] = zrow
    xpad_ref[H + 1:H + 2, :, :] = zrow
    xpad_ref[:, 0:1, :] = jnp.zeros((H + 2, 1, Cp), cdtype)
    xpad_ref[:, W + 1:Wp + 2, :] = zright     # right border (+ garbage cols)

    # ---- stage the input into the padded plane (cast to compute dtype) -----
    xpad_ref[1:H + 1, 1:W + 1, :] = x_ref[0].astype(cdtype)

    def conv3x3(w_ref):
        # im2col split by kernel row dh: 3 accumulating matmuls, K = 3*Cp.
        # TODO(synk): dw=1,2 taps are sublane-unaligned reads; could be an
        #             aligned load + pltpu.roll on v6e/v7x.
        for dh in range(3):
            for dw in range(3):
                col_ref[:, dw * Cp:(dw + 1) * Cp] = (
                    xpad_ref[dh:dh + H, dw:dw + Wp, :].reshape(H * Wp, Cp))
            part = jnp.dot(col_ref[...], w_ref[dh],
                           preferred_element_type=jnp.float32)
            if dh == 0:
                acc_ref[...] = part
            else:
                acc_ref[...] += part

    # ---- conv1 + bn1 + relu; h reuses the xpad plane (no hpad scratch) -----
    conv3x3(w1_ref)
    h = jnp.maximum(acc_ref[...] * s1_ref[...] + b1_ref[...], 0.0)
    xpad_ref[1:H + 1, 1:Wp + 1, :] = h.reshape(H, Wp, Cp).astype(cdtype)
    if Wp > W:
        # h's garbage columns spilled into the right halo column; re-zero it.
        xpad_ref[:, W + 1:Wp + 2, :] = zright

    # ---- conv2 + bn2 + residual add + relu (f32 epilogue) ------------------
    conv3x3(w2_ref)
    out = acc_ref[...] * s2_ref[...] + b2_ref[...]
    out = out.reshape(H, Wp, Cp)
    if Wp > W:
        out = out[:, :W, :]
    out = out + x_ref[0].astype(jnp.float32)   # residual from full-precision x
    out = jnp.maximum(out, 0.0)
    o_ref[...] = out.reshape(1, H, W, Cp).astype(o_ref.dtype)


def _fold_bn(gamma, beta, mean, var):
    scale = gamma / jnp.sqrt(var + _BN_EPS)
    bias = beta - mean * scale
    return scale, bias


def _pad_axis(a, axis, target):
    if a.shape[axis] == target:
        return a
    pads = [(0, 0)] * a.ndim
    pads[axis] = (0, target - a.shape[axis])
    return jnp.pad(a, pads)


def basic_block_forward_nhwc(x, params, *, compute_dtype=jnp.bfloat16):
    """Fused BasicBlock forward (stride=1, no downsample).  NHWC in/out.

    compute_dtype controls the matmul operand dtype (bf16 default: native MXU
    path, half the im2col/weight VMEM).  Accumulation and the BN / residual /
    ReLU epilogue are always f32; the residual uses x at its original dtype.
    """
    N, H, W, C = x.shape
    out_dtype = x.dtype
    Cp = _round_up(max(C, _LANE), _LANE)      # lane-dense channel count
    Wp = _round_up(W, 8)                      # sublane-aligned scratch width

    # Channel padding to a multiple of 128 keeps every matmul operand and the
    # output block lane-dense.  In a full model activations would stay padded
    # end-to-end; the pad/slice here is only at this single-block boundary.
    xp = _pad_axis(x, 3, Cp)
    w1 = _pad_axis(_pad_axis(params["w1"], 2, Cp), 3, Cp).astype(compute_dtype)
    w2 = _pad_axis(_pad_axis(params["w2"], 2, Cp), 3, Cp).astype(compute_dtype)
    w1 = w1.reshape(3, 3 * Cp, Cp)            # [dh][(dw, cin)][cout]
    w2 = w2.reshape(3, 3 * Cp, Cp)

    s1, b1 = _fold_bn(params["gamma1"], params["beta1"],
                      params["mean1"], params["var1"])
    s2, b2 = _fold_bn(params["gamma2"], params["beta2"],
                      params["mean2"], params["var2"])
    s1 = _pad_axis(s1.reshape(1, -1), 1, Cp).astype(jnp.float32)
    b1 = _pad_axis(b1.reshape(1, -1), 1, Cp).astype(jnp.float32)
    s2 = _pad_axis(s2.reshape(1, -1), 1, Cp).astype(jnp.float32)
    b2 = _pad_axis(b2.reshape(1, -1), 1, Cp).astype(jnp.float32)

    kernel = functools.partial(_basic_block_kernel, H=H, W=W, Wp=Wp)
    # Grid-invariant weights: single-buffered (pl.Buffered(1)) so the
    # 512-channel stage does not double-buffer ~2x9.4 MB of weights.
    w_spec1 = pl.BlockSpec((3, 3 * Cp, Cp), lambda n: (0, 0, 0),
                           pipeline_mode=pl.Buffered(1))
    w_spec2 = pl.BlockSpec((3, 3 * Cp, Cp), lambda n: (0, 0, 0),
                           pipeline_mode=pl.Buffered(1))
    vec_spec = pl.BlockSpec((1, Cp), lambda n: (0, 0))

    out = pl.pallas_call(
        kernel,
        out_shape=jax.ShapeDtypeStruct((N, H, W, Cp), out_dtype),
        grid=(N,),
        in_specs=[
            pl.BlockSpec((1, H, W, Cp), lambda n: (n, 0, 0, 0)),   # x
            w_spec1,                                               # w1
            w_spec2,                                               # w2
            vec_spec, vec_spec, vec_spec, vec_spec,                # s1,b1,s2,b2
        ],
        out_specs=pl.BlockSpec((1, H, W, Cp), lambda n: (n, 0, 0, 0)),
        scratch_shapes=[
            pltpu.VMEM((H + 2, Wp + 2, Cp), compute_dtype),  # padded x / h
            pltpu.VMEM((H * Wp, 3 * Cp), compute_dtype),     # per-dh im2col
            pltpu.VMEM((H * Wp, Cp), jnp.float32),           # f32 accumulator
        ],
        compiler_params=pltpu.CompilerParams(
            dimension_semantics=("parallel",),        # batch -> megacore
            vmem_limit_bytes=_pick_vmem_limit()),
    )(xp, w1, w2, s1, b1, s2, b2)

    return out[..., :C] if Cp != C else out


def basic_block_forward_nchw(x_nchw, params, *, compute_dtype=jnp.bfloat16):
    """BasicBlock forward, NCHW interface (matches the PyTorch module).

    NOTE: in a full ResNet keep activations NHWC end-to-end and call
    basic_block_forward_nhwc directly; these transposes only exist to match
    the PyTorch layout of a single block.
    """
    x = jnp.transpose(x_nchw, (0, 2, 3, 1))   # NCHW -> NHWC
    out = basic_block_forward_nhwc(x, params, compute_dtype=compute_dtype)
    return jnp.transpose(out, (0, 3, 1, 2))   # NHWC -> NCHW


def _reference_forward_nchw(x_nchw, params):
    """Pure-JAX reference (lax.conv) for verification."""
    x = jnp.transpose(x_nchw, (0, 2, 3, 1))
    dn = ("NHWC", "HWIO", "NHWC")
    s1, b1 = _fold_bn(params["gamma1"], params["beta1"],
                      params["mean1"], params["var1"])
    s2, b2 = _fold_bn(params["gamma2"], params["beta2"],
                      params["mean2"], params["var2"])
    h = lax.conv_general_dilated(x, params["w1"], (1, 1), "SAME",
                                 dimension_numbers=dn)
    h = jnp.maximum(h * s1 + b1, 0.0)
    o = lax.conv_general_dilated(h, params["w2"], (1, 1), "SAME",
                                 dimension_numbers=dn)
    o = jnp.maximum(o * s2 + b2 + x, 0.0)
    return jnp.transpose(o, (0, 3, 1, 2))


def make_params(key, inplanes, planes):
    ks = jax.random.split(key, 8)
    return {
        "w1": 0.1 * jax.random.normal(ks[0], (3, 3, inplanes, planes),
                                      jnp.float32),
        "w2": 0.1 * jax.random.normal(ks[1], (3, 3, planes, planes),
                                      jnp.float32),
        "gamma1": 1.0 + 0.1 * jax.random.normal(ks[2], (planes,), jnp.float32),
        "beta1": 0.1 * jax.random.normal(ks[3], (planes,), jnp.float32),
        "mean1": 0.05 * jax.random.normal(ks[4], (planes,), jnp.float32),
        "var1": 1.0 + 0.1 * jax.random.uniform(ks[5], (planes,), jnp.float32),
        "gamma2": 1.0 + 0.1 * jax.random.normal(ks[6], (planes,), jnp.float32),
        "beta2": 0.1 * jax.random.normal(ks[7], (planes,), jnp.float32),
        "mean2": 0.05 * jax.random.normal(ks[2], (planes,), jnp.float32),
        "var2": 1.0 + 0.1 * jax.random.uniform(ks[3], (planes,), jnp.float32),
    }


if __name__ == "__main__":
    key = jax.random.PRNGKey(0)
    N, C, H, W = 2, 4, 16, 16           # inplanes = planes = 4, stride = 1
    kx, kp = jax.random.split(key)
    x = jax.random.normal(kx, (N, C, H, W), jnp.float32)
    params = make_params(kp, C, C)

    ref = jax.block_until_ready(_reference_forward_nchw(x, params))

    # Exact path: f32 matmul operands — tight check vs. the lax.conv reference.
    out_f32 = jax.block_until_ready(
        basic_block_forward_nchw(x, params, compute_dtype=jnp.float32))
    np.testing.assert_allclose(np.asarray(out_f32), np.asarray(ref),
                               rtol=1e-4, atol=1e-4)
    assert out_f32.shape == (N, C, H, W)

    # Default fast path: bf16 matmul operands (native MXU), f32 accumulation
    # and f32 BN/residual epilogue — loose check vs. the f32 reference.
    out_bf16 = jax.block_until_ready(basic_block_forward_nchw(x, params))
    np.testing.assert_allclose(np.asarray(out_bf16), np.asarray(ref),
                               rtol=5e-2, atol=5e-2)
    assert out_bf16.shape == (N, C, H, W)

    print("KERNEL_OK")
</pallas_src>

<mosaic_0001>
module attributes {stable_mosaic.version = 11 : i64} {
  func.func @_basic_block_kernel(%arg0: i32, %arg1: memref<1x16x16x128xf32, #tpu.memory_space<vmem>>, %arg2: memref<3x384x128xf32, #tpu.memory_space<vmem>>, %arg3: memref<3x384x128xf32, #tpu.memory_space<vmem>>, %arg4: memref<1x128xf32, #tpu.memory_space<vmem>>, %arg5: memref<1x128xf32, #tpu.memory_space<vmem>>, %arg6: memref<1x128xf32, #tpu.memory_space<vmem>>, %arg7: memref<1x128xf32, #tpu.memory_space<vmem>>, %arg8: memref<1x16x16x128xf32, #tpu.memory_space<vmem>>, %arg9: memref<18x18x128xf32, #tpu.memory_space<vmem>>, %arg10: memref<256x384xf32, #tpu.memory_space<vmem>>, %arg11: memref<256x128xf32, #tpu.memory_space<vmem>>) attributes {dimension_semantics = [#tpu.dimension_semantics<parallel>], iteration_bounds = array<i64: 2>, scalar_prefetch = 0 : i64, scratch_operands = 3 : i64, tpu.core_type = #tpu.core_type<tc>, window_params = [{transform_indices = @transform_0, window_bounds = array<i64: 1, 16, 16, 128>}, {pipeline_mode = #tpu.pipeline_mode<synchronous>, transform_indices = @transform_1, window_bounds = array<i64: 3, 384, 128>}, {pipeline_mode = #tpu.pipeline_mode<synchronous>, transform_indices = @transform_2, window_bounds = array<i64: 3, 384, 128>}, {pipeline_mode = #tpu.pipeline_mode<synchronous>, transform_indices = @transform_3, window_bounds = array<i64: 1, 128>}, {pipeline_mode = #tpu.pipeline_mode<synchronous>, transform_indices = @transform_4, window_bounds = array<i64: 1, 128>}, {pipeline_mode = #tpu.pipeline_mode<synchronous>, transform_indices = @transform_5, window_bounds = array<i64: 1, 128>}, {pipeline_mode = #tpu.pipeline_mode<synchronous>, transform_indices = @transform_6, window_bounds = array<i64: 1, 128>}, {transform_indices = @transform_7, window_bounds = array<i64: 1, 16, 16, 128>}]} {
    %cst = arith.constant 0.000000e+00 : f32
    %0 = vector.broadcast %cst : f32 to vector<1x18x128xf32>
    %cst_0 = arith.constant 0.000000e+00 : f32
    %1 = vector.broadcast %cst_0 : f32 to vector<18x1x128xf32>
    %c0 = arith.constant 0 : index
    %c0_1 = arith.constant 0 : index
    %c0_2 = arith.constant 0 : index
    %2 = vector.load %arg9[%c0, %c0_1, %c0_2] : memref<18x18x128xf32, #tpu.memory_space<vmem>>, vector<1x18x128xf32>
    tpu.vector_store %arg9[%c0, %c0_1, %c0_2], %0 {strides = array<i32>} : memref<18x18x128xf32, #tpu.memory_space<vmem>>, vector<1x18x128xf32>,
    %c17 = arith.constant 17 : index
    %c0_3 = arith.constant 0 : index
    %c0_4 = arith.constant 0 : index
    %3 = vector.load %arg9[%c17, %c0_3, %c0_4] : memref<18x18x128xf32, #tpu.memory_space<vmem>>, vector<1x18x128xf32>
    tpu.vector_store %arg9[%c17, %c0_3, %c0_4], %0 {strides = array<i32>} : memref<18x18x128xf32, #tpu.memory_space<vmem>>, vector<1x18x128xf32>,
    %cst_5 = arith.constant 0.000000e+00 : f32
    %4 = vector.broadcast %cst_5 : f32 to vector<18x1x128xf32>
    %c0_6 = arith.constant 0 : index
    %c0_7 = arith.constant 0 : index
    %c0_8 = arith.constant 0 : index
    %5 = vector.load %arg9[%c0_6, %c0_7, %c0_8] : memref<18x18x128xf32, #tpu.memory_space<vmem>>, vector<18x1x128xf32>
    tpu.vector_store %arg9[%c0_6, %c0_7, %c0_8], %4 {strides = array<i32>} : memref<18x18x128xf32, #tpu.memory_space<vmem>>, vector<18x1x128xf32>,
    %c0_9 = arith.constant 0 : index
    %c17_10 = arith.constant 17 : index
    %c0_11 = arith.constant 0 : index
    %6 = vector.load %arg9[%c0_9, %c17_10, %c0_11] : memref<18x18x128xf32, #tpu.memory_space<vmem>>, vector<18x1x128xf32>
    tpu.vector_store %arg9[%c0_9, %c17_10, %c0_11], %1 {strides = array<i32>} : memref<18x18x128xf32, #tpu.memory_space<vmem>>, vector<18x1x128xf32>,
    %c0_12 = arith.constant 0 : index
    %c0_13 = arith.constant 0 : index
    %c0_14 = arith.constant 0 : index
    %c0_15 = arith.constant 0 : index
    %7 = vector.load %arg1[%c0_12, %c0_13, %c0_14, %c0_15] : memref<1x16x16x128xf32, #tpu.memory_space<vmem>>, vector<1x16x16x128xf32>
    %8 = vector.shape_cast %7 : vector<1x16x16x128xf32> to vector<16x16x128xf32>
    %c1 = arith.constant 1 : index
    %c1_16 = arith.constant 1 : index
    %c0_17 = arith.constant 0 : index
    %9 = vector.load %arg9[%c1, %c1_16, %c0_17] : memref<18x18x128xf32, #tpu.memory_space<vmem>>, vector<16x16x128xf32>
    tpu.vector_store %arg9[%c1, %c1_16, %c0_17], %8 {strides = array<i32>} : memref<18x18x128xf32, #tpu.memory_space<vmem>>, vector<16x16x128xf32>,
    %c0_18 = arith.constant 0 : index
    %c0_19 = arith.constant 0 : index
    %c0_20 = arith.constant 0 : index
    %10 = vector.load %arg9[%c0_18, %c0_19, %c0_20] : memref<18x18x128xf32, #tpu.memory_space<vmem>>, vector<16x16x128xf32>
    %11 = vector.shape_cast %10 : vector<16x16x128xf32> to vector<256x128xf32>
    %c0_21 = arith.constant 0 : index
    %c0_22 = arith.constant 0 : index
    %12 = vector.load %arg10[%c0_21, %c0_22] : memref<256x384xf32, #tpu.memory_space<vmem>>, vector<256x128xf32>
    tpu.vector_store %arg10[%c0_21, %c0_22], %11 {strides = array<i32>} : memref<256x384xf32, #tpu.memory_space<vmem>>, vector<256x128xf32>,
    %c0_23 = arith.constant 0 : index
    %c1_24 = arith.constant 1 : index
    %c0_25 = arith.constant 0 : index
    %13 = vector.load %arg9[%c0_23, %c1_24, %c0_25] : memref<18x18x128xf32, #tpu.memory_space<vmem>>, vector<16x16x128xf32>
    %14 = vector.shape_cast %13 : vector<16x16x128xf32> to vector<256x128xf32>
    %c0_26 = arith.constant 0 : index
    %c128 = arith.constant 128 : index
    %15 = vector.load %arg10[%c0_26, %c128] : memref<256x384xf32, #tpu.memory_space<vmem>>, vector<256x128xf32>
    tpu.vector_store %arg10[%c0_26, %c128], %14 {strides = array<i32>} : memref<256x384xf32, #tpu.memory_space<vmem>>, vector<256x128xf32>,
    %c0_27 = arith.constant 0 : index
    %c2 = arith.constant 2 : index
    %c0_28 = arith.constant 0 : index
    %16 = vector.load %arg9[%c0_27, %c2, %c0_28] : memref<18x18x128xf32, #tpu.memory_space<vmem>>, vector<16x16x128xf32>
    %17 = vector.shape_cast %16 : vector<16x16x128xf32> to vector<256x128xf32>
    %c0_29 = arith.constant 0 : index
    %c256 = arith.constant 256 : index
    %18 = vector.load %arg10[%c0_29, %c256] : memref<256x384xf32, #tpu.memory_space<vmem>>, vector<256x128xf32>
    tpu.vector_store %arg10[%c0_29, %c256], %17 {strides = array<i32>} : memref<256x384xf32, #tpu.memory_space<vmem>>, vector<256x128xf32>,
    %c0_30 = arith.constant 0 : index
    %c0_31 = arith.constant 0 : index
    %19 = vector.load %arg10[%c0_30, %c0_31] : memref<256x384xf32, #tpu.memory_space<vmem>>, vector<256x384xf32>
    %c0_32 = arith.constant 0 : index
    %c0_33 = arith.constant 0 : index
    %c0_34 = arith.constant 0 : index
    %20 = vector.load %arg2[%c0_32, %c0_33, %c0_34] : memref<3x384x128xf32, #tpu.memory_space<vmem>>, vector<1x384x128xf32>
    %21 = vector.shape_cast %20 : vector<1x384x128xf32> to vector<384x128xf32>
    %cst_35 = arith.constant dense<0.000000e+00> : vector<256x128xf32>
    %22 = tpu.matmul %19, %21, %cst_35 {dimension_numbers = #tpu.dot_dimension_numbers<[1], [0], [0], [1], [0, 0, 1, 1], [], []>} : vector<256x384xf32>, vector<384x128xf32>, vector<256x128xf32> -> vector<256x128xf32>
    %c0_36 = arith.constant 0 : index
    %c0_37 = arith.constant 0 : index
    %23 = vector.load %arg11[%c0_36, %c0_37] : memref<256x128xf32, #tpu.memory_space<vmem>>, vector<256x128xf32>
    tpu.vector_store %arg11[%c0_36, %c0_37], %22 {strides = array<i32>} : memref<256x128xf32, #tpu.memory_space<vmem>>, vector<256x128xf32>,
    %c1_38 = arith.constant 1 : index
    %c0_39 = arith.constant 0 : index
    %c0_40 = arith.constant 0 : index
    %24 = vector.load %arg9[%c1_38, %c0_39, %c0_40] : memref<18x18x128xf32, #tpu.memory_space<vmem>>, vector<16x16x128xf32>
    %25 = vector.shape_cast %24 : vector<16x16x128xf32> to vector<256x128xf32>
    %c0_41 = arith.constant 0 : index
    %c0_42 = arith.constant 0 : index
    %26 = vector.load %arg10[%c0_41, %c0_42] : memref<256x384xf32, #tpu.memory_space<vmem>>, vector<256x128xf32>
    tpu.vector_store %arg10[%c0_41, %c0_42], %25 {strides = array<i32>} : memref<256x384xf32, #tpu.memory_space<vmem>>, vector<256x128xf32>,
    %c1_43 = arith.constant 1 : index
    %c1_44 = arith.constant 1 : index
    %c0_45 = arith.constant 0 : index
    %27 = vector.load %arg9[%c1_43, %c1_44, %c0_45] : memref<18x18x128xf32, #tpu.memory_space<vmem>>, vector<16x16x128xf32>
    %28 = vector.shape_cast %27 : vector<16x16x128xf32> to vector<256x128xf32>
    %c0_46 = arith.constant 0 : index
    %c128_47 = arith.constant 128 : index
    %29 = vector.load %arg10[%c0_46, %c128_47] : memref<256x384xf32, #tpu.memory_space<vmem>>, vector<256x128xf32>
    tpu.vector_store %arg10[%c0_46, %c128_47], %28 {strides = array<i32>} : memref<256x384xf32, #tpu.memory_space<vmem>>, vector<256x128xf32>,
    %c1_48 = arith.constant 1 : index
    %c2_49 = arith.constant 2 : index
    %c0_50 = arith.constant 0 : index
    %30 = vector.load %arg9[%c1_48, %c2_49, %c0_50] : memref<18x18x128xf32, #tpu.memory_space<vmem>>, vector<16x16x128xf32>
    %31 = vector.shape_cast %30 : vector<16x16x128xf32> to vector<256x128xf32>
    %c0_51 = arith.constant 0 : index
    %c256_52 = arith.constant 256 : index
    %32 = vector.load %arg10[%c0_51, %c256_52] : memref<256x384xf32, #tpu.memory_space<vmem>>, vector<256x128xf32>
    tpu.vector_store %arg10[%c0_51, %c256_52], %31 {strides = array<i32>} : memref<256x384xf32, #tpu.memory_space<vmem>>, vector<256x128xf32>,
    %c0_53 = arith.constant 0 : index
    %c0_54 = arith.constant 0 : index
    %33 = vector.load %arg10[%c0_53, %c0_54] : memref<256x384xf32, #tpu.memory_space<vmem>>, vector<256x384xf32>
    %c1_55 = arith.constant 1 : index
    %c0_56 = arith.constant 0 : index
    %c0_57 = arith.constant 0 : index
    %34 = vector.load %arg2[%c1_55, %c0_56, %c0_57] : memref<3x384x128xf32, #tpu.memory_space<vmem>>, vector<1x384x128xf32>
    %35 = vector.shape_cast %34 : vector<1x384x128xf32> to vector<384x128xf32>
    %cst_58 = arith.constant dense<0.000000e+00> : vector<256x128xf32>
    %36 = tpu.matmul %33, %35, %cst_58 {dimension_numbers = #tpu.dot_dimension_numbers<[1], [0], [0], [1], [0, 0, 1, 1], [], []>} : vector<256x384xf32>, vector<384x128xf32>, vector<256x128xf32> -> vector<256x128xf32>
    %c0_59 = arith.constant 0 : index
    %c0_60 = arith.constant 0 : index
    %37 = vector.load %arg11[%c0_59, %c0_60] : memref<256x128xf32, #tpu.memory_space<vmem>>, vector<256x128xf32>
    %38 = arith.addf %37, %36 : vector<256x128xf32>
    %c0_61 = arith.constant 0 : index
    %c0_62 = arith.constant 0 : index
    %39 = vector.load %arg11[%c0_61, %c0_62] : memref<256x128xf32, #tpu.memory_space<vmem>>, vector<256x128xf32>
    tpu.vector_store %arg11[%c0_61, %c0_62], %38 {strides = array<i32>} : memref<256x128xf32, #tpu.memory_space<vmem>>, vector<256x128xf32>,
    %c2_63 = arith.constant 2 : index
    %c0_64 = arith.constant 0 : index
    %c0_65 = arith.constant 0 : index
    %40 = vector.load %arg9[%c2_63, %c0_64, %c0_65] : memref<18x18x128xf32, #tpu.memory_space<vmem>>, vector<16x16x128xf32>
    %41 = vector.shape_cast %40 : vector<16x16x128xf32> to vector<256x128xf32>
    %c0_66 = arith.constant 0 : index
    %c0_67 = arith.constant 0 : index
    %42 = vector.load %arg10[%c0_66, %c0_67] : memref<256x384xf32, #tpu.memory_space<vmem>>, vector<256x128xf32>
    tpu.vector_store %arg10[%c0_66, %c0_67], %41 {strides = array<i32>} : memref<256x384xf32, #tpu.memory_space<vmem>>, vector<256x128xf32>,
    %c2_68 = arith.constant 2 : index
    %c1_69 = arith.constant 1 : index
    %c0_70 = arith.constant 0 : index
    %43 = vector.load %arg9[%c2_68, %c1_69, %c0_70] : memref<18x18x128xf32, #tpu.memory_space<vmem>>, vector<16x16x128xf32>
    %44 = vector.shape_cast %43 : vector<16x16x128xf32> to vector<256x128xf32>
    %c0_71 = arith.constant 0 : index
    %c128_72 = arith.constant 128 : index
    %45 = vector.load %arg10[%c0_71, %c128_72] : memref<256x384xf32, #tpu.memory_space<vmem>>, vector<256x128xf32>
    tpu.vector_store %arg10[%c0_71, %c128_72], %44 {strides = array<i32>} : memref<256x384xf32, #tpu.memory_space<vmem>>, vector<256x128xf32>,
    %c2_73 = arith.constant 2 : index
    %c2_74 = arith.constant 2 : index
    %c0_75 = arith.constant 0 : index
    %46 = vector.load %arg9[%c2_73, %c2_74, %c0_75] : memref<18x18x128xf32, #tpu.memory_space<vmem>>, vector<16x16x128xf32>
    %47 = vector.shape_cast %46 : vector<16x16x128xf32> to vector<256x128xf32>
    %c0_76 = arith.constant 0 : index
    %c256_77 = arith.constant 256 : index
    %48 = vector.load %arg10[%c0_76, %c256_77] : memref<256x384xf32, #tpu.memory_space<vmem>>, vector<256x128xf32>
    tpu.vector_store %arg10[%c0_76, %c256_77], %47 {strides = array<i32>} : memref<256x384xf32, #tpu.memory_space<vmem>>, vector<256x128xf32>,
    %c0_78 = arith.constant 0 : index
    %c0_79 = arith.constant 0 : index
    %49 = vector.load %arg10[%c0_78, %c0_79] : memref<256x384xf32, #tpu.memory_space<vmem>>, vector<256x384xf32>
    %c2_80 = arith.constant 2 : index
    %c0_81 = arith.constant 0 : index
    %c0_82 = arith.constant 0 : index
    %50 = vector.load %arg2[%c2_80, %c0_81, %c0_82] : memref<3x384x128xf32, #tpu.memory_space<vmem>>, vector<1x384x128xf32>
    %51 = vector.shape_cast %50 : vector<1x384x128xf32> to vector<384x128xf32>
    %cst_83 = arith.constant dense<0.000000e+00> : vector<256x128xf32>
    %52 = tpu.matmul %49, %51, %cst_83 {dimension_numbers = #tpu.dot_dimension_numbers<[1], [0], [0], [1], [0, 0, 1, 1], [], []>} : vector<256x384xf32>, vector<384x128xf32>, vector<256x128xf32> -> vector<256x128xf32>
    %c0_84 = arith.constant 0 : index
    %c0_85 = arith.constant 0 : index
    %53 = vector.load %arg11[%c0_84, %c0_85] : memref<256x128xf32, #tpu.memory_space<vmem>>, vector<256x128xf32>
    %54 = arith.addf %53, %52 : vector<256x128xf32>
    %c0_86 = arith.constant 0 : index
    %c0_87 = arith.constant 0 : index
    %55 = vector.load %arg11[%c0_86, %c0_87] : memref<256x128xf32, #tpu.memory_space<vmem>>, vector<256x128xf32>
    tpu.vector_store %arg11[%c0_86, %c0_87], %54 {strides = array<i32>} : memref<256x128xf32, #tpu.memory_space<vmem>>, vector<256x128xf32>,
    %c0_88 = arith.constant 0 : index
    %c0_89 = arith.constant 0 : index
    %56 = vector.load %arg11[%c0_88, %c0_89] : memref<256x128xf32, #tpu.memory_space<vmem>>, vector<256x128xf32>
    %c0_90 = arith.constant 0 : index
    %c0_91 = arith.constant 0 : index
    %57 = vector.load %arg4[%c0_90, %c0_91] : memref<1x128xf32, #tpu.memory_space<vmem>>, vector<1x128xf32>
    %58 = vector.broadcast %57 : vector<1x128xf32> to vector<256x128xf32>
    %59 = arith.mulf %56, %58 : vector<256x128xf32>
    %c0_92 = arith.constant 0 : index
    %c0_93 = arith.constant 0 : index
    %60 = vector.load %arg5[%c0_92, %c0_93] : memref<1x128xf32, #tpu.memory_space<vmem>>, vector<1x128xf32>
    %61 = vector.broadcast %60 : vector<1x128xf32> to vector<256x128xf32>
    %62 = arith.addf %59, %61 : vector<256x128xf32>
    %cst_94 = arith.constant 0.000000e+00 : f32
    %63 = vector.broadcast %cst_94 : f32 to vector<256x128xf32>
    %64 = arith.maximumf %62, %63 : vector<256x128xf32>
    %65 = vector.shape_cast %64 : vector<256x128xf32> to vector<16x16x128xf32>
    %c1_95 = arith.constant 1 : index
    %c1_96 = arith.constant 1 : index
    %c0_97 = arith.constant 0 : index
    %66 = vector.load %arg9[%c1_95, %c1_96, %c0_97] : memref<18x18x128xf32, #tpu.memory_space<vmem>>, vector<16x16x128xf32>
    tpu.vector_store %arg9[%c1_95, %c1_96, %c0_97], %65 {strides = array<i32>} : memref<18x18x128xf32, #tpu.memory_space<vmem>>, vector<16x16x128xf32>,
    %c0_98 = arith.constant 0 : index
    %c0_99 = arith.constant 0 : index
    %c0_100 = arith.constant 0 : index
    %67 = vector.load %arg9[%c0_98, %c0_99, %c0_100] : memref<18x18x128xf32, #tpu.memory_space<vmem>>, vector<16x16x128xf32>
    %68 = vector.shape_cast %67 : vector<16x16x128xf32> to vector<256x128xf32>
    %c0_101 = arith.constant 0 : index
    %c0_102 = arith.constant 0 : index
    %69 = vector.load %arg10[%c0_101, %c0_102] : memref<256x384xf32, #tpu.memory_space<vmem>>, vector<256x128xf32>
    tpu.vector_store %arg10[%c0_101, %c0_102], %68 {strides = array<i32>} : memref<256x384xf32, #tpu.memory_space<vmem>>, vector<256x128xf32>,
    %c0_103 = arith.constant 0 : index
    %c1_104 = arith.constant 1 : index
    %c0_105 = arith.constant 0 : index
    %70 = vector.load %arg9[%c0_103, %c1_104, %c0_105] : memref<18x18x128xf32, #tpu.memory_space<vmem>>, vector<16x16x128xf32>
    %71 = vector.shape_cast %70 : vector<16x16x128xf32> to vector<256x128xf32>
    %c0_106 = arith.constant 0 : index
    %c128_107 = arith.constant 128 : index
    %72 = vector.load %arg10[%c0_106, %c128_107] : memref<256x384xf32, #tpu.memory_space<vmem>>, vector<256x128xf32>
    tpu.vector_store %arg10[%c0_106, %c128_107], %71 {strides = array<i32>} : memref<256x384xf32, #tpu.memory_space<vmem>>, vector<256x128xf32>,
    %c0_108 = arith.constant 0 : index
    %c2_109 = arith.constant 2 : index
    %c0_110 = arith.constant 0 : index
    %73 = vector.load %arg9[%c0_108, %c2_109, %c0_110] : memref<18x18x128xf32, #tpu.memory_space<vmem>>, vector<16x16x128xf32>
    %74 = vector.shape_cast %73 : vector<16x16x128xf32> to vector<256x128xf32>
    %c0_111 = arith.constant 0 : index
    %c256_112 = arith.constant 256 : index
    %75 = vector.load %arg10[%c0_111, %c256_112] : memref<256x384xf32, #tpu.memory_space<vmem>>, vector<256x128xf32>
    tpu.vector_store %arg10[%c0_111, %c256_112], %74 {strides = array<i32>} : memref<256x384xf32, #tpu.memory_space<vmem>>, vector<256x128xf32>,
    %c0_113 = arith.constant 0 : index
    %c0_114 = arith.constant 0 : index
    %76 = vector.load %arg10[%c0_113, %c0_114] : memref<256x384xf32, #tpu.memory_space<vmem>>, vector<256x384xf32>
    %c0_115 = arith.constant 0 : index
    %c0_116 = arith.constant 0 : index
    %c0_117 = arith.constant 0 : index
    %77 = vector.load %arg3[%c0_115, %c0_116, %c0_117] : memref<3x384x128xf32, #tpu.memory_space<vmem>>, vector<1x384x128xf32>
    %78 = vector.shape_cast %77 : vector<1x384x128xf32> to vector<384x128xf32>
    %cst_118 = arith.constant dense<0.000000e+00> : vector<256x128xf32>
    %79 = tpu.matmul %76, %78, %cst_118 {dimension_numbers = #tpu.dot_dimension_numbers<[1], [0], [0], [1], [0, 0, 1, 1], [], []>} : vector<256x384xf32>, vector<384x128xf32>, vector<256x128xf32> -> vector<256x128xf32>
    %c0_119 = arith.constant 0 : index
    %c0_120 = arith.constant 0 : index
    %80 = vector.load %arg11[%c0_119, %c0_120] : memref<256x128xf32, #tpu.memory_space<vmem>>, vector<256x128xf32>
    tpu.vector_store %arg11[%c0_119, %c0_120], %79 {strides = array<i32>} : memref<256x128xf32, #tpu.memory_space<vmem>>, vector<256x128xf32>,
    %c1_121 = arith.constant 1 : index
    %c0_122 = arith.constant 0 : index
    %c0_123 = arith.constant 0 : index
    %81 = vector.load %arg9[%c1_121, %c0_122, %c0_123] : memref<18x18x128xf32, #tpu.memory_space<vmem>>, vector<16x16x128xf32>
    %82 = vector.shape_cast %81 : vector<16x16x128xf32> to vector<256x128xf32>
    %c0_124 = arith.constant 0 : index
    %c0_125 = arith.constant 0 : index
    %83 = vector.load %arg10[%c0_124, %c0_125] : memref<256x384xf32, #tpu.memory_space<vmem>>, vector<256x128xf32>
    tpu.vector_store %arg10[%c0_124, %c0_125], %82 {strides = array<i32>} : memref<256x384xf32, #tpu.memory_space<vmem>>, vector<256x128xf32>,
    %c1_126 = arith.constant 1 : index
    %c1_127 = arith.constant 1 : index
    %c0_128 = arith.constant 0 : index
    %84 = vector.load %arg9[%c1_126, %c1_127, %c0_128] : memref<18x18x128xf32, #tpu.memory_space<vmem>>, vector<16x16x128xf32>
    %85 = vector.shape_cast %84 : vector<16x16x128xf32> to vector<256x128xf32>
    %c0_129 = arith.constant 0 : index
    %c128_130 = arith.constant 128 : index
    %86 = vector.load %arg10[%c0_129, %c128_130] : memref<256x384xf32, #tpu.memory_space<vmem>>, vector<256x128xf32>
    tpu.vector_store %arg10[%c0_129, %c128_130], %85 {strides = array<i32>} : memref<256x384xf32, #tpu.memory_space<vmem>>, vector<256x128xf32>,
    %c1_131 = arith.constant 1 : index
    %c2_132 = arith.constant 2 : index
    %c0_133 = arith.constant 0 : index
    %87 = vector.load %arg9[%c1_131, %c2_132, %c0_133] : memref<18x18x128xf32, #tpu.memory_space<vmem>>, vector<16x16x128xf32>
    %88 = vector.shape_cast %87 : vector<16x16x128xf32> to vector<256x128xf32>
    %c0_134 = arith.constant 0 : index
    %c256_135 = arith.constant 256 : index
    %89 = vector.load %arg10[%c0_134, %c256_135] : memref<256x384xf32, #tpu.memory_space<vmem>>, vector<256x128xf32>
    tpu.vector_store %arg10[%c0_134, %c256_135], %88 {strides = array<i32>} : memref<256x384xf32, #tpu.memory_space<vmem>>, vector<256x128xf32>,
    %c0_136 = arith.constant 0 : index
    %c0_137 = arith.constant 0 : index
    %90 = vector.load %arg10[%c0_136, %c0_137] : memref<256x384xf32, #tpu.memory_space<vmem>>, vector<256x384xf32>
    %c1_138 = arith.constant 1 : index
    %c0_139 = arith.constant 0 : index
    %c0_140 = arith.constant 0 : index
    %91 = vector.load %arg3[%c1_138, %c0_139, %c0_140] : memref<3x384x128xf32, #tpu.memory_space<vmem>>, vector<1x384x128xf32>
    %92 = vector.shape_cast %91 : vector<1x384x128xf32> to vector<384x128xf32>
    %cst_141 = arith.constant dense<0.000000e+00> : vector<256x128xf32>
    %93 = tpu.matmul %90, %92, %cst_141 {dimension_numbers = #tpu.dot_dimension_numbers<[1], [0], [0], [1], [0, 0, 1, 1], [], []>} : vector<256x384xf32>, vector<384x128xf32>, vector<256x128xf32> -> vector<256x128xf32>
    %c0_142 = arith.constant 0 : index
    %c0_143 = arith.constant 0 : index
    %94 = vector.load %arg11[%c0_142, %c0_143] : memref<256x128xf32, #tpu.memory_space<vmem>>, vector<256x128xf32>
    %95 = arith.addf %94, %93 : vector<256x128xf32>
    %c0_144 = arith.constant 0 : index
    %c0_145 = arith.constant 0 : index
    %96 = vector.load %arg11[%c0_144, %c0_145] : memref<256x128xf32, #tpu.memory_space<vmem>>, vector<256x128xf32>
    tpu.vector_store %arg11[%c0_144, %c0_145], %95 {strides = array<i32>} : memref<256x128xf32, #tpu.memory_space<vmem>>, vector<256x128xf32>,
    %c2_146 = arith.constant 2 : index
    %c0_147 = arith.constant 0 : index
    %c0_148 = arith.constant 0 : index
    %97 = vector.load %arg9[%c2_146, %c0_147, %c0_148] : memref<18x18x128xf32, #tpu.memory_space<vmem>>, vector<16x16x128xf32>
    %98 = vector.shape_cast %97 : vector<16x16x128xf32> to vector<256x128xf32>
    %c0_149 = arith.constant 0 : index
    %c0_150 = arith.constant 0 : index
    %99 = vector.load %arg10[%c0_149, %c0_150] : memref<256x384xf32, #tpu.memory_space<vmem>>, vector<256x128xf32>
    tpu.vector_store %arg10[%c0_149, %c0_150], %98 {strides = array<i32>} : memref<256x384xf32, #tpu.memory_space<vmem>>, vector<256x128xf32>,
    %c2_151 = arith.constant 2 : index
    %c1_152 = arith.constant 1 : index
    %c0_153 = arith.constant 0 : index
    %100 = vector.load %arg9[%c2_151, %c1_152, %c0_153] : memref<18x18x128xf32, #tpu.memory_space<vmem>>, vector<16x16x128xf32>
    %101 = vector.shape_cast %100 : vector<16x16x128xf32> to vector<256x128xf32>
    %c0_154 = arith.constant 0 : index
    %c128_155 = arith.constant 128 : index
    %102 = vector.load %arg10[%c0_154, %c128_155] : memref<256x384xf32, #tpu.memory_space<vmem>>, vector<256x128xf32>
    tpu.vector_store %arg10[%c0_154, %c128_155], %101 {strides = array<i32>} : memref<256x384xf32, #tpu.memory_space<vmem>>, vector<256x128xf32>,
    %c2_156 = arith.constant 2 : index
    %c2_157 = arith.constant 2 : index
    %c0_158 = arith.constant 0 : index
    %103 = vector.load %arg9[%c2_156, %c2_157, %c0_158] : memref<18x18x128xf32, #tpu.memory_space<vmem>>, vector<16x16x128xf32>
    %104 = vector.shape_cast %103 : vector<16x16x128xf32> to vector<256x128xf32>
    %c0_159 = arith.constant 0 : index
    %c256_160 = arith.constant 256 : index
    %105 = vector.load %arg10[%c0_159, %c256_160] : memref<256x384xf32, #tpu.memory_space<vmem>>, vector<256x128xf32>
    tpu.vector_store %arg10[%c0_159, %c256_160], %104 {strides = array<i32>} : memref<256x384xf32, #tpu.memory_space<vmem>>, vector<256x128xf32>,
    %c0_161 = arith.constant 0 : index
    %c0_162 = arith.constant 0 : index
    %106 = vector.load %arg10[%c0_161, %c0_162] : memref<256x384xf32, #tpu.memory_space<vmem>>, vector<256x384xf32>
    %c2_163 = arith.constant 2 : index
    %c0_164 = arith.constant 0 : index
    %c0_165 = arith.constant 0 : index
    %107 = vector.load %arg3[%c2_163, %c0_164, %c0_165] : memref<3x384x128xf32, #tpu.memory_space<vmem>>, vector<1x384x128xf32>
    %108 = vector.shape_cast %107 : vector<1x384x128xf32> to vector<384x128xf32>
    %cst_166 = arith.constant dense<0.000000e+00> : vector<256x128xf32>
    %109 = tpu.matmul %106, %108, %cst_166 {dimension_numbers = #tpu.dot_dimension_numbers<[1], [0], [0], [1], [0, 0, 1, 1], [], []>} : vector<256x384xf32>, vector<384x128xf32>, vector<256x128xf32> -> vector<256x128xf32>
    %c0_167 = arith.constant 0 : index
    %c0_168 = arith.constant 0 : index
    %110 = vector.load %arg11[%c0_167, %c0_168] : memref<256x128xf32, #tpu.memory_space<vmem>>, vector<256x128xf32>
    %111 = arith.addf %110, %109 : vector<256x128xf32>
    %c0_169 = arith.constant 0 : index
    %c0_170 = arith.constant 0 : index
    %112 = vector.load %arg11[%c0_169, %c0_170] : memref<256x128xf32, #tpu.memory_space<vmem>>, vector<256x128xf32>
    tpu.vector_store %arg11[%c0_169, %c0_170], %111 {strides = array<i32>} : memref<256x128xf32, #tpu.memory_space<vmem>>, vector<256x128xf32>,
    %c0_171 = arith.constant 0 : index
    %c0_172 = arith.constant 0 : index
    %113 = vector.load %arg11[%c0_171, %c0_172] : memref<256x128xf32, #tpu.memory_space<vmem>>, vector<256x128xf32>
    %c0_173 = arith.constant 0 : index
    %c0_174 = arith.constant 0 : index
    %114 = vector.load %arg6[%c0_173, %c0_174] : memref<1x128xf32, #tpu.memory_space<vmem>>, vector<1x128xf32>
    %115 = vector.broadcast %114 : vector<1x128xf32> to vector<256x128xf32>
    %116 = arith.mulf %113, %115 : vector<256x128xf32>
    %c0_175 = arith.constant 0 : index
    %c0_176 = arith.constant 0 : index
    %117 = vector.load %arg7[%c0_175, %c0_176] : memref<1x128xf32, #tpu.memory_space<vmem>>, vector<1x128xf32>
    %118 = vector.broadcast %117 : vector<1x128xf32> to vector<256x128xf32>
    %119 = arith.addf %116, %118 : vector<256x128xf32>
    %120 = vector.shape_cast %119 : vector<256x128xf32> to vector<16x16x128xf32>
    %c0_177 = arith.constant 0 : index
    %c0_178 = arith.constant 0 : index
    %c0_179 = arith.constant 0 : index
    %c0_180 = arith.constant 0 : index
    %121 = vector.load %arg1[%c0_177, %c0_178, %c0_179, %c0_180] : memref<1x16x16x128xf32, #tpu.memory_space<vmem>>, vector<1x16x16x128xf32>
    %122 = vector.shape_cast %121 : vector<1x16x16x128xf32> to vector<16x16x128xf32>
    %123 = arith.addf %120, %122 : vector<16x16x128xf32>
    %cst_181 = arith.constant 0.000000e+00 : f32
    %124 = vector.broadcast %cst_181 : f32 to vector<16x16x128xf32>
    %125 = arith.maximumf %123, %124 : vector<16x16x128xf32>
    %126 = vector.shape_cast %125 : vector<16x16x128xf32> to vector<1x16x16x128xf32>
    %c0_182 = arith.constant 0 : index
    %c0_183 = arith.constant 0 : index
    %c0_184 = arith.constant 0 : index
    %c0_185 = arith.constant 0 : index
    %127 = vector.load %arg8[%c0_182, %c0_183, %c0_184, %c0_185] : memref<1x16x16x128xf32, #tpu.memory_space<vmem>>, vector<1x16x16x128xf32>
    tpu.vector_store %arg8[%c0_182, %c0_183, %c0_184, %c0_185], %126 {strides = array<i32>} : memref<1x16x16x128xf32, #tpu.memory_space<vmem>>, vector<1x16x16x128xf32>,
    return
  }
  func.func @transform_0(%arg0: i32) -> (i32, i32, i32, i32) {
    %c0_i32 = arith.constant 0 : i32
    %c0_i32_0 = arith.constant 0 : i32
    %c0_i32_1 = arith.constant 0 : i32
    %c0_i32_2 = arith.constant 0 : i32
    return %arg0, %c0_i32, %c0_i32_0, %c0_i32_1 : i32, i32, i32, i32
  }
  func.func @transform_1(%arg0: i32) -> (i32, i32, i32) {
    %c0_i32 = arith.constant 0 : i32
    %c0_i32_0 = arith.constant 0 : i32
    %c0_i32_1 = arith.constant 0 : i32
    %c0_i32_2 = arith.constant 0 : i32
    return %c0_i32, %c0_i32_0, %c0_i32_1 : i32, i32, i32
  }
  func.func @transform_2(%arg0: i32) -> (i32, i32, i32) {
    %c0_i32 = arith.constant 0 : i32
    %c0_i32_0 = arith.constant 0 : i32
    %c0_i32_1 = arith.constant 0 : i32
    %c0_i32_2 = arith.constant 0 : i32
    return %c0_i32, %c0_i32_0, %c0_i32_1 : i32, i32, i32
  }
  func.func @transform_3(%arg0: i32) -> (i32, i32) {
    %c0_i32 = arith.constant 0 : i32
    %c0_i32_0 = arith.constant 0 : i32
    %c0_i32_1 = arith.constant 0 : i32
    return %c0_i32, %c0_i32_0 : i32, i32
  }
  func.func @transform_4(%arg0: i32) -> (i32, i32) {
    %c0_i32 = arith.constant 0 : i32
    %c0_i32_0 = arith.constant 0 : i32
    %c0_i32_1 = arith.constant 0 : i32
    return %c0_i32, %c0_i32_0 : i32, i32
  }
  func.func @transform_5(%arg0: i32) -> (i32, i32) {
    %c0_i32 = arith.constant 0 : i32
    %c0_i32_0 = arith.constant 0 : i32
    %c0_i32_1 = arith.constant 0 : i32
    return %c0_i32, %c0_i32_0 : i32, i32
  }
  func.func @transform_6(%arg0: i32) -> (i32, i32) {
    %c0_i32 = arith.constant 0 : i32
    %c0_i32_0 = arith.constant 0 : i32
    %c0_i32_1 = arith.constant 0 : i32
    return %c0_i32, %c0_i32_0 : i32, i32
  }
  func.func @transform_7(%arg0: i32) -> (i32, i32, i32, i32) {
    %c0_i32 = arith.constant 0 : i32
    %c0_i32_0 = arith.constant 0 : i32
    %c0_i32_1 = arith.constant 0 : i32
    %c0_i32_2 = arith.constant 0 : i32
    return %arg0, %c0_i32, %c0_i32_0, %c0_i32_1 : i32, i32, i32, i32
  }
}

</mosaic_0001>

<bundles_post_ra>
// kernel: tpu_custom_call.1
= control target key start
LH: loop header
LB: loop body
LE: loop exit
PB: predicated region body
PF: predicated region fallthrough
CT: control target
= control target key end

     0   :  { %12 = vsyncpa [#allocation6], 0  ;;  %s9952_s0 = inlined_call_operand.hbm [shape: f32[2,16,16,128], index: 0, kind: input, shape index: {}]   ;;  %s9953_s1 = inlined_call_operand.hbm [shape: f32[3,384,128], index: 1, kind: input, shape index: {}]   ;;  %s9954_s2 = inlined_call_operand.hbm [shape: f32[3,384,128], index: 2, kind: input, shape index: {}]   ;;  %s9955_s3 = inlined_call_operand.vmem [shape: f32[1,128], index: 3, kind: input, shape index: {}]   ;;  %s9956_s4 = inlined_call_operand.vmem [shape: f32[1,128], index: 4, kind: input, shape index: {}]   ;;  %s9957_s5 = inlined_call_operand.vmem [shape: f32[1,128], index: 5, kind: input, shape index: {}]   ;;  %s9958_s6 = inlined_call_operand.vmem [shape: f32[1,128], index: 6, kind: input, shape index: {}]   ;;  %s9959_s7 = inlined_call_operand.hbm [shape: f32[2,16,16,128], index: 7, kind: output, shape index: {}]  }
   0x1   :  { %14 = vsyncpa [#allocation6 + $0x1], 0 }
   0x2   :  { %15 = vsyncpa [#allocation9], 0 }
   0x3   :  { %16 = vsyncpa [#allocation7], 0 }
   0x4   :  { %18 = vsyncpa [#allocation7 + $0x1], 0  ;;  %s7678_s24 = smov 0   ;;  %s7680_s25 = smov 0  }
   0x5   :  { %s7682_s26 = smov 0   ;;  %s7684_s27 = smov 0  }
   0x6 LB: > { %s7699_s28 = sadd.s32 4294967295, %s7626_s27   ;;  %s6121_s29 = sadd.s32 4294967294, %s7626_s27   ;;  %s7626_s27 = sphi %s7684_s27, %s10084_s27   ;;  %s7622_s26 = sphi %s7682_s26, %s10083_s26   ;;  %s7618_s25 = sphi %s7680_s25, %s10082_s25   ;;  %s7614_s24 = sphi %s7678_s24, %s10081_s24  }
   0x7   : > { %p44_p0 = scmp.ne.s32.totalorder %s7618_s25, %s7614_s24  ;;  %p9960_p1 = scmp.eq.s32.totalorder %s7699_s28, 0 }
   0x8   : > { %p200_p3 = scmp.eq.s32.totalorder %s6121_s29, 1  ;;  %p6122_p5 = scmp.ge.s32.totalorder %s7626_s27, 1 }
   0x9   : > { %p7708_p4 = por %p9960_p1, %p44_p0  ;;  %p207_p7 = scmp.lt.s32.totalorder %s7626_s27, 3 }
   0xa   : > { %p7713_p6 = por %p200_p3, %p44_p0  ;;  %s7628_s10 = smov [#allocation8]  }
   0xb   : > { %s9998_s30 = scalar_select %p7708_p4, 1, 0 }
   0xc   : > { %s9999_s8 = scalar_select %p7713_p6, 1, 0 }
   0xd   : > { %p7718_p8 = pnand %p6122_p5, %p207_p7  ;;  %s219_s11 = sshll.u32 %s7628_s10, 4  ;;  %s7722_s11 = int_to_ptr.vmem [resolvable:$true] %s219_s11 }
   0xe   : > { %s7629_s13 = smov [#allocation10]   ;;  %s7470_s17 = scalar_lea.hbm %s9953_s1, 18432 }
   0xf   : > { %p7405_p9 = pneg %p7718_p8  ;;  %s232_s14 = sshll.u32 %s7629_s13, 4  ;;  %s7733_s14 = int_to_ptr.vmem [resolvable:$true] %s232_s14 }
  0x10   : > { %p7471_p12 = scmp.ne.s32.totalorder %s9953_s1, %s7470_s17  ;;  %p7477_p5 = scmp.lt.u32.totalorder %s7470_s17, %s9953_s1 }
  0x11   : > { %p7729_p11 = pnand %p7405_p9, %p9960_p1 }
  0x13   : > { %p7472_p13 = pneg %p7729_p11 }
  0x15   : > { %p7473_p0 = pnand %p7472_p13, %p7471_p12 }
  0x17   : > { %p7474_p3 = pneg %p7473_p0 }
  0x19   : > { %p7479_p7 = pnand %p7477_p5, %p7474_p3 }
  0x1b   : > { %7482 = shalt.err (!%p7479_p7)
}
  0x1c   : > { %s7483_s22 = scalar_lea.vmem %s7722_s11, 18432  ;;  %p7491_p2 = scmp.lt.s32.totalorder %s7722_s11, %s7722_s11 }
  0x1d   : > { %p7484_p9 = scmp.ne.s32.totalorder %s7722_s11, %s7483_s22  ;;  %p7492_p12 = scmp.lt.s32.totalorder %s7483_s22, %s7483_s22 }
  0x1f   : > { %p7486_p10 = pnand %p7484_p9, %p7472_p13  ;;  %p7493_p0 = por %p7492_p12, %p7491_p2 }
  0x21   : > { %p7487_p1 = pneg %p7486_p10 }
  0x23   : > { %p7494_p6 = pnand %p7493_p0, %p7487_p1 }
  0x25   : > { %7497 = shalt.err (!%p7494_p6)
}
  0x26   : > { %s9961_s23 = smov 128   ;;  %s7631_s29 = smov 8  }
  0x27   : > { %7408 = dma.hbm_to_vmem [thread:$0]  (!%p7729_p11), %s9953_s1, 18432, %s7722_s11, [#allocation9], %s9961_s23, %s9961_s23, %s7631_s29  }
  0x28   : > { %s7498_s17 = scalar_lea.hbm %s9954_s2, 18432 }
  0x29   : > { %p7499_p1 = scmp.ne.s32.totalorder %s9954_s2, %s7498_s17  ;;  %p7505_p10 = scmp.lt.u32.totalorder %s7498_s17, %s9954_s2 }
  0x2b   : > { %p7501_p2 = pnand %p7499_p1, %p7472_p13 }
  0x2d   : > { %p7502_p6 = pneg %p7501_p2 }
  0x2f   : > { %p7507_p3 = pnand %p7505_p10, %p7502_p6 }
  0x31   : > { %7510 = shalt.err (!%p7507_p3)
}
  0x32   : > { %s7511_s11 = scalar_lea.vmem %s7733_s14, 18432  ;;  %p7519_p12 = scmp.lt.s32.totalorder %s7733_s14, %s7733_s14 }
  0x33   : > { %p7512_p5 = scmp.ne.s32.totalorder %s7733_s14, %s7511_s11  ;;  %p7520_p0 = scmp.lt.s32.totalorder %s7511_s11, %s7511_s11 }
  0x35   : > { %p7514_p7 = pnand %p7512_p5, %p7472_p13  ;;  %p7521_p1 = por %p7520_p0, %p7519_p12 }
  0x37   : > { %p7515_p9 = pneg %p7514_p7 }
  0x39   : > { %p7522_p2 = pnand %p7521_p1, %p7515_p9 }
  0x3b   : > { %7525 = shalt.err (!%p7522_p2)
}
  0x3c   : > { %7411 = dma.hbm_to_vmem [thread:$0]  (!%p7729_p11), %s9954_s2, 18432, %s7733_s14, [#allocation9], %s9961_s23, %s9961_s23, %s7631_s29  }
  0x3d   : > { %s7794_s12 = sadd.s32 1, %s7626_s27   ;;  %s31_s13 = sadd.s32 1, %s7622_s26 }
  0x3e   : > { %s28_s15 = ssub.s32 %s7626_s27, %s7794_s12  ;;  %p38_p13 = scmp.ne.s32.totalorder %s7622_s26, %s7618_s25 }
  0x3f   : > { %p29_p6 = scmp.eq.s32.totalorder %s28_s15, 0  ;;  %p39_p10 = scmp.eq.s32.totalorder %s7626_s27, 0 }
  0x40   : > { %p10002_p3 = scmp.eq.s32.totalorder %s7699_s28, 1  ;;  %p7422_p7 = scmp.lt.s32.totalorder %s7626_s27, 2 }
  0x41   : > { %s7810_s17 = scalar_select %p29_p6, %s7622_s26, %s31_s13  }
  0x42   : > { %p7804_p5 = por %p10002_p3, %p38_p13  ;;  %p40_p9 = por %p39_p10, %p38_p13 }
  0x43   : > { %s258_s18 = sand.u32 1, %s7622_s26   ;;  %s6143_s14 = sshll.u32 %s7626_s27, 12 }
  0x44   : > { %s10003_s16 = scalar_select %p7804_p5, 1, 0 }
  0x45   : > { %s6126_s19 = sshll.u32 %s258_s18, 8  ;;  %s7817_s11 = scalar_lea.hbm %s9952_s0, %s6143_s14 }
  0x46   : > { %s262_s22 = scalar_lea.vmem [#allocation5], %s6126_s19  ;;  %p7821_p11 = pnand %p7422_p7, %p40_p9 }
  0x47   : > { %s269_s10 = sshll.u32 %s262_s22, 4  ;;  %s7825_s15 = scalar_lea.sflag [#allocation6], %s258_s18  ;;  %s7819_s10 = int_to_ptr.vmem [resolvable:$true] %s269_s10 }
  0x48   : > { %s7526_s23 = scalar_lea.hbm %s7817_s11, 4096  ;;  %p7528_p0 = pneg %p7821_p11 }
  0x49   : > { %p7527_p12 = scmp.ne.s32.totalorder %s7817_s11, %s7526_s23  ;;  %s7531_s20 = scalar_lea.hbm %s9952_s0, 8192 }
  0x4a   : > { %p7532_p13 = scmp.lt.u32.totalorder %s7817_s11, %s9952_s0  ;;  %p7533_p6 = scmp.lt.u32.totalorder %s7531_s20, %s7526_s23 }
  0x4b   : > { %p7529_p1 = pnand %p7528_p0, %p7527_p12  ;;  %p7535_p3 = scmp.lt.u32.totalorder %s7526_s23, %s7817_s11 }
  0x4c   : > { %p7534_p10 = por %p7533_p6, %p7532_p13 }
  0x4d   : > { %p7530_p2 = pneg %p7529_p1 }
  0x4e   : > { %p7536_p7 = por %p7535_p3, %p7534_p10 }
  0x50   : > { %p7537_p9 = pnand %p7536_p7, %p7530_p2 }
  0x52   : > { %7540 = shalt.err (!%p7537_p9)
}
  0x53   : > { %s7541_s18 = scalar_lea.vmem %s7819_s10, 4096  ;;  %s7632_s19 = smov [#allocation5]  }
  0x54   : > { %p7542_p12 = scmp.ne.s32.totalorder %s7819_s10, %s7541_s18  ;;  %s7546_s14 = sshll.u32 %s7632_s19, 4  ;;  %s7547_s14 = int_to_ptr.vmem [resolvable:$false] %s7546_s14 }
  0x55   : > { %s7548_s21 = scalar_lea.vmem %s7547_s14, 8192  ;;  %p7549_p4 = scmp.lt.s32.totalorder %s7819_s10, %s7547_s14 }
  0x56   : > { %p7544_p1 = pnand %p7542_p12, %p7528_p0  ;;  %p7550_p13 = scmp.lt.s32.totalorder %s7548_s21, %s7541_s18 }
  0x58   : > { %p7545_p5 = pneg %p7544_p1  ;;  %p7551_p6 = por %p7550_p13, %p7549_p4 }
  0x5a   : > { %p7552_p10 = pnand %p7551_p6, %p7545_p5 }
  0x5c   : > { %7555 = shalt.err (!%p7552_p10)
}
  0x5d   : > { %s10005_s23 = smov 128   ;;  %281 = sbr.rel (%p7718_p8) target bundleno = 1144 (0x478), region = 48 }
  0x5e   : > { %7415 = dma.hbm_to_vmem [thread:$0]  (!%p7821_p11), %s7817_s11, 4096, %s7819_s10, %s7825_s15, %s10005_s23, %s10005_s23, %s7631_s29  }
  0x64   : > { %s7859_s20 = sand.u32 1, %s7618_s25   ;;  %p10006_p4 = scmp.ne.s32.totalorder %s9998_s30, 0 }
  0x65   : > { %s6130_s22 = sshll.u32 %s7859_s20, 8  ;;  %s284_s18 = scalar_lea.sflag [#allocation6], %s7859_s20 }
  0x66   : > { %s7865_s13 = scalar_lea.vmem [#allocation5], %s6130_s22 }
  0x67   : > { %7601 = dma.done.wait (%p10006_p4), %s284_s18, 4096  }
  0x68   : > { %7603 = vsyncadd (%p10006_p4), %s284_s18, 4294963200  ;;  %p10007_p5 = scmp.eq.s32.totalorder %s7699_s28, 0 }
  0x6a   : > { %7605 = dma.done.wait (%p10007_p5), [#allocation9], 36864   ;;  %p10008_p8 = pmov %p10007_p5 }
  0x6b   : > { %v9964_v0 = vmov 0.0|0.0   ;;  %v7634_v1 = vmov 0.0   ;;  %v722_v2 = vld [vmem:[#allocation8] sm:$0xff]  ;;  %v723_v3 = vld [vmem:[#allocation8 + $0x8] sm:$0xff]  ;;  %v724_v7 = vld [vmem:[#allocation8 + $0x10] sm:$0xff]  ;;  %s9742_s21 = scalar_lea.vmem [#allocation11], %s6130_s22 }
  0x6c   : > { %7607 = vsyncadd (%p10008_p8), [#allocation9], 4294930432  ;;  %6913 = vmatprep.subr.bf16.mxu0 %v9964_v0  ;;  %326 = vst [vmem:[#allocation2] sm:$0xff] %v7634_v1  ;;  %v754_v4 = vld [vmem:[#allocation8 + $0x100] sm:$0xff]  ;;  %v6914_v5 = vpack.c.bf16 %v723_v3, %v722_v2  ;;  %v755_v6 = vld [vmem:[#allocation8 + $0x108] sm:$0xff]  ;;  %s6144_s23 = sshll.u32 %s7699_s28, 12 }
  0x6d   : > { %327 = vst [vmem:[#allocation2 + $0x8] sm:$0xff] %v7634_v1  ;;  %328 = vst [vmem:[#allocation2 + $0x10] sm:$0x3] %v7634_v1  ;;  %v725_v8 = vld [vmem:[#allocation8 + $0x18] sm:$0xff]  ;;  %v6961_v9 = vpack.c.bf16 %v755_v6, %v754_v4  ;;  %v756_v10 = vld [vmem:[#allocation8 + $0x110] sm:$0xff]  ;;  %s6029_s22 = sshll.u32 %s9742_s21, 4  ;;  %s9905_s9 = scalar_lea.hbm %s9959_s7, %s6144_s23  ;;  %s9907_s22 = int_to_ptr.vmem [resolvable:$true] %s6029_s22 }
  0x6e   : > { %330 = vst [vmem:[#allocation2 + $0x198] sm:$0xff] %v7634_v1  ;;  %331 = vst [vmem:[#allocation2 + $0x1a0] sm:$0xff] %v7634_v1  ;;  %v757_v11 = vld [vmem:[#allocation8 + $0x118] sm:$0xff]  ;;  %6915 = vmatpush1.bf16.msra.mxu0 %v6914_v5  ;;  %v6917_v12 = vpack.c.bf16 %v725_v8, %v724_v7  ;;  %v758_v14 = vld [vmem:[#allocation8 + $0x120] sm:$0xff]  ;;  %s7556_s29 = scalar_lea.vmem %s9907_s22, 4096  ;;  %p10078_p0 = scmp.ne.s32.totalorder %s10003_s16, 0 }
  0x6f   : > { %332 = vst [vmem:[#allocation2 + $0x1a8] sm:$0x3] %v7634_v1  ;;  %334 = vst [vmem:[#allocation2 + $0x18] sm:$0x1] %v7634_v1  ;;  %v6965_v13 = vpack.c.bf16 %v757_v11, %v756_v10  ;;  %v759_v15 = vld [vmem:[#allocation8 + $0x128] sm:$0xff]  ;;  %6962 = vmatprep.subr.bf16.mxu1 %v6961_v9  ;;  %6916 = vmatprep.subr.bf16.mxu0 %v9964_v0  ;;  %v726_v16 = vld [vmem:[#allocation8 + $0x20] sm:$0xff]  ;;  %p7557_p11 = scmp.ne.s32.totalorder %s9907_s22, %s7556_s29 }
  0x70   : > { %335 = vst [vmem:[#allocation2 + $0x30] sm:$0x1] %v7634_v1  ;;  %336 = vst [vmem:[#allocation2 + $0x48] sm:$0x1] %v7634_v1  ;;  %v727_v17 = vld [vmem:[#allocation8 + $0x28] sm:$0xff]  ;;  %6964 = vmatpush3.bf16.msra.mxu1 %v6961_v9  ;;  %v6969_v18 = vpack.c.bf16 %v759_v15, %v758_v14  ;;  %v760_v20 = vld [vmem:[#allocation8 + $0x130] sm:$0xff] }
  0x71   : > { %337 = vst [vmem:[#allocation2 + $0x60] sm:$0x1] %v7634_v1  ;;  %338 = vst [vmem:[#allocation2 + $0x78] sm:$0x1] %v7634_v1  ;;  %6966 = vmatprep.subr.bf16.mxu1 %v6965_v13  ;;  %v6920_v19 = vpack.c.bf16 %v727_v17, %v726_v16  ;;  %v761_v21 = vld [vmem:[#allocation8 + $0x138] sm:$0xff]  ;;  %v728_v22 = vld [vmem:[#allocation8 + $0x30] sm:$0xff]  ;;  %p7558_p2 = pnand %p7557_p11, %p10078_p0 }
  0x72   : > { %339 = vst [vmem:[#allocation2 + $0x90] sm:$0x1] %v7634_v1  ;;  %340 = vst [vmem:[#allocation2 + $0xa8] sm:$0x1] %v7634_v1  ;;  %6918 = vmatpush1.bf16.msra.mxu0 %v6917_v12  ;;  %v729_v23 = vld [vmem:[#allocation8 + $0x38] sm:$0xff]  ;;  %v6973_v24 = vpack.c.bf16 %v761_v21, %v760_v20  ;;  %v762_v27 = vld [vmem:[#allocation8 + $0x140] sm:$0xff] }
  0x73   : > { %341 = vst [vmem:[#allocation2 + $0xc0] sm:$0x1] %v7634_v1  ;;  %342 = vst [vmem:[#allocation2 + $0xd8] sm:$0x1] %v7634_v1  ;;  %6919 = vmatprep.subr.bf16.mxu0 %v9964_v0  ;;  %v6923_v26 = vpack.c.bf16 %v729_v23, %v728_v22  ;;  %v763_v28 = vld [vmem:[#allocation8 + $0x148] sm:$0xff]  ;;  %v730_v29 = vld [vmem:[#allocation8 + $0x40] sm:$0xff]  ;;  %p7559_p3 = pneg %p7558_p2 }
  0x74   : > { %343 = vst [vmem:[#allocation2 + $0xf0] sm:$0x1] %v7634_v1  ;;  %344 = vst [vmem:[#allocation2 + $0x108] sm:$0x1] %v7634_v1  ;;  %6968 = vmatpush3.bf16.msra.mxu1 %v6965_v13  ;;  %v562_v25 = vld [vmem:[#allocation2 + $0x2] sm:$0xff]  ;;  %v731_v30 = vld [vmem:[#allocation8 + $0x48] sm:$0xff]  ;;  %v6977_v33 = vpack.c.bf16 %v763_v28, %v762_v27 }
  0x75   : > { %345 = vst [vmem:[#allocation2 + $0x120] sm:$0x1] %v7634_v1  ;;  %346 = vst [vmem:[#allocation2 + $0x138] sm:$0x1] %v7634_v1  ;;  %6970 = vmatprep.subr.bf16.mxu1 %v6969_v18  ;;  %6465 = vmatprep.mubr.f32.mxu1 %v562_v25  ;;  %v7922_v31 = vld [vmem:[%s7865_s13] sm:$0xff]  ;;  %v7925_v32 = vld [vmem:[%s7865_s13 + $0x8] sm:$0xff]  ;;  %v6926_v35 = vpack.c.bf16 %v731_v30, %v730_v29 }
  0x76   : > { %347 = vst [vmem:[#allocation2 + $0x150] sm:$0x1] %v7634_v1  ;;  %348 = vst [vmem:[#allocation2 + $0x168] sm:$0x1] %v7634_v1  ;;  %6921 = vmatpush1.bf16.msra.mxu0 %v6920_v19  ;;  %v7930_v34 = vld [vmem:[%s7865_s13 + $0x10] sm:$0xff]  ;;  %v765_v37 = vld [vmem:[#allocation8 + $0x158] sm:$0xff] }
  0x77   : > { %349 = vst [vmem:[#allocation2 + $0x180] sm:$0x1] %v7634_v1  ;;  %352 = vst [vmem:[#allocation2 + $0x29] sm:$0x1] %v7634_v1  ;;  %6922 = vmatprep.subr.bf16.mxu0 %v9964_v0  ;;  %v764_v36 = vld [vmem:[#allocation8 + $0x150] sm:$0xff]  ;;  %v7933_v38 = vld [vmem:[%s7865_s13 + $0x18] sm:$0xff] }
  0x78   : > { %353 = vst [vmem:[#allocation2 + $0x41] sm:$0x1] %v7634_v1  ;;  %354 = vst [vmem:[#allocation2 + $0x59] sm:$0x1] %v7634_v1  ;;  %6972 = vmatpush3.bf16.msra.mxu1 %v6969_v18  ;;  %v732_v39 = vld [vmem:[#allocation8 + $0x50] sm:$0xff]  ;;  %v733_v40 = vld [vmem:[#allocation8 + $0x58] sm:$0xff]  ;;  %v6981_v43 = vpack.c.bf16 %v765_v37, %v764_v36 }
  0x79   : > { %355 = vst [vmem:[#allocation2 + $0x71] sm:$0x1] %v7634_v1  ;;  %356 = vst [vmem:[#allocation2 + $0x89] sm:$0x1] %v7634_v1  ;;  %6974 = vmatprep.subr.bf16.mxu1 %v6973_v24  ;;  %v7939_v41 = vld [vmem:[%s7865_s13 + $0x20] sm:$0xff]  ;;  %v7942_v42 = vld [vmem:[%s7865_s13 + $0x28] sm:$0xff]  ;;  %v6929_v45 = vpack.c.bf16 %v733_v40, %v732_v39 }
  0x7a   : > { %357 = vst [vmem:[#allocation2 + $0xa1] sm:$0x1] %v7634_v1  ;;  %358 = vst [vmem:[#allocation2 + $0xb9] sm:$0x1] %v7634_v1  ;;  %6924 = vmatpush1.bf16.msra.mxu0 %v6923_v26  ;;  %v7947_v44 = vld [vmem:[%s7865_s13 + $0x30] sm:$0xff]  ;;  %v766_v46 = vld [vmem:[#allocation8 + $0x160] sm:$0xff] }
  0x7b   : > { %359 = vst [vmem:[#allocation2 + $0xd1] sm:$0x1] %v7634_v1  ;;  %360 = vst [vmem:[#allocation2 + $0xe9] sm:$0x1] %v7634_v1  ;;  %6925 = vmatprep.subr.bf16.mxu0 %v9964_v0  ;;  %v767_v47 = vld [vmem:[#allocation8 + $0x168] sm:$0xff]  ;;  %v7950_v48 = vld [vmem:[%s7865_s13 + $0x38] sm:$0xff] }
  0x7c   : > { %361 = vst [vmem:[#allocation2 + $0x101] sm:$0x1] %v7634_v1  ;;  %362 = vst [vmem:[#allocation2 + $0x119] sm:$0x1] %v7634_v1  ;;  %6976 = vmatpush3.bf16.msra.mxu1 %v6973_v24  ;;  %v734_v49 = vld [vmem:[#allocation8 + $0x60] sm:$0xff]  ;;  %v735_v50 = vld [vmem:[#allocation8 + $0x68] sm:$0xff]  ;;  %v6985_v53 = vpack.c.bf16 %v767_v47, %v766_v46 }
  0x7d   : > { %363 = vst [vmem:[#allocation2 + $0x131] sm:$0x1] %v7634_v1  ;;  %364 = vst [vmem:[#allocation2 + $0x149] sm:$0x1] %v7634_v1  ;;  %6978 = vmatprep.subr.bf16.mxu1 %v6977_v33  ;;  %v7956_v51 = vld [vmem:[%s7865_s13 + $0x40] sm:$0xff]  ;;  %v7959_v52 = vld [vmem:[%s7865_s13 + $0x48] sm:$0xff]  ;;  %v6932_v54 = vpack.c.bf16 %v735_v50, %v734_v49 }
  0x7e   : > { %365 = vst [vmem:[#allocation2 + $0x161] sm:$0x1] %v7634_v1  ;;  %366 = vst [vmem:[#allocation2 + $0x179] sm:$0x1] %v7634_v1  ;;  %6927 = vmatpush1.bf16.msra.mxu0 %v6926_v35  ;;  %v736_v55 = vld [vmem:[#allocation8 + $0x70] sm:$0xff]  ;;  %v769_v57 = vld [vmem:[#allocation8 + $0x178] sm:$0xff] }
  0x7f   : > { %367 = vst [vmem:[#allocation2 + $0x191] sm:$0x1] %v7634_v1  ;;  %333 = vst [vmem:[#allocation2] sm:$0x1] %v7634_v1  ;;  %6928 = vmatprep.subr.bf16.mxu0 %v9964_v0  ;;  %v768_v56 = vld [vmem:[#allocation8 + $0x170] sm:$0xff]  ;;  %v737_v58 = vld [vmem:[#allocation8 + $0x78] sm:$0xff] }
  0x80   : > { %350 = vst [vmem:[#allocation2 + $0x198] sm:$0x1] %v7634_v1  ;;  %351 = vst [vmem:[#allocation2 + $0x11] sm:$0x1] %v7634_v1  ;;  %6980 = vmatpush3.bf16.msra.mxu1 %v6977_v33  ;;  %v7965_v59 = vld [vmem:[%s7865_s13 + $0x50] sm:$0xff]  ;;  %v7968_v60 = vld [vmem:[%s7865_s13 + $0x58] sm:$0xff]  ;;  %v6989_v61 = vpack.c.bf16 %v769_v57, %v768_v56  ;;  %v6935_v63 = vpack.c.bf16 %v737_v58, %v736_v55 }
  0x81   : > { %368 = vst [vmem:[#allocation2 + $0x1a9] sm:$0x1] %v7634_v1  ;;  %402 = vst [vmem:[#allocation2 + $0x19] sm:$0xff] %v7922_v31  ;;  %6982 = vmatprep.subr.bf16.mxu1 %v6981_v43  ;;  %v7973_v62 = vld [vmem:[%s7865_s13 + $0x60] sm:$0xff]  ;;  %v7976_v2 = vld [vmem:[%s7865_s13 + $0x68] sm:$0xff]  ;;  %s7635_s28 = smov [#allocation11]  }
  0x82   : > { %403 = vst [vmem:[#allocation2 + $0x21] sm:$0xff] %v7925_v32  ;;  %404 = vst [vmem:[#allocation2 + $0x31] sm:$0xff] %v7930_v34  ;;  %6930 = vmatpush1.bf16.msra.mxu0 %v6929_v45  ;;  %v738_v3 = vld [vmem:[#allocation8 + $0x80] sm:$0xff]  ;;  %v739_v4 = vld [vmem:[#allocation8 + $0x88] sm:$0xff]  ;;  %s7560_s11 = sshll.u32 %s7635_s28, 4  ;;  %s7561_s11 = int_to_ptr.vmem [resolvable:$false] %s7560_s11 }
  0x83   : > { %405 = vst [vmem:[#allocation2 + $0x39] sm:$0xff] %v7933_v38  ;;  %406 = vst [vmem:[#allocation2 + $0x49] sm:$0xff] %v7939_v41  ;;  %6931 = vmatprep.subr.bf16.mxu0 %v9964_v0  ;;  %v1541_v5 = vld [vmem:[#allocation8 + $0x180] sm:$0xff]  ;;  %v1542_v6 = vld [vmem:[#allocation8 + $0x188] sm:$0xff]  ;;  %v6938_v9 = vpack.c.bf16 %v739_v4, %v738_v3  ;;  %s7562_s10 = scalar_lea.vmem %s7561_s11, 8192  ;;  %p7563_p7 = scmp.lt.s32.totalorder %s9907_s22, %s7561_s11 }
  0x84   : > { %407 = vst [vmem:[#allocation2 + $0x51] sm:$0xff] %v7942_v42  ;;  %408 = vst [vmem:[#allocation2 + $0x61] sm:$0xff] %v7947_v44  ;;  %6984 = vmatpush3.bf16.msra.mxu1 %v6981_v43  ;;  %v498_v7 = vld [vmem:[#allocation2 + $0x1] sm:$0xff]  ;;  %v6994_v14 = vpack.c.bf16 %v1542_v6, %v1541_v5  ;;  %v7991_v16 = vld [vmem:[%s7865_s13 + $0x80] sm:$0xff]  ;;  %p7564_p9 = scmp.lt.s32.totalorder %s7562_s10, %s7556_s29 }
  0x85   : > { %409 = vst [vmem:[#allocation2 + $0x69] sm:$0xff] %v7950_v48  ;;  %410 = vst [vmem:[#allocation2 + $0x79] sm:$0xff] %v7956_v51  ;;  %6986 = vmatprep.subr.bf16.mxu1 %v6985_v53  ;;  %v7982_v8 = vld [vmem:[%s7865_s13 + $0x70] sm:$0xff]  ;;  %834 = vmatprep.mubr.f32.mxu0 %v498_v7  ;;  %v7985_v10 = vld [vmem:[%s7865_s13 + $0x78] sm:$0xff] }
  0x86   : > { %411 = vst [vmem:[#allocation2 + $0x81] sm:$0xff] %v7959_v52  ;;  %412 = vst [vmem:[#allocation2 + $0x91] sm:$0xff] %v7965_v59  ;;  %6933 = vmatpush1.bf16.msra.mxu0 %v6932_v54  ;;  %v740_v11 = vld [vmem:[#allocation8 + $0x90] sm:$0xff]  ;;  %v741_v12 = vld [vmem:[#allocation8 + $0x98] sm:$0xff]  ;;  %p7565_p12 = por %p7564_p9, %p7563_p7 }
  0x87   : > { %413 = vst [vmem:[#allocation2 + $0x99] sm:$0xff] %v7968_v60  ;;  %414 = vst [vmem:[#allocation2 + $0xa9] sm:$0xff] %v7973_v62  ;;  %6934 = vmatprep.subr.bf16.mxu0 %v9964_v0  ;;  %v563_v13 = vld [vmem:[#allocation2 + $0xa] sm:$0xff]  ;;  %v1543_v15 = vld [vmem:[#allocation8 + $0x190] sm:$0xff]  ;;  %v6941_v20 = vpack.c.bf16 %v741_v12, %v740_v11 }
  0x88   : > { %415 = vst [vmem:[#allocation2 + $0xb1] sm:$0xff] %v7976_v2  ;;  %6988 = vmatpush3.bf16.msra.mxu1 %v6985_v53  ;;  %416 = vst [vmem:[#allocation2 + $0xc1] sm:$0xff] %v7982_v8  ;;  %v1544_v18 = vld [vmem:[#allocation8 + $0x198] sm:$0xff]  ;;  %v7995_v19 = vld [vmem:[%s7865_s13 + $0x88] sm:$0xff]  ;;  %p7566_p1 = pnand %p7565_p12, %p7559_p3 }
  0x89   : > { %6990 = vmatprep.subr.bf16.mxu1 %v6989_v61  ;;  %417 = vst [vmem:[#allocation2 + $0xc9] sm:$0xff] %v7985_v10  ;;  %v564_v17 = vld [vmem:[#allocation2 + $0x1a] sm:$0xff]  ;;  %418 = vst [vmem:[#allocation2 + $0xd9] sm:$0xff] %v7991_v16  ;;  %v742_v21 = vld [vmem:[#allocation8 + $0xa0] sm:$0xff]  ;;  %v6997_v26 = vpack.c.bf16 %v1544_v18, %v1543_v15 }
  0x8a   : > { %6936 = vmatpush1.bf16.msra.mxu0 %v6935_v63  ;;  %419 = vst [vmem:[#allocation2 + $0xe1] sm:$0xff] %v7995_v19  ;;  %v743_v22 = vld [vmem:[#allocation8 + $0xa8] sm:$0xff]  ;;  %v8001_v23 = vld [vmem:[%s7865_s13 + $0x90] sm:$0xff]  ;;  %v8004_v24 = vld [vmem:[%s7865_s13 + $0x98] sm:$0xff] }
  0x8b   : > { %6937 = vmatprep.subr.bf16.mxu0 %v9964_v0  ;;  %v565_v25 = vld [vmem:[#allocation2 + $0x22] sm:$0xff]  ;;  %v1545_v27 = vld [vmem:[#allocation8 + $0x1a0] sm:$0xff]  ;;  %420 = vst [vmem:[#allocation2 + $0xf1] sm:$0xff] %v8001_v23  ;;  %421 = vst [vmem:[#allocation2 + $0xf9] sm:$0xff] %v8004_v24  ;;  %v6944_v35 = vpack.c.bf16 %v743_v22, %v742_v21 }
  0x8c   : > { %6992 = vmatpush3.bf16.msra.mxu1 %v6989_v61  ;;  %v8009_v28 = vld [vmem:[%s7865_s13 + $0xa0] sm:$0xff]  ;;  %v1546_v30 = vld [vmem:[#allocation8 + $0x1a8] sm:$0xff]  ;;  %v744_v36 = vld [vmem:[#allocation8 + $0xb0] sm:$0xff] }
  0x8d   : > { %6993 = vmatprep.subr.bf16.mxu1 %v9964_v0  ;;  %v566_v29 = vld [vmem:[#allocation2 + $0x32] sm:$0xff]  ;;  %422 = vst [vmem:[#allocation2 + $0x109] sm:$0xff] %v8009_v28  ;;  %v745_v37 = vld [vmem:[#allocation8 + $0xb8] sm:$0xff]  ;;  %v8019_v39 = vld [vmem:[%s7865_s13 + $0xb0] sm:$0xff]  ;;  %v7000_v45 = vpack.c.bf16 %v1546_v30, %v1545_v27 }
  0x8e   : > { %6939 = vmatpush1.bf16.msra.mxu0 %v6938_v9  ;;  %v8013_v33 = vld [vmem:[%s7865_s13 + $0xa8] sm:$0xff]  ;;  %v8022_v40 = vld [vmem:[%s7865_s13 + $0xb8] sm:$0xff]  ;;  %424 = vst [vmem:[#allocation2 + $0x121] sm:$0xff] %v8019_v39  ;;  %v1547_v47 = vld [vmem:[#allocation8 + $0x1b0] sm:$0xff]  ;;  %v6947_v50 = vpack.c.bf16 %v745_v37, %v744_v36 }
  0x8f   : > { %6466 = vmatmul.mubr.f32.vlgmr.msra.gmra.mrb[0].mxu1 %v563_v13  ;;  %6940 = vmatprep.subr.bf16.mxu0 %v9964_v0  ;;  %423 = vst [vmem:[#allocation2 + $0x111] sm:$0xff] %v8013_v33  ;;  %v567_v43 = vld [vmem:[#allocation2 + $0x3a] sm:$0xff]  ;;  %425 = vst [vmem:[#allocation2 + $0x129] sm:$0xff] %v8022_v40  ;;  %v568_v46 = vld [vmem:[#allocation2 + $0x4a] sm:$0xff] }
  0x90   : > { %6995 = vmatpush1.bf16.msra.mxu1 %v6994_v14  ;;  %6468 = vmatprep.mubr.f32.mxu1 %v564_v17  ;;  %v1548_v49 = vld [vmem:[#allocation8 + $0x1b8] sm:$0xff]  ;;  %v8028_v53 = vld [vmem:[%s7865_s13 + $0xc0] sm:$0xff]  ;;  %v8031_v54 = vld [vmem:[%s7865_s13 + $0xc8] sm:$0xff] }
  0x91   : > { %6996 = vmatprep.subr.bf16.mxu1 %v9964_v0  ;;  %v746_v55 = vld [vmem:[#allocation8 + $0xc0] sm:$0xff]  ;;  %v747_v56 = vld [vmem:[#allocation8 + $0xc8] sm:$0xff]  ;;  %426 = vst [vmem:[#allocation2 + $0x139] sm:$0xff] %v8028_v53  ;;  %427 = vst [vmem:[#allocation2 + $0x141] sm:$0xff] %v8031_v54  ;;  %v7003_v58 = vpack.c.bf16 %v1548_v49, %v1547_v47 }
  0x92   : > { %6942 = vmatpush1.bf16.msra.mxu0 %v6941_v20  ;;  %v569_v57 = vld [vmem:[#allocation2 + $0x52] sm:$0xff]  ;;  %v8037_v61 = vld [vmem:[%s7865_s13 + $0xd0] sm:$0xff]  ;;  %v8040_v63 = vld [vmem:[%s7865_s13 + $0xd8] sm:$0xff]  ;;  %v6950_v6 = vpack.c.bf16 %v747_v56, %v746_v55 }
  0x93   : > { %6469 = vmatmul.mubr.f32.gmra.mrb[2].mxu1 %v565_v25  ;;  %6943 = vmatprep.subr.bf16.mxu0 %v9964_v0  ;;  %v570_v3 = vld [vmem:[#allocation2 + $0x62] sm:$0xff]  ;;  %v1549_v4 = vld [vmem:[#allocation8 + $0x1c0] sm:$0xff]  ;;  %v1550_v5 = vld [vmem:[#allocation8 + $0x1c8] sm:$0xff]  ;;  %428 = vst [vmem:[#allocation2 + $0x151] sm:$0xff] %v8037_v61 }
  0x94   : > { %6998 = vmatpush1.bf16.msra.mxu1 %v6997_v26  ;;  %6471 = vmatprep.mubr.f32.mxu1 %v566_v29  ;;  %429 = vst [vmem:[#allocation2 + $0x159] sm:$0xff] %v8040_v63  ;;  %v8046_v7 = vld [vmem:[%s7865_s13 + $0xe0] sm:$0xff]  ;;  %v748_v9 = vld [vmem:[#allocation8 + $0xd0] sm:$0xff]  ;;  %v749_v11 = vld [vmem:[#allocation8 + $0xd8] sm:$0xff]  ;;  %v7006_v14 = vpack.c.bf16 %v1550_v5, %v1549_v4 }
  0x95   : > { %6999 = vmatprep.subr.bf16.mxu1 %v9964_v0  ;;  %v8050_v12 = vld [vmem:[%s7865_s13 + $0xe8] sm:$0xff]  ;;  %430 = vst [vmem:[#allocation2 + $0x169] sm:$0xff] %v8046_v7  ;;  %v571_v13 = vld [vmem:[#allocation2 + $0x6a] sm:$0xff]  ;;  %v1551_v17 = vld [vmem:[#allocation8 + $0x1d0] sm:$0xff]  ;;  %v6953_v20 = vpack.c.bf16 %v749_v11, %v748_v9 }
  0x96   : > { %6945 = vmatpush1.bf16.msra.mxu0 %v6944_v35  ;;  %431 = vst [vmem:[#allocation2 + $0x171] sm:$0xff] %v8050_v12  ;;  %v572_v15 = vld [vmem:[#allocation2 + $0x7a] sm:$0xff]  ;;  %v1552_v18 = vld [vmem:[#allocation8 + $0x1d8] sm:$0xff]  ;;  %v750_v21 = vld [vmem:[#allocation8 + $0xe0] sm:$0xff] }
  0x97   : > { %6472 = vmatmul.mubr.f32.gmra.mrb[4].mxu1 %v567_v43  ;;  %6946 = vmatprep.subr.bf16.mxu0 %v9964_v0  ;;  %v751_v22 = vld [vmem:[#allocation8 + $0xe8] sm:$0xff]  ;;  %v573_v25 = vld [vmem:[#allocation2 + $0x82] sm:$0xff]  ;;  %v7009_v26 = vpack.c.bf16 %v1552_v18, %v1551_v17  ;;  %v1553_v29 = vld [vmem:[#allocation8 + $0x1e0] sm:$0xff] }
  0x98   : > { %7001 = vmatpush1.bf16.msra.mxu1 %v7000_v45  ;;  %6474 = vmatprep.mubr.f32.mxu1 %v568_v46  ;;  %v574_v27 = vld [vmem:[#allocation2 + $0x92] sm:$0xff]  ;;  %v6956_v35 = vpack.c.bf16 %v751_v22, %v750_v21  ;;  %v752_v36 = vld [vmem:[#allocation8 + $0xf0] sm:$0xff]  ;;  %v753_v37 = vld [vmem:[#allocation8 + $0xf8] sm:$0xff] }
  0x99   : > { %7002 = vmatprep.subr.bf16.mxu1 %v9964_v0  ;;  %v1554_v30 = vld [vmem:[#allocation8 + $0x1e8] sm:$0xff]  ;;  %v1573_v46 = vld [vmem:[#allocation8 + $0x280] sm:$0xff]  ;;  %v1556_v55 = vld [vmem:[#allocation8 + $0x1f8] sm:$0xff]  ;;  %v6959_v56 = vpack.c.bf16 %v753_v37, %v752_v36 }
  0x9a   : > { %6948 = vmatpush1.bf16.msra.mxu0 %v6947_v50  ;;  %v575_v43 = vld [vmem:[#allocation2 + $0x9a] sm:$0xff]  ;;  %v7012_v45 = vpack.c.bf16 %v1554_v30, %v1553_v29  ;;  %v576_v49 = vld [vmem:[#allocation2 + $0xaa] sm:$0xff]  ;;  %v8065_v29 = vld [vmem:[#allocation2 + $0xe2] sm:$0xff] }
  0x9b   : > { %6475 = vmatmul.mubr.f32.gmra.mrb[6].mxu1 %v569_v57  ;;  %6949 = vmatprep.subr.bf16.mxu0 %v9964_v0  ;;  %v1574_v47 = vld [vmem:[#allocation8 + $0x288] sm:$0xff]  ;;  %v1555_v50 = vld [vmem:[#allocation8 + $0x1f0] sm:$0xff]  ;;  %v1576_v5 = vld [vmem:[#allocation8 + $0x298] sm:$0xff] }
  0x9c   : > { %7004 = vmatpush1.bf16.msra.mxu1 %v7003_v58  ;;  %6477 = vmatprep.mubr.f32.mxu1 %v570_v3  ;;  %v7041_v57 = vpack.c.bf16 %v1574_v47, %v1573_v46  ;;  %v577_v58 = vld [vmem:[#allocation2 + $0xb2] sm:$0xff]  ;;  %v7015_v3 = vpack.c.bf16 %v1556_v55, %v1555_v50  ;;  %v1575_v4 = vld [vmem:[#allocation8 + $0x290] sm:$0xff]  ;;  %v579_v17 = vld [vmem:[#allocation2 + $0xca] sm:$0xff] }
  0x9d   : > { %7005 = vmatprep.subr.bf16.mxu1 %v9964_v0  ;;  %v1557_v9 = vld [vmem:[#allocation8 + $0x200] sm:$0xff]  ;;  %v1558_v11 = vld [vmem:[#allocation8 + $0x208] sm:$0xff]  ;;  %v1580_v36 = vld [vmem:[#allocation8 + $0x2b8] sm:$0xff] }
  0x9e   : > { %6951 = vmatpush1.bf16.msra.mxu0 %v6950_v6  ;;  %v578_v6 = vld [vmem:[#allocation2 + $0xc2] sm:$0xff]  ;;  %v7018_v18 = vpack.c.bf16 %v1558_v11, %v1557_v9  ;;  %v1578_v21 = vld [vmem:[#allocation8 + $0x2a8] sm:$0xff]  ;;  %v1581_v50 = vld [vmem:[#allocation8 + $0x2c0] sm:$0xff] }
  0x9f   : > { %6478 = vmatmul.mubr.f32.gmra.mrb[8].mxu1 %v571_v13  ;;  %6952 = vmatprep.subr.bf16.mxu0 %v9964_v0  ;;  %v434_v13 = vld [vmem:[#allocation2] sm:$0xff]  ;;  %v8069_v37 = vld [vmem:[#allocation2 + $0xf2] sm:$0xff]  ;;  %v1584_v11 = vld [vmem:[#allocation8 + $0x2d8] sm:$0xff] }
  0xa0   : > { %7007 = vmatpush1.bf16.msra.mxu1 %v7006_v14  ;;  %6480 = vmatprep.mubr.f32.mxu1 %v572_v15  ;;  %v499_v14 = vld [vmem:[#allocation2 + $0x9] sm:$0xff]  ;;  %v7045_v15 = vpack.c.bf16 %v1576_v5, %v1575_v4  ;;  %v8062_v22 = vld [vmem:[#allocation2 + $0xda] sm:$0xff]  ;;  %v8087_v5 = vld [vmem:[#allocation2 + $0x112] sm:$0xff] }
  0xa1   : > { %7008 = vmatprep.subr.bf16.mxu1 %v9964_v0  ;;  %v8072_v46 = vld [vmem:[#allocation2 + $0x18] sm:$0xff]  ;;  %v1583_v9 = vld [vmem:[#allocation8 + $0x2d0] sm:$0xff] }
  0xa2   : > { %6954 = vmatpush1.bf16.msra.mxu0 %v6953_v20  ;;  %v1577_v20 = vld [vmem:[#allocation8 + $0x2a0] sm:$0xff]  ;;  %v1582_v55 = vld [vmem:[#allocation8 + $0x2c8] sm:$0xff] }
  0xa3   : > { %6481 = vmatmul.mubr.f32.gmra.mrb[10].mxu1 %v573_v25  ;;  %6955 = vmatprep.subr.bf16.mxu0 %v9964_v0  ;;  %v1559_v25 = vld [vmem:[#allocation8 + $0x210] sm:$0xff]  ;;  %v7057_v4 = vpack.c.bf16 %v1582_v55, %v1581_v50  ;;  %v1588_v55 = vld [vmem:[#allocation8 + $0x2f8] sm:$0xff] }
  0xa4   : > { %7010 = vmatpush1.bf16.msra.mxu1 %v7009_v26  ;;  %6483 = vmatprep.mubr.f32.mxu1 %v574_v27  ;;  %v1560_v26 = vld [vmem:[#allocation8 + $0x218] sm:$0xff]  ;;  %v7049_v27 = vpack.c.bf16 %v1578_v21, %v1577_v20  ;;  %v1587_v50 = vld [vmem:[#allocation8 + $0x2f0] sm:$0xff] }
  0xa5   : > { %7011 = vmatprep.subr.bf16.mxu1 %v9964_v0  ;;  %v7021_v30 = vpack.c.bf16 %v1560_v26, %v1559_v25  ;;  %v8098_v20 = vld [vmem:[#allocation2 + $0x12a] sm:$0xff]  ;;  %v1586_v26 = vld [vmem:[#allocation8 + $0x2e8] sm:$0xff] }
  0xa6   : > { %6957 = vmatpush1.bf16.msra.mxu0 %v6956_v35  ;;  %v1579_v35 = vld [vmem:[#allocation8 + $0x2b0] sm:$0xff]  ;;  %v1585_v25 = vld [vmem:[#allocation8 + $0x2e0] sm:$0xff] }
  0xa7   : > { %6484 = vmatmul.mubr.f32.gmra.mrb[12].mxu1 %v575_v43  ;;  %6958 = vmatprep.subr.bf16.mxu0 %v9964_v0  ;;  %v1561_v43 = vld [vmem:[#allocation8 + $0x220] sm:$0xff]  ;;  %v7053_v47 = vpack.c.bf16 %v1580_v36, %v1579_v35  ;;  %v1568_v35 = vld [vmem:[#allocation8 + $0x258] sm:$0xff]  ;;  %v8105_v36 = vld [vmem:[#allocation2 + $0x38] sm:$0xff] }
  0xa8   : > { %7013 = vmatpush1.bf16.msra.mxu1 %v7012_v45  ;;  %6486 = vmatprep.mubr.f32.mxu1 %v576_v49  ;;  %v1562_v45 = vld [vmem:[#allocation8 + $0x228] sm:$0xff] }
  0xa9   : > { %7014 = vmatprep.subr.bf16.mxu1 %v9964_v0  ;;  %v8076_v49 = vld [vmem:[#allocation2 + $0xfa] sm:$0xff] }
  0xaa   : > { %6960 = vmatpush1.bf16.msra.mxu0 %v6959_v56  ;;  %v8080_v56 = vld [vmem:[#allocation2 + $0x10a] sm:$0xff] }
  0xab   : > { %6487 = vmatmul.mubr.f32.gmra.mrb[14].mxu1 %v577_v58  ;;  %7042 = vmatprep.subr.bf16.mxu0 %v7041_v57  ;;  %v1564_v58 = vld [vmem:[#allocation8 + $0x238] sm:$0xff] }
  0xac   : > { %7016 = vmatpush1.bf16.msra.mxu1 %v7015_v3  ;;  %6489 = vmatprep.mubr.f32.mxu1 %v578_v6  ;;  %v8083_v3 = vld [vmem:[#allocation2 + $0x20] sm:$0xff] }
  0xad   : > { %835 = vmatmul.mubr.f32.vlgmr.msra.gmra.mrb[0].mxu0 %v434_v13  ;;  %7017 = vmatprep.subr.bf16.mxu1 %v9964_v0  ;;  %v8091_v13 = vld [vmem:[#allocation2 + $0x122] sm:$0xff] }
  0xae   : > { %7044 = vmatpush3.bf16.msra.mxu0 %v7041_v57  ;;  %839 = vmatprep.mubr.f32.mxu0 %v499_v14  ;;  %v1563_v57 = vld [vmem:[#allocation8 + $0x230] sm:$0xff]  ;;  %v1565_v14 = vld [vmem:[#allocation8 + $0x240] sm:$0xff] }
  0xaf   : > { %6490 = vmatmul.mubr.f32.gmra.mrb[16].mxu1 %v579_v17  ;;  %7046 = vmatprep.subr.bf16.mxu0 %v7045_v15  ;;  %v7027_v6 = vpack.c.bf16 %v1564_v58, %v1563_v57  ;;  %v8094_v17 = vld [vmem:[#allocation2 + $0x30] sm:$0xff] }
  0xb0   : > { %7019 = vmatpush1.bf16.msra.mxu1 %v7018_v18  ;;  %6492 = vmatprep.mubr.f32.mxu1 %v8062_v22  ;;  %v7061_v18 = vpack.c.bf16 %v1584_v11, %v1583_v9  ;;  %v8117_v57 = vld [vmem:[#allocation2 + $0x152] sm:$0xff]  ;;  %v8123_v9 = vld [vmem:[%s7865_s13 + $0xf8] sm:$0xff]  ;;  %v7069_v11 = vpack.c.bf16 %v1588_v55, %v1587_v50 }
  0xb1   : > { %840 = vmatmul.mubr.f32.gmra.mrb[2].mxu0 %v7634_v1  ;;  %7020 = vmatprep.subr.bf16.mxu1 %v9964_v0  ;;  %v7024_v1 = vpack.c.bf16 %v1562_v45, %v1561_v43  ;;  %v8108_v43 = vld [vmem:[%s7865_s13 + $0xf0] sm:$0xff]  ;;  %v7065_v45 = vpack.c.bf16 %v1586_v26, %v1585_v25  ;;  %v1569_v58 = vld [vmem:[#allocation8 + $0x260] sm:$0xff]  ;;  %433 = vst [vmem:[#allocation2 + $0x189] sm:$0xff] %v8123_v9  ;;  %v2458_v25 = vld [vmem:[#allocation8 + $0x408] sm:$0xff] }
  0xb2   : > { %844 = vmatprep.mubr.f32.mxu0 %v7922_v31  ;;  %7048 = vmatpush3.bf16.msra.mxu0 %v7045_v15  ;;  %v1566_v15 = vld [vmem:[#allocation8 + $0x248] sm:$0xff]  ;;  %432 = vst [vmem:[#allocation2 + $0x181] sm:$0xff] %v8108_v43  ;;  %v1571_v26 = vld [vmem:[#allocation8 + $0x270] sm:$0xff] }
  0xb3   : > { %6493 = vmatmul.mubr.f32.gmra.mrb[18].mxu1 %v8065_v29  ;;  %7050 = vmatprep.subr.bf16.mxu0 %v7049_v27  ;;  %v7030_v21 = vpack.c.bf16 %v1566_v15, %v1565_v14  ;;  %v8128_v14 = vld [vmem:[#allocation2 + $0x15a] sm:$0xff]  ;;  %v8141_v50 = vld [vmem:[#allocation2 + $0x172] sm:$0xff] }
  0xb4   : > { %7022 = vmatpush1.bf16.msra.mxu1 %v7021_v30  ;;  %6495 = vmatprep.mubr.f32.mxu1 %v8069_v37  ;;  %v1567_v30 = vld [vmem:[#allocation8 + $0x250] sm:$0xff] }
  0xb5   : > { %845 = vmatmul.mubr.f32.gmra.mrb[4].mxu0 %v8072_v46  ;;  %7023 = vmatprep.subr.bf16.mxu1 %v9964_v0 }
  0xb6   : > { %849 = vmatprep.mubr.f32.mxu0 %v7925_v32  ;;  %7052 = vmatpush3.bf16.msra.mxu0 %v7049_v27  ;;  %v8102_v27 = vld [vmem:[#allocation2 + $0x13a] sm:$0xff] }
  0xb7   : > { %6496 = vmatmul.mubr.f32.gmra.mrb[20].mxu1 %v8076_v49  ;;  %7054 = vmatprep.subr.bf16.mxu0 %v7053_v47 }
  0xb8   : > { %7025 = vmatpush1.bf16.msra.mxu1 %v7024_v1  ;;  %6498 = vmatprep.mubr.f32.mxu1 %v8080_v56  ;;  %v7033_v1 = vpack.c.bf16 %v1568_v35, %v1567_v30  ;;  %v1572_v30 = vld [vmem:[#allocation8 + $0x278] sm:$0xff]  ;;  %v8135_v35 = vld [vmem:[#allocation2 + $0x50] sm:$0xff] }
  0xb9   : > { %850 = vmatmul.mubr.f32.gmra.mrb[6].mxu0 %v8083_v3  ;;  %7026 = vmatprep.subr.bf16.mxu1 %v9964_v0  ;;  %v7039_v55 = vpack.c.bf16 %v1572_v30, %v1571_v26  ;;  %v8154_v26 = vld [vmem:[#allocation2 + $0x68] sm:$0xff]  ;;  %v2430_v30 = vld [vmem:[#allocation8 + $0x328] sm:$0xff] }
  0xba   : > { %854 = vmatprep.mubr.f32.mxu0 %v7930_v34  ;;  %7056 = vmatpush3.bf16.msra.mxu0 %v7053_v47  ;;  %v8113_v47 = vld [vmem:[#allocation2 + $0x142] sm:$0xff] }
  0xbb   : > { %6499 = vmatmul.mubr.f32.gmra.mrb[22].mxu1 %v8087_v5  ;;  %7058 = vmatprep.subr.bf16.mxu0 %v7057_v4 }
  0xbc   : > { %7028 = vmatpush1.bf16.msra.mxu1 %v7027_v6  ;;  %6501 = vmatprep.mubr.f32.mxu1 %v8091_v13  ;;  %v8120_v6 = vld [vmem:[#allocation2 + $0x48] sm:$0xff] }
  0xbd   : > { %855 = vmatmul.mubr.f32.gmra.mrb[8].mxu0 %v8094_v17  ;;  %7029 = vmatprep.subr.bf16.mxu1 %v9964_v0 }
  0xbe   : > { %859 = vmatprep.mubr.f32.mxu0 %v7933_v38  ;;  %7060 = vmatpush3.bf16.msra.mxu0 %v7057_v4  ;;  %v1570_v4 = vld [vmem:[#allocation8 + $0x268] sm:$0xff] }
  0xbf   : > { %6502 = vmatmul.mubr.f32.gmra.mrb[24].mxu1 %v8098_v20  ;;  %7062 = vmatprep.subr.bf16.mxu0 %v7061_v18  ;;  %v7036_v15 = vpack.c.bf16 %v1570_v4, %v1569_v58  ;;  %v2425_v58 = vld [vmem:[#allocation8 + $0x300] sm:$0xff]  ;;  %v2426_v4 = vld [vmem:[#allocation8 + $0x308] sm:$0xff] }
  0xc0   : > { %7031 = vmatpush1.bf16.msra.mxu1 %v7030_v21  ;;  %6504 = vmatprep.mubr.f32.mxu1 %v8102_v27  ;;  %v2457_v21 = vld [vmem:[#allocation8 + $0x400] sm:$0xff] }
  0xc1   : > { %860 = vmatmul.mubr.f32.gmra.mrb[10].mxu0 %v8105_v36  ;;  %7032 = vmatprep.subr.bf16.mxu1 %v9964_v0 }
  0xc2   : > { %864 = vmatprep.mubr.f32.mxu0 %v7939_v41  ;;  %7064 = vmatpush3.bf16.msra.mxu0 %v7061_v18  ;;  %v8132_v18 = vld [vmem:[#allocation2 + $0x16a] sm:$0xff] }
  0xc3   : > { %6505 = vmatmul.mubr.f32.gmra.mrb[26].mxu1 %v8113_v47  ;;  %7066 = vmatprep.subr.bf16.mxu0 %v7065_v45 }
  0xc4   : > { %7034 = vmatpush1.bf16.msra.mxu1 %v7033_v1  ;;  %6507 = vmatprep.mubr.f32.mxu1 %v8117_v57  ;;  %v8138_v1 = vpack.c.bf16 %v2458_v25, %v2457_v21  ;;  %v2427_v21 = vld [vmem:[#allocation8 + $0x310] sm:$0xff]  ;;  %v2428_v25 = vld [vmem:[#allocation8 + $0x318] sm:$0xff] }
  0xc5   : > { %865 = vmatmul.mubr.f32.gmra.mrb[12].mxu0 %v8120_v6  ;;  %7035 = vmatprep.subr.bf16.mxu1 %v9964_v0 }
  0xc6   : > { %869 = vmatprep.mubr.f32.mxu0 %v7942_v42  ;;  %7068 = vmatpush3.bf16.msra.mxu0 %v7065_v45  ;;  %v8146_v45 = vld [vmem:[#allocation2 + $0x60] sm:$0xff] }
  0xc7   : > { %6508 = vmatmul.mubr.f32.gmra.mrb[28].mxu1 %v8128_v14  ;;  %7070 = vmatprep.subr.bf16.mxu0 %v7069_v11 }
  0xc8   : > { %7037 = vmatpush1.bf16.msra.mxu1 %v7036_v15  ;;  %6510 = vmatprep.mubr.f32.mxu1 %v8132_v18  ;;  %v7074_v15 = vpack.c.bf16 %v2426_v4, %v2425_v58  ;;  %v2432_v58 = vld [vmem:[#allocation8 + $0x338] sm:$0xff]  ;;  %v8168_v4 = vld [vmem:[#allocation2 + $0x80] sm:$0xff] }
  0xc9   : > { %870 = vmatmul.mubr.f32.gmra.mrb[14].mxu0 %v8135_v35  ;;  %7038 = vmatprep.subr.bf16.mxu1 %v9964_v0 }
  0xca   : > { %874 = vmatprep.mubr.f32.mxu0 %v7947_v44  ;;  %7072 = vmatpush3.bf16.msra.mxu0 %v7069_v11  ;;  %v7077_v11 = vpack.c.bf16 %v2428_v25, %v2427_v21  ;;  %v8175_v21 = vld [vmem:[#allocation2 + $0x90] sm:$0xff] }
  0xcb   : > { %6511 = vmatmul.mubr.f32.gmra.mrb[30].mxu1 %v8141_v50  ;;  %7122 = vmatprep.subr.bf16.mxu0 %v8138_v1 }
  0xcc   : > { %7040 = vmatpush1.bf16.msra.mxu1 %v7039_v55  ;;  %1653 = vmatprep.mubr.f32.mxu1 %v7922_v31  ;;  %v2429_v31 = vld [vmem:[#allocation8 + $0x320] sm:$0xff]  ;;  %v8161_v55 = vld [vmem:[#allocation2 + $0x78] sm:$0xff] }
  0xcd   : > { %875 = vmatmul.mubr.f32.gmra.mrb[16].mxu0 %v8146_v45  ;;  %7073 = vmatprep.subr.bf16.mxu1 %v9964_v0 }
  0xce   : > { %879 = vmatprep.mubr.f32.mxu0 %v7950_v48 }
  0xcf   : > { %1654 = vmatmul.mubr.f32.vlgmr.msra.gmra.mrb[32].mxu1 %v8072_v46  ;;  %v7080_v46 = vpack.c.bf16 %v2430_v30, %v2429_v31  ;;  %v8182_v31 = vld [vmem:[#allocation2 + $0x98] sm:$0xff] }
  0xd0   : > { %1658 = vmatprep.mubr.f32.mxu1 %v7925_v32  ;;  %7075 = vmatpush1.bf16.msra.mxu1 %v7074_v15  ;;  %v2431_v32 = vld [vmem:[#allocation8 + $0x330] sm:$0xff]  ;;  %v2434_v15 = vld [vmem:[#allocation8 + $0x348] sm:$0xff] }
  0xd1   : > { %880 = vmatmul.mubr.f32.gmra.mrb[18].mxu0 %v8154_v26  ;;  %7076 = vmatprep.subr.bf16.mxu1 %v9964_v0 }
  0xd2   : > { %884 = vmatprep.mubr.f32.mxu0 %v7956_v51 }
  0xd3   : > { %1659 = vmatmul.mubr.f32.gmra.mrb[34].mxu1 %v8083_v3  ;;  %v7083_v3 = vpack.c.bf16 %v2432_v58, %v2431_v32  ;;  %v8189_v32 = vld [vmem:[#allocation2 + $0xa8] sm:$0xff] }
  0xd4   : > { %1663 = vmatprep.mubr.f32.mxu1 %v7930_v34  ;;  %7078 = vmatpush1.bf16.msra.mxu1 %v7077_v11  ;;  %v2433_v34 = vld [vmem:[#allocation8 + $0x340] sm:$0xff]  ;;  %v2436_v11 = vld [vmem:[#allocation8 + $0x358] sm:$0xff] }
  0xd5   : > { %885 = vmatmul.mubr.f32.gmra.mrb[20].mxu0 %v8161_v55  ;;  %7079 = vmatprep.subr.bf16.mxu1 %v9964_v0  ;;  %v7086_v25 = vpack.c.bf16 %v2434_v15, %v2433_v34  ;;  %v8196_v34 = vld [vmem:[#allocation2 + $0xb0] sm:$0xff] }
  0xd6   : > { %889 = vmatprep.mubr.f32.mxu0 %v7959_v52 }
  0xd7   : > { %1664 = vmatmul.mubr.f32.gmra.mrb[36].mxu1 %v8094_v17 }
  0xd8   : > { %1668 = vmatprep.mubr.f32.mxu1 %v7933_v38  ;;  %7081 = vmatpush1.bf16.msra.mxu1 %v7080_v46  ;;  %v2435_v38 = vld [vmem:[#allocation8 + $0x350] sm:$0xff]  ;;  %v2438_v46 = vld [vmem:[#allocation8 + $0x368] sm:$0xff] }
  0xd9   : > { %890 = vmatmul.mubr.f32.gmra.mrb[22].mxu0 %v8168_v4  ;;  %7082 = vmatprep.subr.bf16.mxu1 %v9964_v0  ;;  %v7089_v30 = vpack.c.bf16 %v2436_v11, %v2435_v38  ;;  %v8203_v38 = vld [vmem:[#allocation2 + $0xc0] sm:$0xff] }
  0xda   : > { %894 = vmatprep.mubr.f32.mxu0 %v7965_v59 }
  0xdb   : > { %1669 = vmatmul.mubr.f32.gmra.mrb[38].mxu1 %v8105_v36 }
  0xdc   : > { %1673 = vmatprep.mubr.f32.mxu1 %v7939_v41  ;;  %7084 = vmatpush1.bf16.msra.mxu1 %v7083_v3  ;;  %v2437_v41 = vld [vmem:[#allocation8 + $0x360] sm:$0xff]  ;;  %v2440_v3 = vld [vmem:[#allocation8 + $0x378] sm:$0xff] }
  0xdd   : > { %895 = vmatmul.mubr.f32.gmra.mrb[24].mxu0 %v8175_v21  ;;  %7085 = vmatprep.subr.bf16.mxu1 %v9964_v0  ;;  %v7092_v58 = vpack.c.bf16 %v2438_v46, %v2437_v41  ;;  %v8210_v41 = vld [vmem:[#allocation2 + $0xc8] sm:$0xff] }
  0xde   : > { %899 = vmatprep.mubr.f32.mxu0 %v7968_v60 }
  0xdf   : > { %1674 = vmatmul.mubr.f32.gmra.mrb[40].mxu1 %v8120_v6 }
  0xe0   : > { %1678 = vmatprep.mubr.f32.mxu1 %v7942_v42  ;;  %7087 = vmatpush1.bf16.msra.mxu1 %v7086_v25  ;;  %v2439_v42 = vld [vmem:[#allocation8 + $0x370] sm:$0xff]  ;;  %v2442_v25 = vld [vmem:[#allocation8 + $0x388] sm:$0xff] }
  0xe1   : > { %900 = vmatmul.mubr.f32.gmra.mrb[26].mxu0 %v8182_v31  ;;  %7088 = vmatprep.subr.bf16.mxu1 %v9964_v0  ;;  %v7095_v15 = vpack.c.bf16 %v2440_v3, %v2439_v42  ;;  %v8217_v42 = vld [vmem:[#allocation2 + $0xd8] sm:$0xff] }
  0xe2   : > { %904 = vmatprep.mubr.f32.mxu0 %v7973_v62 }
  0xe3   : > { %1679 = vmatmul.mubr.f32.gmra.mrb[42].mxu1 %v8135_v35 }
  0xe4   : > { %1683 = vmatprep.mubr.f32.mxu1 %v7947_v44  ;;  %7090 = vmatpush1.bf16.msra.mxu1 %v7089_v30  ;;  %v2441_v44 = vld [vmem:[#allocation8 + $0x380] sm:$0xff]  ;;  %v2444_v30 = vld [vmem:[#allocation8 + $0x398] sm:$0xff] }
  0xe5   : > { %905 = vmatmul.mubr.f32.gmra.mrb[28].mxu0 %v8189_v32  ;;  %7091 = vmatprep.subr.bf16.mxu1 %v9964_v0  ;;  %v7098_v11 = vpack.c.bf16 %v2442_v25, %v2441_v44  ;;  %v8224_v44 = vld [vmem:[#allocation2 + $0xe0] sm:$0xff] }
  0xe6   : > { %909 = vmatprep.mubr.f32.mxu0 %v7976_v2 }
  0xe7   : > { %1684 = vmatmul.mubr.f32.gmra.mrb[44].mxu1 %v8146_v45 }
  0xe8   : > { %1688 = vmatprep.mubr.f32.mxu1 %v7950_v48  ;;  %7093 = vmatpush1.bf16.msra.mxu1 %v7092_v58  ;;  %v2443_v48 = vld [vmem:[#allocation8 + $0x390] sm:$0xff]  ;;  %v2446_v58 = vld [vmem:[#allocation8 + $0x3a8] sm:$0xff] }
  0xe9   : > { %910 = vmatmul.mubr.f32.gmra.mrb[30].mxu0 %v8196_v34  ;;  %7094 = vmatprep.subr.bf16.mxu1 %v9964_v0  ;;  %v7101_v46 = vpack.c.bf16 %v2444_v30, %v2443_v48  ;;  %v8231_v48 = vld [vmem:[#allocation2 + $0xf0] sm:$0xff] }
  0xea   : > { %914 = vmatprep.mubr.f32.mxu0 %v7982_v8 }
  0xeb   : > { %1689 = vmatmul.mubr.f32.gmra.mrb[46].mxu1 %v8154_v26 }
  0xec   : > { %1693 = vmatprep.mubr.f32.mxu1 %v7956_v51  ;;  %7096 = vmatpush1.bf16.msra.mxu1 %v7095_v15  ;;  %v2445_v51 = vld [vmem:[#allocation8 + $0x3a0] sm:$0xff]  ;;  %v2448_v15 = vld [vmem:[#allocation8 + $0x3b8] sm:$0xff] }
  0xed   : > { %915 = vmatmul.mubr.f32.gmra.mrb[32].mxu0 %v8203_v38  ;;  %7097 = vmatprep.subr.bf16.mxu1 %v9964_v0  ;;  %v7104_v3 = vpack.c.bf16 %v2446_v58, %v2445_v51  ;;  %v8238_v51 = vld [vmem:[#allocation2 + $0xf8] sm:$0xff] }
  0xee   : > { %919 = vmatprep.mubr.f32.mxu0 %v7985_v10 }
  0xef   : > { %1694 = vmatmul.mubr.f32.gmra.mrb[48].mxu1 %v8161_v55 }
  0xf0   : > { %1698 = vmatprep.mubr.f32.mxu1 %v7959_v52  ;;  %7099 = vmatpush1.bf16.msra.mxu1 %v7098_v11  ;;  %v2447_v52 = vld [vmem:[#allocation8 + $0x3b0] sm:$0xff]  ;;  %v2450_v11 = vld [vmem:[#allocation8 + $0x3c8] sm:$0xff] }
  0xf1   : > { %920 = vmatmul.mubr.f32.gmra.mrb[34].mxu0 %v8210_v41  ;;  %7100 = vmatprep.subr.bf16.mxu1 %v9964_v0  ;;  %v7107_v25 = vpack.c.bf16 %v2448_v15, %v2447_v52  ;;  %v8245_v52 = vld [vmem:[#allocation2 + $0x108] sm:$0xff] }
  0xf2   : > { %924 = vmatprep.mubr.f32.mxu0 %v7991_v16 }
  0xf3   : > { %1699 = vmatmul.mubr.f32.gmra.mrb[50].mxu1 %v8168_v4 }
  0xf4   : > { %1703 = vmatprep.mubr.f32.mxu1 %v7965_v59  ;;  %7102 = vmatpush1.bf16.msra.mxu1 %v7101_v46  ;;  %v2449_v59 = vld [vmem:[#allocation8 + $0x3c0] sm:$0xff]  ;;  %v2452_v46 = vld [vmem:[#allocation8 + $0x3d8] sm:$0xff] }
  0xf5   : > { %925 = vmatmul.mubr.f32.gmra.mrb[36].mxu0 %v8217_v42  ;;  %7103 = vmatprep.subr.bf16.mxu1 %v9964_v0  ;;  %v7110_v30 = vpack.c.bf16 %v2450_v11, %v2449_v59  ;;  %v8252_v59 = vld [vmem:[#allocation2 + $0x110] sm:$0xff] }
  0xf6   : > { %929 = vmatprep.mubr.f32.mxu0 %v7995_v19 }
  0xf7   : > { %1704 = vmatmul.mubr.f32.gmra.mrb[52].mxu1 %v8175_v21 }
  0xf8   : > { %1708 = vmatprep.mubr.f32.mxu1 %v7968_v60  ;;  %7105 = vmatpush1.bf16.msra.mxu1 %v7104_v3  ;;  %v2451_v60 = vld [vmem:[#allocation8 + $0x3d0] sm:$0xff]  ;;  %v2454_v3 = vld [vmem:[#allocation8 + $0x3e8] sm:$0xff] }
  0xf9   : > { %930 = vmatmul.mubr.f32.gmra.mrb[38].mxu0 %v8224_v44  ;;  %7106 = vmatprep.subr.bf16.mxu1 %v9964_v0  ;;  %v7113_v58 = vpack.c.bf16 %v2452_v46, %v2451_v60  ;;  %v1380_v60 = vld [vmem:[#allocation2 + $0x1a] sm:$0xff]  ;;  %v2460_v46 = vld [vmem:[#allocation8 + $0x418] sm:$0xff] }
  0xfa   : > { %934 = vmatprep.mubr.f32.mxu0 %v8001_v23 }
  0xfb   : > { %1709 = vmatmul.mubr.f32.gmra.mrb[54].mxu1 %v8182_v31 }
  0xfc   : > { %1713 = vmatprep.mubr.f32.mxu1 %v7973_v62  ;;  %7108 = vmatpush1.bf16.msra.mxu1 %v7107_v25  ;;  %v2453_v62 = vld [vmem:[#allocation8 + $0x3e0] sm:$0xff]  ;;  %v2456_v25 = vld [vmem:[#allocation8 + $0x3f8] sm:$0xff] }
  0xfd   : > { %935 = vmatmul.mubr.f32.gmra.mrb[40].mxu0 %v8231_v48  ;;  %7109 = vmatprep.subr.bf16.mxu1 %v9964_v0  ;;  %v7116_v15 = vpack.c.bf16 %v2454_v3, %v2453_v62  ;;  %v2461_v3 = vld [vmem:[#allocation8 + $0x420] sm:$0xff] }
  0xfe   : > { %939 = vmatprep.mubr.f32.mxu0 %v8004_v24 }
  0xff   : > { %1714 = vmatmul.mubr.f32.gmra.mrb[56].mxu1 %v8189_v32 }
 0x100   : > { %1718 = vmatprep.mubr.f32.mxu1 %v7976_v2  ;;  %7111 = vmatpush1.bf16.msra.mxu1 %v7110_v30  ;;  %v2455_v2 = vld [vmem:[#allocation8 + $0x3f0] sm:$0xff]  ;;  %v8271_v30 = vld [vmem:[#allocation2 + $0x138] sm:$0xff] }
 0x101   : > { %940 = vmatmul.mubr.f32.gmra.mrb[42].mxu0 %v8238_v51  ;;  %7112 = vmatprep.subr.bf16.mxu1 %v9964_v0  ;;  %v7119_v11 = vpack.c.bf16 %v2456_v25, %v2455_v2  ;;  %v8315_v2 = vld [vmem:[#allocation2 + $0x4a] sm:$0xff] }
 0x102   : > { %944 = vmatprep.mubr.f32.mxu0 %v8009_v28 }
 0x103   : > { %1719 = vmatmul.mubr.f32.gmra.mrb[58].mxu1 %v8196_v34 }
 0x104   : > { %1723 = vmatprep.mubr.f32.mxu1 %v7982_v8  ;;  %7114 = vmatpush1.bf16.msra.mxu1 %v7113_v58  ;;  %v8259_v8 = vld [vmem:[#allocation2 + $0x120] sm:$0xff] }
 0x105   : > { %945 = vmatmul.mubr.f32.gmra.mrb[44].mxu0 %v8245_v52  ;;  %7115 = vmatprep.subr.bf16.mxu1 %v9964_v0  ;;  %v1381_v58 = vld [vmem:[#allocation2 + $0x22] sm:$0xff] }
 0x106   : > { %949 = vmatprep.mubr.f32.mxu0 %v8013_v33 }
 0x107   : > { %1724 = vmatmul.mubr.f32.gmra.mrb[60].mxu1 %v8203_v38 }
 0x108   : > { %1728 = vmatprep.mubr.f32.mxu1 %v7985_v10  ;;  %7117 = vmatpush1.bf16.msra.mxu1 %v7116_v15  ;;  %v8265_v10 = vld [vmem:[#allocation2 + $0x128] sm:$0xff]  ;;  %v2462_v15 = vld [vmem:[#allocation8 + $0x428] sm:$0xff] }
 0x109   : > { %950 = vmatmul.mubr.f32.gmra.mrb[46].mxu0 %v8252_v59  ;;  %7118 = vmatprep.subr.bf16.mxu1 %v9964_v0  ;;  %v7129_v25 = vpack.c.bf16 %v2462_v15, %v2461_v3  ;;  %v2467_v15 = vld [vmem:[#allocation8 + $0x450] sm:$0xff] }
 0x10a   : > { %954 = vmatprep.mubr.f32.mxu0 %v8019_v39 }
 0x10b   : > { %1729 = vmatmul.mubr.f32.gmra.mrb[62].mxu1 %v8210_v41 }
 0x10c   : > { %1733 = vmatprep.mubr.f32.mxu1 %v7991_v16  ;;  %7120 = vmatpush1.bf16.msra.mxu1 %v7119_v11  ;;  %v8277_v16 = vld [vmem:[#allocation2 + $0x140] sm:$0xff] }
 0x10d   : > { %955 = vmatmul.mubr.f32.gmra.mrb[48].mxu0 %v8259_v8  ;;  %v2463_v11 = vld [vmem:[#allocation8 + $0x430] sm:$0xff] }
 0x10e   : > { %959 = vmatprep.mubr.f32.mxu0 %v8022_v40 }
 0x10f   : > { %1734 = vmatmul.mubr.f32.gmra.mrb[64].mxu1 %v8217_v42 }
 0x110   : > { %1738 = vmatprep.mubr.f32.mxu1 %v7995_v19  ;;  %v8283_v19 = vld [vmem:[#allocation2 + $0x150] sm:$0xff] }
 0x111   : > { %960 = vmatmul.mubr.f32.gmra.mrb[50].mxu0 %v8265_v10 }
 0x112   : > { %964 = vmatprep.mubr.f32.mxu0 %v8028_v53 }
 0x113   : > { %1739 = vmatmul.mubr.f32.gmra.mrb[66].mxu1 %v8224_v44 }
 0x114   : > { %1743 = vmatprep.mubr.f32.mxu1 %v8001_v23  ;;  %v8289_v23 = vld [vmem:[#allocation2 + $0x158] sm:$0xff] }
 0x115   : > { %965 = vmatmul.mubr.f32.gmra.mrb[52].mxu0 %v8271_v30 }
 0x116   : > { %969 = vmatprep.mubr.f32.mxu0 %v8031_v54 }
 0x117   : > { %1744 = vmatmul.mubr.f32.gmra.mrb[68].mxu1 %v8231_v48 }
 0x118   : > { %1748 = vmatprep.mubr.f32.mxu1 %v8004_v24  ;;  %v8295_v24 = vld [vmem:[#allocation2 + $0x168] sm:$0xff] }
 0x119   : > { %970 = vmatmul.mubr.f32.gmra.mrb[54].mxu0 %v8277_v16  ;;  %10009 = vst [vmem:[#allocation15_spill] sm:$0xff] %v8295_v24 }
 0x11a   : > { %974 = vmatprep.mubr.f32.mxu0 %v8037_v61 }
 0x11b   : > { %1749 = vmatmul.mubr.f32.gmra.mrb[70].mxu1 %v8238_v51 }
 0x11c   : > { %1753 = vmatprep.mubr.f32.mxu1 %v8009_v28  ;;  %v8301_v28 = vld [vmem:[#allocation2 + $0x170] sm:$0xff] }
 0x11d   : > { %975 = vmatmul.mubr.f32.gmra.mrb[56].mxu0 %v8283_v19 }
 0x11e   : > { %979 = vmatprep.mubr.f32.mxu0 %v8040_v63 }
 0x11f   : > { %1754 = vmatmul.mubr.f32.gmra.mrb[72].mxu1 %v8245_v52 }
 0x120   : > { %1758 = vmatprep.mubr.f32.mxu1 %v8013_v33  ;;  %v2459_v33 = vld [vmem:[#allocation8 + $0x410] sm:$0xff] }
 0x121   : > { %980 = vmatmul.mubr.f32.gmra.mrb[58].mxu0 %v8289_v23  ;;  %v7125_v62 = vpack.c.bf16 %v2460_v46, %v2459_v33  ;;  %v2465_v46 = vld [vmem:[#allocation8 + $0x440] sm:$0xff] }
 0x122   : > { %984 = vmatprep.mubr.f32.mxu0 %v8046_v7 }
 0x123   : > { %1759 = vmatmul.mubr.f32.gmra.mrb[74].mxu1 %v8252_v59 }
 0x124   : > { %1763 = vmatprep.mubr.f32.mxu1 %v8019_v39  ;;  %v8307_v39 = vld [vmem:[#allocation2 + $0x32] sm:$0xff] }
 0x125   : > { %985 = vmatmul.mubr.f32.gmra.mrb[60].mxu0 %v8295_v24 }
 0x126   : > { %989 = vmatprep.mubr.f32.mxu0 %v8050_v12 }
 0x127   : > { %1764 = vmatmul.mubr.f32.gmra.mrb[76].mxu1 %v8259_v8 }
 0x128   : > { %1768 = vmatprep.mubr.f32.mxu1 %v8022_v40  ;;  %v8312_v40 = vld [vmem:[#allocation2 + $0x3a] sm:$0xff] }
 0x129   : > { %990 = vmatmul.mubr.f32.gmra.mrb[62].mxu0 %v8301_v28 }
 0x12a   : > { %6545 = vmatprep.mubr.f32.mxu0 %v1380_v60  ;;  %v2464_v60 = vld [vmem:[#allocation8 + $0x438] sm:$0xff] }
 0x12b   : > { %1769 = vmatmul.mubr.f32.gmra.mrb[78].mxu1 %v8265_v10  ;;  %v7133_v33 = vpack.c.bf16 %v2464_v60, %v2463_v11  ;;  %v2468_v11 = vld [vmem:[#allocation8 + $0x458] sm:$0xff] }
 0x12c   : > { %1773 = vmatprep.mubr.f32.mxu1 %v8028_v53  ;;  %v8320_v53 = vld [vmem:[#allocation2 + $0x52] sm:$0xff]  ;;  %v7141_v60 = vpack.c.bf16 %v2468_v11, %v2467_v15  ;;  %v2471_v15 = vld [vmem:[#allocation8 + $0x470] sm:$0xff]  ;;  %v2472_v11 = vld [vmem:[#allocation8 + $0x478] sm:$0xff] }
 0x12d   : > { %6546 = vmatmul.mubr.f32.vlgmr.msra.gmra.mrb[64].mxu0 %v1381_v58  ;;  %v2466_v58 = vld [vmem:[#allocation8 + $0x448] sm:$0xff] }
 0x12e   : > { %7124 = vmatpush3.bf16.msra.mxu0 %v8138_v1  ;;  %6548 = vmatprep.mubr.f32.mxu0 %v8307_v39  ;;  %v8323_v1 = vld [vmem:[#allocation2 + $0x62] sm:$0xff]  ;;  %v7137_v3 = vpack.c.bf16 %v2466_v58, %v2465_v46  ;;  %v2469_v46 = vld [vmem:[#allocation8 + $0x460] sm:$0xff]  ;;  %v2470_v58 = vld [vmem:[#allocation8 + $0x468] sm:$0xff] }
 0x12f   : > { %1774 = vmatmul.mubr.f32.gmra.mrb[80].mxu1 %v8271_v30  ;;  %7126 = vmatprep.subr.bf16.mxu0 %v7125_v62  ;;  %v7145_v0 = vpack.c.bf16 %v2470_v58, %v2469_v46  ;;  %v8358_v46 = vld [vmem:[#allocation2 + $0x180] sm:$0xff]  ;;  %v2200_v58 = vld [vmem:[#allocation2 + $0x31] sm:$0xff] }
 0x130   : > { %1778 = vmatprep.mubr.f32.mxu1 %v8031_v54  ;;  %v8328_v54 = vld [vmem:[#allocation2 + $0x6a] sm:$0xff] }
 0x131   : > { %6549 = vmatmul.mubr.f32.gmra.mrb[66].mxu0 %v8312_v40 }
 0x132   : > { %6551 = vmatprep.mubr.f32.mxu0 %v8315_v2  ;;  %7128 = vmatpush3.bf16.msra.mxu0 %v7125_v62  ;;  %v8331_v62 = vld [vmem:[#allocation2 + $0x7a] sm:$0xff] }
 0x133   : > { %1779 = vmatmul.mubr.f32.gmra.mrb[82].mxu1 %v8277_v16  ;;  %7130 = vmatprep.subr.bf16.mxu0 %v7129_v25 }
 0x134   : > { %1783 = vmatprep.mubr.f32.mxu1 %v8037_v61  ;;  %v8336_v61 = vld [vmem:[#allocation2 + $0x82] sm:$0xff] }
 0x135   : > { %6552 = vmatmul.mubr.f32.gmra.mrb[68].mxu0 %v8320_v53 }
 0x136   : > { %6554 = vmatprep.mubr.f32.mxu0 %v8323_v1  ;;  %7132 = vmatpush3.bf16.msra.mxu0 %v7129_v25  ;;  %v8339_v25 = vld [vmem:[#allocation2 + $0x92] sm:$0xff] }
 0x137   : > { %1784 = vmatmul.mubr.f32.gmra.mrb[84].mxu1 %v8283_v19  ;;  %7134 = vmatprep.subr.bf16.mxu0 %v7133_v33 }
 0x138   : > { %1788 = vmatprep.mubr.f32.mxu1 %v8040_v63  ;;  %v8344_v63 = vld [vmem:[#allocation2 + $0x9a] sm:$0xff] }
 0x139   : > { %6555 = vmatmul.mubr.f32.gmra.mrb[70].mxu0 %v8328_v54 }
 0x13a   : > { %6557 = vmatprep.mubr.f32.mxu0 %v8331_v62  ;;  %7136 = vmatpush3.bf16.msra.mxu0 %v7133_v33  ;;  %v8347_v33 = vld [vmem:[#allocation2 + $0xaa] sm:$0xff] }
 0x13b   : > { %1789 = vmatmul.mubr.f32.gmra.mrb[86].mxu1 %v8289_v23  ;;  %7138 = vmatprep.subr.bf16.mxu0 %v7137_v3 }
 0x13c   : > { %1793 = vmatprep.mubr.f32.mxu1 %v8046_v7  ;;  %v8352_v7 = vld [vmem:[#allocation2 + $0xb2] sm:$0xff] }
 0x13d   : > { %6558 = vmatmul.mubr.f32.gmra.mrb[72].mxu0 %v8336_v61 }
 0x13e   : > { %6560 = vmatprep.mubr.f32.mxu0 %v8339_v25  ;;  %7140 = vmatpush3.bf16.msra.mxu0 %v7137_v3  ;;  %v8355_v3 = vld [vmem:[#allocation2 + $0xc2] sm:$0xff] }
 0x13f   : > { %1794 = vmatmul.mubr.f32.gmra.mrb[88].mxu1 %v8295_v24  ;;  %7142 = vmatprep.subr.bf16.mxu0 %v7141_v60  ;;  %v7149_v24 = vpack.c.bf16 %v2472_v11, %v2471_v15  ;;  %v2215_v15 = vld [vmem:[#allocation2 + $0xe1] sm:$0xff] }
 0x140   : > { %1798 = vmatprep.mubr.f32.mxu1 %v8050_v12  ;;  %v8362_v12 = vld [vmem:[#allocation2 + $0xca] sm:$0xff]  ;;  %v2279_v11 = vld [vmem:[#allocation2 + $0xe2] sm:$0xff] }
 0x141   : > { %6561 = vmatmul.mubr.f32.gmra.mrb[74].mxu0 %v8344_v63 }
 0x142   : > { %6563 = vmatprep.mubr.f32.mxu0 %v8347_v33  ;;  %7144 = vmatpush3.bf16.msra.mxu0 %v7141_v60  ;;  %v8366_v60 = vld [vmem:[#allocation2 + $0x188] sm:$0xff] }
 0x143   : > { %1799 = vmatmul.mubr.f32.gmra.mrb[90].mxu1 %v8301_v28  ;;  %7146 = vmatprep.subr.bf16.mxu0 %v7145_v0 }
 0x144   : > { %1803 = vmatprep.mubr.f32.mxu1 %v8108_v43  ;;  %v10010_v43 = vmov 0.0|0.0  }
 0x145   : > { %6564 = vmatmul.mubr.f32.gmra.mrb[76].mxu0 %v8352_v7 }
 0x146   : > { %6566 = vmatprep.mubr.f32.mxu0 %v8355_v3  ;;  %7148 = vmatpush3.bf16.msra.mxu0 %v7145_v0  ;;  %v2201_v0 = vld [vmem:[#allocation2 + $0x39] sm:$0xff] }
 0x147   : > { %1804 = vmatmul.mubr.f32.gmra.mrb[92].mxu1 %v8358_v46  ;;  %7150 = vmatprep.subr.bf16.mxu0 %v7149_v24 }
 0x148   : > { %1808 = vmatprep.mubr.f32.mxu1 %v8123_v9  ;;  %v2202_v9 = vld [vmem:[#allocation2 + $0x49] sm:$0xff] }
 0x149   : > { %6567 = vmatmul.mubr.f32.gmra.mrb[78].mxu0 %v8362_v12 }
 0x14a   : > { %6569 = vmatprep.mubr.f32.mxu0 %v8062_v22  ;;  %7152 = vmatpush3.bf16.msra.mxu0 %v7149_v24  ;;  %v2203_v22 = vld [vmem:[#allocation2 + $0x51] sm:$0xff]  ;;  %v2212_v24 = vld [vmem:[#allocation2 + $0xc1] sm:$0xff] }
 0x14b   : > { %1809 = vmatmul.mubr.f32.gmra.mrb[94].mxu1 %v8366_v60  ;;  %7153 = vmatprep.subr.bf16.mxu0 %v10010_v43 }
 0x14c   : > { %2537 = vmatprep.mubr.f32.mxu1 %v2200_v58  ;;  %v3482_v58 = vld [vmem:[#allocation10 + $0x8] sm:$0xff] }
 0x14d   : > { %6570 = vmatmul.mubr.f32.gmra.mrb[80].mxu0 %v8065_v29  ;;  %v2204_v29 = vld [vmem:[#allocation2 + $0x61] sm:$0xff] }
 0x14e   : > { %6572 = vmatprep.mubr.f32.mxu0 %v8069_v37  ;;  %v2205_v37 = vld [vmem:[#allocation2 + $0x69] sm:$0xff] }
 0x14f   : > { %2538 = vmatmul.mubr.f32.vlgmr.msra.gmra.mrb[96].mxu1 %v8094_v17  ;;  %v2207_v17 = vld [vmem:[#allocation2 + $0x81] sm:$0xff] }
 0x150   : > { %2542 = vmatprep.mubr.f32.mxu1 %v2201_v0 }
 0x151   : > { %6573 = vmatmul.mubr.f32.gmra.mrb[82].mxu0 %v8076_v49  ;;  %v2206_v49 = vld [vmem:[#allocation2 + $0x79] sm:$0xff] }
 0x152   : > { %6575 = vmatprep.mubr.f32.mxu0 %v8080_v56 }
 0x153   : > { %2543 = vmatmul.mubr.f32.gmra.mrb[98].mxu1 %v8105_v36 }
 0x154   : > { %2547 = vmatprep.mubr.f32.mxu1 %v2202_v9 }
 0x155   : > { %6576 = vmatmul.mubr.f32.gmra.mrb[84].mxu0 %v8087_v5  ;;  %v8392_v5 = vld [vmem:[#allocation2 + $0x182] sm:$0xff] }
 0x156   : > { %6578 = vmatprep.mubr.f32.mxu0 %v8091_v13 }
 0x157   : > { %2548 = vmatmul.mubr.f32.gmra.mrb[100].mxu1 %v8120_v6 }
 0x158   : > { %2552 = vmatprep.mubr.f32.mxu1 %v2203_v22 }
 0x159   : > { %6579 = vmatmul.mubr.f32.gmra.mrb[86].mxu0 %v8098_v20  ;;  %v8396_v20 = vld [vmem:[#allocation2 + $0x18a] sm:$0xff] }
 0x15a   : > { %6581 = vmatprep.mubr.f32.mxu0 %v8102_v27 }
 0x15b   : > { %2553 = vmatmul.mubr.f32.gmra.mrb[102].mxu1 %v8135_v35 }
 0x15c   : > { %2557 = vmatprep.mubr.f32.mxu1 %v2204_v29 }
 0x15d   : > { %6582 = vmatmul.mubr.f32.gmra.mrb[88].mxu0 %v8113_v47  ;;  %v2208_v47 = vld [vmem:[#allocation2 + $0x91] sm:$0xff] }
 0x15e   : > { %6584 = vmatprep.mubr.f32.mxu0 %v8117_v57 }
 0x15f   : > { %2558 = vmatmul.mubr.f32.gmra.mrb[104].mxu1 %v8146_v45 }
 0x160   : > { %2562 = vmatprep.mubr.f32.mxu1 %v2205_v37 }
 0x161   : > { %6585 = vmatmul.mubr.f32.gmra.mrb[90].mxu0 %v8128_v14  ;;  %v2209_v14 = vld [vmem:[#allocation2 + $0x99] sm:$0xff] }
 0x162   : > { %6587 = vmatprep.mubr.f32.mxu0 %v8132_v18  ;;  %v8389_v56 = vpop.f32.mrb[0].mxu1 }
 0x163   : > { %2563 = vmatmul.mubr.f32.gmra.mrb[106].mxu1 %v8154_v26  ;;  %v1061_v13 = vpop.f32.mrb[1].mxu1 }
 0x164   : > { %2567 = vmatprep.mubr.f32.mxu1 %v2206_v49  ;;  %v2281_v49 = vld [vmem:[#allocation2 + $0xfa] sm:$0xff] }
 0x165   : > { %6588 = vmatmul.mubr.f32.gmra.mrb[92].mxu0 %v8141_v50  ;;  %v2210_v50 = vld [vmem:[#allocation2 + $0xa9] sm:$0xff] }
 0x166   : > { %6590 = vmatprep.mubr.f32.mxu0 %v8392_v5  ;;  %v8398_v27 = vpop.f32.mrb[2].mxu1 }
 0x167   : > { %2568 = vmatmul.mubr.f32.gmra.mrb[108].mxu1 %v8161_v55  ;;  %v8401_v36 = vpop.f32.mrb[3].mxu1  ;;  %v2211_v55 = vld [vmem:[#allocation2 + $0xb1] sm:$0xff] }
 0x168   : > { %2572 = vmatprep.mubr.f32.mxu1 %v2207_v17  ;;  %v3484_v17 = vld [vmem:[#allocation10 + $0x18] sm:$0xff] }
 0x169   : > { %6591 = vmatmul.mubr.f32.gmra.mrb[94].mxu0 %v8396_v20 }
 0x16a   : > { %6625 = vmatprep.mubr.f32.mxu0 %v8307_v39  ;;  %v8405_v57 = vpop.f32.mrb[4].mxu1 }
 0x16b   : > { %2573 = vmatmul.mubr.f32.gmra.mrb[110].mxu1 %v8168_v4  ;;  %v8408_v6 = vpop.f32.mrb[5].mxu1 }
 0x16c   : > { %2577 = vmatprep.mubr.f32.mxu1 %v2208_v47 }
 0x16d   : > { %6626 = vmatmul.mubr.f32.vlgmr.msra.gmra.mrb[96].mxu0 %v8312_v40  ;;  %v2213_v40 = vld [vmem:[#allocation2 + $0xc9] sm:$0xff] }
 0x16e   : > { %6628 = vmatprep.mubr.f32.mxu0 %v8315_v2  ;;  %v8412_v18 = vpop.f32.mrb[6].mxu1 }
 0x16f   : > { %2578 = vmatmul.mubr.f32.gmra.mrb[112].mxu1 %v8175_v21  ;;  %v8415_v35 = vpop.f32.mrb[7].mxu1 }
 0x170   : > { %2582 = vmatprep.mubr.f32.mxu1 %v2209_v14 }
 0x171   : > { %6629 = vmatmul.mubr.f32.gmra.mrb[98].mxu0 %v8320_v53 }
 0x172   : > { %6631 = vmatprep.mubr.f32.mxu0 %v8323_v1  ;;  %v8419_v45 = vpop.f32.mrb[8].mxu1 }
 0x173   : > { %2583 = vmatmul.mubr.f32.gmra.mrb[114].mxu1 %v8182_v31  ;;  %v8422_v26 = vpop.f32.mrb[9].mxu1 }
 0x174   : > { %2587 = vmatprep.mubr.f32.mxu1 %v2210_v50 }
 0x175   : > { %6632 = vmatmul.mubr.f32.gmra.mrb[100].mxu0 %v8328_v54 }
 0x176   : > { %6634 = vmatprep.mubr.f32.mxu0 %v8331_v62  ;;  %v8426_v4 = vpop.f32.mrb[10].mxu1 }
 0x177   : > { %2588 = vmatmul.mubr.f32.gmra.mrb[116].mxu1 %v8189_v32  ;;  %v8429_v21 = vpop.f32.mrb[11].mxu1 }
 0x178   : > { %2592 = vmatprep.mubr.f32.mxu1 %v2211_v55 }
 0x179   : > { %6635 = vmatmul.mubr.f32.gmra.mrb[102].mxu0 %v8336_v61  ;;  %v2278_v61 = vld [vmem:[#allocation2 + $0xda] sm:$0xff] }
 0x17a   : > { %6637 = vmatprep.mubr.f32.mxu0 %v8339_v25  ;;  %v8433_v31 = vpop.f32.mrb[12].mxu1 }
 0x17b   : > { %2593 = vmatmul.mubr.f32.gmra.mrb[118].mxu1 %v8196_v34  ;;  %v8436_v39 = vpop.f32.mrb[13].mxu1  ;;  %v2214_v34 = vld [vmem:[#allocation2 + $0xd9] sm:$0xff] }
 0x17c   : > { %2597 = vmatprep.mubr.f32.mxu1 %v2212_v24  ;;  %v2217_v24 = vld [vmem:[#allocation2 + $0xf9] sm:$0xff] }
 0x17d   : > { %6638 = vmatmul.mubr.f32.gmra.mrb[104].mxu0 %v8344_v63 }
 0x17e   : > { %6640 = vmatprep.mubr.f32.mxu0 %v8347_v33  ;;  %v8440_v32 = vpop.f32.mrb[14].mxu1 }
 0x17f   : > { %2598 = vmatmul.mubr.f32.gmra.mrb[120].mxu1 %v8203_v38  ;;  %v8443_v2 = vpop.f32.mrb[15].mxu1 }
 0x180   : > { %v836_v53 = vpop.f32.mrb[0].mxu0  ;;  %2602 = vmatprep.mubr.f32.mxu1 %v2213_v40  ;;  %v2283_v40 = vld [vmem:[#allocation2 + $0x112] sm:$0xff] }
 0x181   : > { %v838_v1 = vpop.f32.mrb[1].mxu0  ;;  %v8445_v54 = vadd.f32 %v1061_v13, %v836_v53  ;;  %6641 = vmatmul.mubr.f32.gmra.mrb[106].mxu0 %v8352_v7  ;;  %v3483_v13 = vld [vmem:[#allocation10 + $0x10] sm:$0xff] }
 0x182   : > { %6643 = vmatprep.mubr.f32.mxu0 %v8355_v3  ;;  %v8449_v62 = vpop.f32.mrb[16].mxu1  ;;  %v3481_v3 = vld [vmem:[#allocation10] sm:$0xff]  ;;  %v7157_v14 = vpack.c.bf16 %v3484_v17, %v3483_v13  ;;  %v3486_v1 = vld [vmem:[#allocation10 + $0x28] sm:$0xff] }
 0x183   : > { %2603 = vmatmul.mubr.f32.gmra.mrb[122].mxu1 %v8210_v41  ;;  %v8452_v25 = vpop.f32.mrb[17].mxu1  ;;  %v2280_v41 = vld [vmem:[#allocation2 + $0xf2] sm:$0xff]  ;;  %v7154_v9 = vpack.c.bf16 %v3482_v58, %v3481_v3 }
 0x184   : > { %v841_v38 = vpop.f32.mrb[2].mxu0  ;;  %2607 = vmatprep.mubr.f32.mxu1 %v2214_v34  ;;  %v2284_v34 = vld [vmem:[#allocation2 + $0x122] sm:$0xff] }
 0x185   : > { %v8455_v63 = vadd.f32 %v8389_v56, %v841_v38  ;;  %v843_v33 = vpop.f32.mrb[3].mxu0  ;;  %6644 = vmatmul.mubr.f32.gmra.mrb[108].mxu0 %v8362_v12  ;;  %v2216_v12 = vld [vmem:[#allocation2 + $0xf1] sm:$0xff] }
 0x186   : > { %6646 = vmatprep.mubr.f32.mxu0 %v2278_v61  ;;  %v8458_v7 = vpop.f32.mrb[18].mxu1  ;;  %7155 = vmatpush1.bf16.msra.mxu0 %v7154_v9  ;;  %v3513_v38 = vld [vmem:[#allocation10 + $0x100] sm:$0xff]  ;;  %v3514_v33 = vld [vmem:[#allocation10 + $0x108] sm:$0xff] }
 0x187   : > { %2608 = vmatmul.mubr.f32.gmra.mrb[124].mxu1 %v8217_v42  ;;  %v8461_v0 = vpop.f32.mrb[19].mxu1  ;;  %v2282_v42 = vld [vmem:[#allocation2 + $0x10a] sm:$0xff]  ;;  %7156 = vmatprep.subr.bf16.mxu0 %v10010_v43 }
 0x188   : > { %v846_v22 = vpop.f32.mrb[4].mxu0  ;;  %2612 = vmatprep.mubr.f32.mxu1 %v2215_v15  ;;  %v2285_v9 = vld [vmem:[#allocation2 + $0x12a] sm:$0xff] }
 0x189   : > { %v8464_v29 = vadd.f32 %v8401_v36, %v846_v22  ;;  %v848_v37 = vpop.f32.mrb[5].mxu0  ;;  %6647 = vmatmul.mubr.f32.gmra.mrb[110].mxu0 %v2279_v11  ;;  %v7201_v11 = vpack.c.bf16 %v3514_v33, %v3513_v38  ;;  %v3487_v22 = vld [vmem:[#allocation10 + $0x30] sm:$0xff] }
 0x18a   : > { %6649 = vmatprep.mubr.f32.mxu0 %v2280_v41  ;;  %v8466_v56 = vpop.f32.mrb[20].mxu1  ;;  %7158 = vmatpush1.bf16.msra.mxu0 %v7157_v14  ;;  %v2218_v41 = vld [vmem:[#allocation2 + $0x109] sm:$0xff]  ;;  %v2219_v14 = vld [vmem:[#allocation2 + $0x111] sm:$0xff]  ;;  %v2220_v33 = vld [vmem:[#allocation2 + $0x121] sm:$0xff] }
 0x18b   : > { %2613 = vmatmul.mubr.f32.gmra.mrb[126].mxu1 %v8224_v44  ;;  %v8469_v47 = vpop.f32.mrb[21].mxu1  ;;  %v3485_v44 = vld [vmem:[#allocation10 + $0x20] sm:$0xff]  ;;  %7159 = vmatprep.subr.bf16.mxu0 %v10010_v43  ;;  %v3488_v37 = vld [vmem:[#allocation10 + $0x38] sm:$0xff] }
 0x18c   : > { %v851_v36 = vpop.f32.mrb[6].mxu0  ;;  %2617 = vmatprep.mubr.f32.mxu1 %v2216_v12  ;;  %7202 = vmatprep.subr.bf16.mxu1 %v7201_v11  ;;  %v2286_v12 = vld [vmem:[#allocation2 + $0x13a] sm:$0xff]  ;;  %v7163_v13 = vpack.c.bf16 %v3488_v37, %v3487_v22 }
 0x18d   : > { %v8473_v50 = vadd.f32 %v8398_v27, %v851_v36  ;;  %v853_v55 = vpop.f32.mrb[7].mxu0  ;;  %6650 = vmatmul.mubr.f32.gmra.mrb[112].mxu0 %v2281_v49  ;;  %v7160_v27 = vpack.c.bf16 %v3486_v1, %v3485_v44  ;;  %7204 = vmatpush3.bf16.msra.mxu1 %v7201_v11  ;;  %v2287_v36 = vld [vmem:[#allocation2 + $0x142] sm:$0xff] }
 0x18e   : > { %6652 = vmatprep.mubr.f32.mxu0 %v2282_v42  ;;  %v8475_v53 = vpop.f32.mrb[22].mxu1  ;;  %v3492_v11 = vld [vmem:[#allocation10 + $0x58] sm:$0xff] }
 0x18f   : > { %2618 = vmatmul.mubr.f32.gmra.mrb[128].mxu1 %v8231_v48  ;;  %v8478_v61 = vpop.f32.mrb[23].mxu1  ;;  %7161 = vmatpush1.bf16.msra.mxu0 %v7160_v27  ;;  %v2289_v27 = vld [vmem:[#allocation2 + $0x15a] sm:$0xff] }
 0x190   : > { %v856_v15 = vpop.f32.mrb[8].mxu0  ;;  %2622 = vmatprep.mubr.f32.mxu1 %v2217_v24  ;;  %7162 = vmatprep.subr.bf16.mxu0 %v10010_v43  ;;  %v3490_v24 = vld [vmem:[#allocation10 + $0x48] sm:$0xff] }
 0x191   : > { %v8482_v3 = vadd.f32 %v8408_v6, %v856_v15  ;;  %v858_v58 = vpop.f32.mrb[9].mxu0  ;;  %6653 = vmatmul.mubr.f32.gmra.mrb[114].mxu0 %v2283_v40  ;;  %v2288_v40 = vld [vmem:[#allocation2 + $0x152] sm:$0xff] }
 0x192   : > { %6655 = vmatprep.mubr.f32.mxu0 %v2284_v34  ;;  %v8484_v48 = vpop.f32.mrb[24].mxu1  ;;  %v2290_v58 = vld [vmem:[#allocation2 + $0x16a] sm:$0xff] }
 0x193   : > { %2623 = vmatmul.mubr.f32.gmra.mrb[130].mxu1 %v8238_v51  ;;  %v8487_v49 = vpop.f32.mrb[25].mxu1  ;;  %v3489_v51 = vld [vmem:[#allocation10 + $0x40] sm:$0xff]  ;;  %7164 = vmatpush1.bf16.msra.mxu0 %v7163_v13 }
 0x194   : > { %v861_v17 = vpop.f32.mrb[10].mxu0  ;;  %2627 = vmatprep.mubr.f32.mxu1 %v2218_v41  ;;  %v7166_v1 = vpack.c.bf16 %v3490_v24, %v3489_v51  ;;  %7165 = vmatprep.subr.bf16.mxu0 %v10010_v43  ;;  %v2291_v13 = vld [vmem:[#allocation2 + $0x172] sm:$0xff]  ;;  %v3516_v51 = vld [vmem:[#allocation10 + $0x118] sm:$0xff] }
 0x195   : > { %v8490_v6 = vadd.f32 %v8405_v57, %v861_v17  ;;  %v863_v42 = vpop.f32.mrb[11].mxu0  ;;  %6656 = vmatmul.mubr.f32.gmra.mrb[116].mxu0 %v2285_v9 }
 0x196   : > { %6658 = vmatprep.mubr.f32.mxu0 %v2286_v12  ;;  %v8493_v55 = vpop.f32.mrb[26].mxu1  ;;  %v2221_v12 = vld [vmem:[#allocation2 + $0x129] sm:$0xff]  ;;  %v3494_v42 = vld [vmem:[#allocation10 + $0x68] sm:$0xff] }
 0x197   : > { %2628 = vmatmul.mubr.f32.gmra.mrb[132].mxu1 %v8245_v52  ;;  %v8496_v44 = vpop.f32.mrb[27].mxu1  ;;  %v3491_v52 = vld [vmem:[#allocation10 + $0x50] sm:$0xff]  ;;  %7167 = vmatpush1.bf16.msra.mxu0 %v7166_v1 }
 0x198   : > { %v866_v57 = vpop.f32.mrb[12].mxu0  ;;  %2632 = vmatprep.mubr.f32.mxu1 %v2219_v14  ;;  %v7169_v9 = vpack.c.bf16 %v3492_v11, %v3491_v52  ;;  %7168 = vmatprep.subr.bf16.mxu0 %v10010_v43  ;;  %v2294_v11 = vld [vmem:[#allocation2 + $0x19a] sm:$0xff] }
 0x199   : > { %v8500_v34 = vadd.f32 %v8415_v35, %v866_v57  ;;  %v868_v38 = vpop.f32.mrb[13].mxu0  ;;  %6659 = vmatmul.mubr.f32.gmra.mrb[118].mxu0 %v2287_v36  ;;  %v3515_v36 = vld [vmem:[#allocation10 + $0x110] sm:$0xff] }
 0x19a   : > { %6661 = vmatprep.mubr.f32.mxu0 %v2288_v40  ;;  %v8502_v15 = vpop.f32.mrb[28].mxu1  ;;  %v2222_v38 = vld [vmem:[#allocation2 + $0x139] sm:$0xff] }
 0x19b   : > { %2633 = vmatmul.mubr.f32.gmra.mrb[134].mxu1 %v8252_v59  ;;  %v8505_v41 = vpop.f32.mrb[29].mxu1  ;;  %v3493_v59 = vld [vmem:[#allocation10 + $0x60] sm:$0xff]  ;;  %7170 = vmatpush1.bf16.msra.mxu0 %v7169_v9 }
 0x19c   : > { %v871_v22 = vpop.f32.mrb[14].mxu0  ;;  %2637 = vmatprep.mubr.f32.mxu1 %v2220_v33  ;;  %v7172_v24 = vpack.c.bf16 %v3494_v42, %v3493_v59  ;;  %7171 = vmatprep.subr.bf16.mxu0 %v10010_v43  ;;  %v3495_v33 = vld [vmem:[#allocation10 + $0x70] sm:$0xff] }
 0x19d   : > { %v8509_v35 = vadd.f32 %v8412_v18, %v871_v22  ;;  %v873_v37 = vpop.f32.mrb[15].mxu0  ;;  %6662 = vmatmul.mubr.f32.gmra.mrb[120].mxu0 %v2289_v27  ;;  %v7205_v18 = vpack.c.bf16 %v3516_v51, %v3515_v36  ;;  %v3496_v27 = vld [vmem:[#allocation10 + $0x78] sm:$0xff]  ;;  %v2224_v51 = vld [vmem:[#allocation2 + $0x151] sm:$0xff] }
 0x19e   : > { %6664 = vmatprep.mubr.f32.mxu0 %v2290_v58  ;;  %v8511_v17 = vpop.f32.mrb[30].mxu1  ;;  %v7175_v58 = vpack.c.bf16 %v3496_v27, %v3495_v33  ;;  %v2223_v37 = vld [vmem:[#allocation2 + $0x141] sm:$0xff]  ;;  %v2225_v27 = vld [vmem:[#allocation2 + $0x159] sm:$0xff] }
 0x19f   : > { %2638 = vmatmul.mubr.f32.gmra.mrb[136].mxu1 %v8259_v8  ;;  %v8514_v14 = vpop.f32.mrb[31].mxu1  ;;  %7206 = vmatprep.subr.bf16.mxu1 %v7205_v18 }
 0x1a0   : > { %v876_v40 = vpop.f32.mrb[16].mxu0  ;;  %2642 = vmatprep.mubr.f32.mxu1 %v2221_v12  ;;  %7173 = vmatpush1.bf16.msra.mxu0 %v7172_v24  ;;  %v3497_v12 = vld [vmem:[#allocation10 + $0x80] sm:$0xff] }
 0x1a1   : > { %v8518_v1 = vadd.f32 %v8422_v26, %v876_v40  ;;  %v878_v57 = vpop.f32.mrb[17].mxu0  ;;  %6665 = vmatmul.mubr.f32.gmra.mrb[122].mxu0 %v2291_v13  ;;  %7208 = vmatpush3.bf16.msra.mxu1 %v7205_v18  ;;  %v3498_v13 = vld [vmem:[#allocation10 + $0x88] sm:$0xff]  ;;  %v3499_v40 = vld [vmem:[#allocation10 + $0x90] sm:$0xff]  ;;  %v3500_v18 = vld [vmem:[#allocation10 + $0x98] sm:$0xff] }
 0x1a2   : > { %6667 = vmatprep.mubr.f32.mxu0 %v8392_v5  ;;  %v8521_v8 = vpop.f32.mrb[32].mxu1  ;;  %7174 = vmatprep.subr.bf16.mxu0 %v10010_v43  ;;  %v7178_v42 = vpack.c.bf16 %v3498_v13, %v3497_v12  ;;  %v7181_v57 = vpack.c.bf16 %v3500_v18, %v3499_v40 }
 0x1a3   : > { %2643 = vmatmul.mubr.f32.gmra.mrb[138].mxu1 %v8265_v10  ;;  %v1657_v52 = vpop.f32.mrb[33].mxu1  ;;  %v2295_v10 = vld [vmem:[#allocation2 + $0x1a2] sm:$0xff] }
 0x1a4   : > { %v881_v9 = vpop.f32.mrb[18].mxu0  ;;  %2647 = vmatprep.mubr.f32.mxu1 %v2222_v38  ;;  %7176 = vmatpush1.bf16.msra.mxu0 %v7175_v58  ;;  %v3502_v58 = vld [vmem:[#allocation10 + $0xa8] sm:$0xff] }
 0x1a5   : > { %v8525_v26 = vadd.f32 %v8419_v45, %v881_v9  ;;  %v883_v22 = vpop.f32.mrb[19].mxu0  ;;  %6668 = vmatmul.mubr.f32.gmra.mrb[124].mxu0 %v8396_v20  ;;  %7177 = vmatprep.subr.bf16.mxu0 %v10010_v43 }
 0x1a6   : > { %v8529_v5 = vpop.f32.mrb[34].mxu1  ;;  %6670 = vmatprep.mubr.f32.mxu0 %v2294_v11  ;;  %v3501_v11 = vld [vmem:[#allocation10 + $0xa0] sm:$0xff]  ;;  %v3518_v22 = vld [vmem:[#allocation10 + $0x128] sm:$0xff] }
 0x1a7   : > { %2648 = vmatmul.mubr.f32.gmra.mrb[140].mxu1 %v8271_v30  ;;  %v1662_v59 = vpop.f32.mrb[35].mxu1 }
 0x1a8   : > { %v886_v36 = vpop.f32.mrb[20].mxu0  ;;  %2652 = vmatprep.mubr.f32.mxu1 %v2223_v37  ;;  %7179 = vmatpush1.bf16.msra.mxu0 %v7178_v42  ;;  %v7184_v37 = vpack.c.bf16 %v3502_v58, %v3501_v11  ;;  %v2226_v59 = vld [vmem:[#allocation2 + $0x169] sm:$0xff] }
 0x1a9   : > { %v8534_v45 = vadd.f32 %v8429_v21, %v886_v36  ;;  %v888_v20 = vpop.f32.mrb[21].mxu0  ;;  %6671 = vmatmul.mubr.f32.gmra.mrb[126].mxu0 %v2295_v10  ;;  %7180 = vmatprep.subr.bf16.mxu0 %v10010_v43  ;;  %v3503_v36 = vld [vmem:[#allocation10 + $0xb0] sm:$0xff]  ;;  %v3505_v11 = vld [vmem:[#allocation10 + $0xc0] sm:$0xff] }
 0x1aa   : > { %v8536_v24 = vpop.f32.mrb[36].mxu1  ;;  %v10011_v58 = vld [vmem:[#allocation15_spill] sm:$0xff] }
 0x1ab   : > { %2653 = vmatmul.mubr.f32.gmra.mrb[142].mxu1 %v8277_v16  ;;  %v1667_v30 = vpop.f32.mrb[37].mxu1  ;;  %v3517_v16 = vld [vmem:[#allocation10 + $0x120] sm:$0xff] }
 0x1ac   : > { %v891_v38 = vpop.f32.mrb[22].mxu0  ;;  %2657 = vmatprep.mubr.f32.mxu1 %v2224_v51  ;;  %7182 = vmatpush1.bf16.msra.mxu0 %v7181_v57  ;;  %v7209_v12 = vpack.c.bf16 %v3518_v22, %v3517_v16  ;;  %v2227_v30 = vld [vmem:[#allocation2 + $0x171] sm:$0xff]  ;;  %v3519_v57 = vld [vmem:[#allocation10 + $0x130] sm:$0xff] }
 0x1ad   : > { %v8541_v33 = vadd.f32 %v8426_v4, %v891_v38  ;;  %v893_v21 = vpop.f32.mrb[23].mxu0  ;;  %7183 = vmatprep.subr.bf16.mxu0 %v10010_v43  ;;  %v3520_v38 = vld [vmem:[#allocation10 + $0x138] sm:$0xff] }
 0x1ae   : > { %v8543_v52 = vpop.f32.mrb[38].mxu1  ;;  %7210 = vmatprep.subr.bf16.mxu1 %v7209_v12 }
 0x1af   : > { %2658 = vmatmul.mubr.f32.gmra.mrb[144].mxu1 %v8283_v19  ;;  %v1672_v9 = vpop.f32.mrb[39].mxu1  ;;  %v3504_v19 = vld [vmem:[#allocation10 + $0xb8] sm:$0xff] }
 0x1b0   : > { %v896_v10 = vpop.f32.mrb[24].mxu0  ;;  %2662 = vmatprep.mubr.f32.mxu1 %v2225_v27  ;;  %7185 = vmatpush1.bf16.msra.mxu0 %v7184_v37  ;;  %v7187_v51 = vpack.c.bf16 %v3504_v19, %v3503_v36  ;;  %v7213_v27 = vpack.c.bf16 %v3520_v38, %v3519_v57  ;;  %v3507_v36 = vld [vmem:[#allocation10 + $0xd0] sm:$0xff]  ;;  %v3508_v19 = vld [vmem:[#allocation10 + $0xd8] sm:$0xff] }
 0x1b1   : > { %v8548_v4 = vadd.f32 %v8436_v39, %v896_v10  ;;  %v898_v13 = vpop.f32.mrb[25].mxu0  ;;  %7212 = vmatpush3.bf16.msra.mxu1 %v7209_v12  ;;  %7186 = vmatprep.subr.bf16.mxu0 %v10010_v43  ;;  %v3521_v10 = vld [vmem:[#allocation10 + $0x140] sm:$0xff]  ;;  %v3522_v12 = vld [vmem:[#allocation10 + $0x148] sm:$0xff]  ;;  %v3523_v57 = vld [vmem:[#allocation10 + $0x150] sm:$0xff] }
 0x1b2   : > { %v8550_v42 = vpop.f32.mrb[40].mxu1  ;;  %7214 = vmatprep.subr.bf16.mxu1 %v7213_v27  ;;  %v3524_v38 = vld [vmem:[#allocation10 + $0x158] sm:$0xff] }
 0x1b3   : > { %2663 = vmatmul.mubr.f32.gmra.mrb[146].mxu1 %v8289_v23  ;;  %v1677_v20 = vpop.f32.mrb[41].mxu1  ;;  %v3506_v23 = vld [vmem:[#allocation10 + $0xc8] sm:$0xff] }
 0x1b4   : > { %v901_v40 = vpop.f32.mrb[26].mxu0  ;;  %2667 = vmatprep.mubr.f32.mxu1 %v2226_v59  ;;  %7188 = vmatpush1.bf16.msra.mxu0 %v7187_v51  ;;  %v7190_v16 = vpack.c.bf16 %v3506_v23, %v3505_v11  ;;  %v7217_v59 = vpack.c.bf16 %v3522_v12, %v3521_v10  ;;  %v7193_v51 = vpack.c.bf16 %v3508_v19, %v3507_v36  ;;  %v3510_v23 = vld [vmem:[#allocation10 + $0xe8] sm:$0xff]  ;;  %v3525_v12 = vld [vmem:[#allocation10 + $0x160] sm:$0xff]  ;;  %v3511_v19 = vld [vmem:[#allocation10 + $0xf0] sm:$0xff] }
 0x1b5   : > { %v8554_v18 = vadd.f32 %v8433_v31, %v901_v40  ;;  %v903_v39 = vpop.f32.mrb[27].mxu0  ;;  %7216 = vmatpush3.bf16.msra.mxu1 %v7213_v27  ;;  %7189 = vmatprep.subr.bf16.mxu0 %v10010_v43  ;;  %v7221_v11 = vpack.c.bf16 %v3524_v38, %v3523_v57  ;;  %v2230_v10 = vld [vmem:[#allocation2 + $0x199] sm:$0xff]  ;;  %v2231_v38 = vld [vmem:[#allocation2 + $0x1a1] sm:$0xff] }
 0x1b6   : > { %v8557_v21 = vpop.f32.mrb[42].mxu1  ;;  %v7466_v39 = vld [vmem:[#allocation2 + $0x181] sm:$0xff]  ;;  %7218 = vmatprep.subr.bf16.mxu1 %v7217_v59 }
 0x1b7   : > { %2668 = vmatmul.mubr.f32.gmra.mrb[148].mxu1 %v10011_v58  ;;  %v1682_v9 = vpop.f32.mrb[43].mxu1 }
 0x1b8   : > { %v906_v22 = vpop.f32.mrb[28].mxu0  ;;  %2672 = vmatprep.mubr.f32.mxu1 %v2227_v30  ;;  %7191 = vmatpush1.bf16.msra.mxu0 %v7190_v16 }
 0x1b9   : > { %v8561_v31 = vadd.f32 %v8443_v2, %v906_v22  ;;  %v908_v37 = vpop.f32.mrb[29].mxu0  ;;  %7220 = vmatpush3.bf16.msra.mxu1 %v7217_v59  ;;  %7192 = vmatprep.subr.bf16.mxu0 %v10010_v43  ;;  %v7467_v22 = vld [vmem:[#allocation2 + $0x189] sm:$0xff]  ;;  %v3526_v59 = vld [vmem:[#allocation10 + $0x168] sm:$0xff] }
 0x1ba   : > { %v8564_v13 = vpop.f32.mrb[44].mxu1  ;;  %7222 = vmatprep.subr.bf16.mxu1 %v7221_v11 }
 0x1bb   : > { %2673 = vmatmul.mubr.f32.gmra.mrb[150].mxu1 %v8301_v28  ;;  %v1687_v20 = vpop.f32.mrb[45].mxu1  ;;  %v3509_v28 = vld [vmem:[#allocation10 + $0xe0] sm:$0xff] }
 0x1bc   : > { %v911_v40 = vpop.f32.mrb[30].mxu0  ;;  %2677 = vmatprep.mubr.f32.mxu1 %v7466_v39  ;;  %7194 = vmatpush1.bf16.msra.mxu0 %v7193_v51  ;;  %v7196_v9 = vpack.c.bf16 %v3510_v23, %v3509_v28  ;;  %v3512_v20 = vld [vmem:[#allocation10 + $0xf8] sm:$0xff] }
 0x1bd   : > { %v8568_v2 = vadd.f32 %v8440_v32, %v911_v40  ;;  %v913_v30 = vpop.f32.mrb[31].mxu0  ;;  %7224 = vmatpush3.bf16.msra.mxu1 %v7221_v11  ;;  %7195 = vmatprep.subr.bf16.mxu0 %v10010_v43  ;;  %v7199_v40 = vpack.c.bf16 %v3512_v20, %v3511_v19  ;;  %v3527_v11 = vld [vmem:[#allocation10 + $0x170] sm:$0xff]  ;;  %v3528_v28 = vld [vmem:[#allocation10 + $0x178] sm:$0xff] }
 0x1be   : > { %v8571_v27 = vpop.f32.mrb[46].mxu1 }
 0x1bf   : > { %2678 = vmatmul.mubr.f32.gmra.mrb[152].mxu1 %v8358_v46  ;;  %v1692_v58 = vpop.f32.mrb[47].mxu1  ;;  %v7225_v46 = vpack.c.bf16 %v3526_v59, %v3525_v12  ;;  %v3321_v12 = vld [vmem:[#allocation2 + $0x2] sm:$0xff] }
 0x1c0   : > { %v916_v16 = vpop.f32.mrb[32].mxu0  ;;  %2682 = vmatprep.mubr.f32.mxu1 %v7467_v22  ;;  %7197 = vmatpush1.bf16.msra.mxu0 %v7196_v9  ;;  %v3257_v58 = vld [vmem:[#allocation2 + $0x1] sm:$0xff]  ;;  %v3258_v59 = vld [vmem:[#allocation2 + $0x9] sm:$0xff] }
 0x1c1   : > { %v8575_v32 = vadd.f32 %v8452_v25, %v916_v16  ;;  %v918_v37 = vpop.f32.mrb[33].mxu0  ;;  %v2166_v25 = vld [vmem:[#allocation2 + $0x198] sm:$0xff]  ;;  %7226 = vmatprep.subr.bf16.mxu1 %v7225_v46  ;;  %7198 = vmatprep.subr.bf16.mxu0 %v10010_v43  ;;  %v3193_v16 = vld [vmem:[#allocation2] sm:$0xff] }
 0x1c2   : > { %v8578_v36 = vpop.f32.mrb[48].mxu1  ;;  %7228 = vmatpush3.bf16.msra.mxu1 %v7225_v46  ;;  %3593 = vmatprep.mubr.f32.mxu0 %v3257_v58  ;;  %v7468_v46 = vld [vmem:[#allocation2 + $0x8] sm:$0xff] }
 0x1c3   : > { %2683 = vmatmul.mubr.f32.gmra.mrb[154].mxu1 %v8366_v60  ;;  %v1697_v51 = vpop.f32.mrb[49].mxu1  ;;  %v7229_v60 = vpack.c.bf16 %v3528_v28, %v3527_v11 }
 0x1c4   : > { %v921_v39 = vpop.f32.mrb[34].mxu0  ;;  %2687 = vmatprep.mubr.f32.mxu1 %v2230_v10  ;;  %7200 = vmatpush1.bf16.msra.mxu0 %v7199_v40  ;;  %v3322_v51 = vld [vmem:[#allocation2 + $0xa] sm:$0xff] }
 0x1c5   : > { %v8582_v30 = vadd.f32 %v8449_v62, %v921_v39  ;;  %v923_v57 = vpop.f32.mrb[35].mxu0  ;;  %7230 = vmatprep.subr.bf16.mxu1 %v7229_v60 }
 0x1c6   : > { %v8585_v23 = vpop.f32.mrb[50].mxu1  ;;  %7232 = vmatpush3.bf16.msra.mxu1 %v7229_v60 }
 0x1c7   : > { %2688 = vmatmul.mubr.f32.gmra.mrb[156].mxu1 %v2166_v25  ;;  %v1702_v9 = vpop.f32.mrb[51].mxu1  ;;  %3594 = vmatmul.mubr.f32.vlgmr.msra.gmra.mrb[128].mxu0 %v3193_v16 }
 0x1c8   : > { %v926_v22 = vpop.f32.mrb[36].mxu0  ;;  %2692 = vmatprep.mubr.f32.mxu1 %v2231_v38  ;;  %7233 = vmatprep.subr.bf16.mxu1 %v10010_v43 }
 0x1c9   : > { %v8588_v62 = vadd.f32 %v8461_v0, %v926_v22  ;;  %v928_v37 = vpop.f32.mrb[37].mxu0  ;;  %3598 = vmatprep.mubr.f32.mxu0 %v3258_v59  ;;  %v4333_v59 = vld [vmem:[#allocation10 + $0x288] sm:$0xff] }
 0x1ca   : > { %v8590_v10 = vpop.f32.mrb[52].mxu1 }
 0x1cb   : > { %2693 = vmatmul.mubr.f32.gmra.mrb[158].mxu1 %v7468_v46  ;;  %v1707_v19 = vpop.f32.mrb[53].mxu1  ;;  %3599 = vmatmul.mubr.f32.gmra.mrb[130].mxu0 %v7468_v46 }
 0x1cc   : > { %v931_v20 = vpop.f32.mrb[38].mxu0  ;;  %6705 = vmatprep.mubr.f32.mxu1 %v3321_v12  ;;  %v4332_v12 = vld [vmem:[#allocation10 + $0x280] sm:$0xff] }
 0x1cd   : > { %v8594_v0 = vadd.f32 %v8458_v7, %v931_v20  ;;  %v933_v40 = vpop.f32.mrb[39].mxu0  ;;  %v7281_v19 = vpack.c.bf16 %v4333_v59, %v4332_v12 }
 0x1ce   : > { %v8596_v39 = vpop.f32.mrb[54].mxu1 }
 0x1cf   : > { %v1712_v25 = vpop.f32.mrb[55].mxu1  ;;  %6706 = vmatmul.mubr.f32.vlgmr.msra.gmra.mrb[160].mxu1 %v3322_v51  ;;  %7282 = vmatprep.subr.bf16.mxu0 %v7281_v19 }
 0x1d0   : > { %v936_v57 = vpop.f32.mrb[40].mxu0  ;;  %7284 = vmatpush3.bf16.msra.mxu0 %v7281_v19 }
 0x1d1   : > { %v8599_v38 = vadd.f32 %v8469_v47, %v936_v57  ;;  %v938_v11 = vpop.f32.mrb[41].mxu0 }
 0x1d2   : > { %v8601_v28 = vpop.f32.mrb[56].mxu1 }
 0x1d3   : > { %v1717_v60 = vpop.f32.mrb[57].mxu1 }
 0x1d4   : > { %v941_v58 = vpop.f32.mrb[42].mxu0 }
 0x1d5   : > { %v8604_v9 = vadd.f32 %v8466_v56, %v941_v58  ;;  %v943_v7 = vpop.f32.mrb[43].mxu0 }
 0x1d6   : > { %v8606_v16 = vpop.f32.mrb[58].mxu1 }
 0x1d7   : > { %v1722_v22 = vpop.f32.mrb[59].mxu1 }
 0x1d8   : > { %v946_v37 = vpop.f32.mrb[44].mxu0 }
 0x1d9   : > { %v8609_v46 = vadd.f32 %v8478_v61, %v946_v37  ;;  %v948_v47 = vpop.f32.mrb[45].mxu0 }
 0x1da   : > { %v8611_v20 = vpop.f32.mrb[60].mxu1 }
 0x1db   : > { %10012 = vst [vmem:[#allocation15_spill] sm:$0xff] %v8609_v46  ;;  %v1727_v51 = vpop.f32.mrb[61].mxu1 }
 0x1dc   : > { %v951_v40 = vpop.f32.mrb[46].mxu0 }
 0x1dd   : > { %v8614_v56 = vadd.f32 %v8475_v53, %v951_v40  ;;  %v953_v25 = vpop.f32.mrb[47].mxu0 }
 0x1de   : > { %v8616_v57 = vpop.f32.mrb[62].mxu1  ;;  %v4334_v25 = vld [vmem:[#allocation10 + $0x290] sm:$0xff] }
 0x1df   : > { %v1732_v11 = vpop.f32.mrb[63].mxu1 }
 0x1e0   : > { %v956_v60 = vpop.f32.mrb[48].mxu0 }
 0x1e1   : > { %v8619_v58 = vadd.f32 %v8487_v49, %v956_v60  ;;  %v958_v61 = vpop.f32.mrb[49].mxu0  ;;  %v4335_v49 = vld [vmem:[#allocation10 + $0x298] sm:$0xff] }
 0x1e2   : > { %v8621_v7 = vpop.f32.mrb[64].mxu1  ;;  %v7285_v60 = vpack.c.bf16 %v4335_v49, %v4334_v25  ;;  %v4303_v25 = vld [vmem:[#allocation10 + $0x198] sm:$0xff] }
 0x1e3   : > { %10013 = vst [vmem:[#allocation16_spill] sm:$0xff] %v8619_v58  ;;  %v1737_v22 = vpop.f32.mrb[65].mxu1  ;;  %v4300_v58 = vld [vmem:[#allocation10 + $0x180] sm:$0xff] }
 0x1e4   : > { %v961_v37 = vpop.f32.mrb[50].mxu0  ;;  %7286 = vmatprep.subr.bf16.mxu0 %v7285_v60 }
 0x1e5   : > { %v8624_v12 = vadd.f32 %v8484_v48, %v961_v37  ;;  %v963_v59 = vpop.f32.mrb[51].mxu0  ;;  %v4301_v48 = vld [vmem:[#allocation10 + $0x188] sm:$0xff]  ;;  %7288 = vmatpush3.bf16.msra.mxu0 %v7285_v60 }
 0x1e6   : > { %v8626_v47 = vpop.f32.mrb[66].mxu1 }
 0x1e7   : > { %10014 = vst [vmem:[#allocation17_spill] sm:$0xff] %v8624_v12  ;;  %v1742_v53 = vpop.f32.mrb[67].mxu1 }
 0x1e8   : > { %v966_v19 = vpop.f32.mrb[52].mxu0  ;;  %v7234_v53 = vpack.c.bf16 %v4301_v48, %v4300_v58  ;;  %v4304_v58 = vld [vmem:[#allocation10 + $0x1a0] sm:$0xff] }
 0x1e9   : > { %v8629_v51 = vadd.f32 %v8496_v44, %v966_v19  ;;  %v968_v40 = vpop.f32.mrb[53].mxu0 }
 0x1ea   : > { %v8631_v11 = vpop.f32.mrb[68].mxu1  ;;  %7235 = vmatpush1.bf16.msra.mxu1 %v7234_v53  ;;  %v4302_v40 = vld [vmem:[#allocation10 + $0x190] sm:$0xff] }
 0x1eb   : > { %10015 = vst [vmem:[#allocation18_spill] sm:$0xff] %v8629_v51  ;;  %v1747_v61 = vpop.f32.mrb[69].mxu1  ;;  %7236 = vmatprep.subr.bf16.mxu1 %v10010_v43  ;;  %v7237_v51 = vpack.c.bf16 %v4303_v25, %v4302_v40  ;;  %v4306_v40 = vld [vmem:[#allocation10 + $0x1b0] sm:$0xff]  ;;  %v4307_v25 = vld [vmem:[#allocation10 + $0x1b8] sm:$0xff] }
 0x1ec   : > { %v971_v22 = vpop.f32.mrb[54].mxu0 }
 0x1ed   : > { %v8634_v37 = vadd.f32 %v8493_v55, %v971_v22  ;;  %v973_v59 = vpop.f32.mrb[55].mxu0  ;;  %v4305_v22 = vld [vmem:[#allocation10 + $0x1a8] sm:$0xff] }
 0x1ee   : > { %v8636_v12 = vpop.f32.mrb[70].mxu1  ;;  %7238 = vmatpush1.bf16.msra.mxu1 %v7237_v51  ;;  %v7240_v53 = vpack.c.bf16 %v4305_v22, %v4304_v58 }
 0x1ef   : > { %10016 = vst [vmem:[#allocation19_spill] sm:$0xff] %v8634_v37  ;;  %v1752_v44 = vpop.f32.mrb[71].mxu1  ;;  %7239 = vmatprep.subr.bf16.mxu1 %v10010_v43  ;;  %v7243_v37 = vpack.c.bf16 %v4307_v25, %v4306_v40 }
 0x1f0   : > { %v976_v19 = vpop.f32.mrb[56].mxu0 }
 0x1f1   : > { %v8640_v49 = vadd.f32 %v8505_v41, %v976_v19  ;;  %v978_v61 = vpop.f32.mrb[57].mxu0 }
 0x1f2   : > { %v8642_v46 = vpop.f32.mrb[72].mxu1  ;;  %7241 = vmatpush1.bf16.msra.mxu1 %v7240_v53  ;;  %v4309_v53 = vld [vmem:[#allocation10 + $0x1c8] sm:$0xff] }
 0x1f3   : > { %10017 = vst [vmem:[#allocation20_spill] sm:$0xff] %v8640_v49  ;;  %v1757_v55 = vpop.f32.mrb[73].mxu1  ;;  %7242 = vmatprep.subr.bf16.mxu1 %v10010_v43  ;;  %v4337_v49 = vld [vmem:[#allocation10 + $0x2a8] sm:$0xff] }
 0x1f4   : > { %v981_v60 = vpop.f32.mrb[58].mxu0  ;;  %v4336_v55 = vld [vmem:[#allocation10 + $0x2a0] sm:$0xff] }
 0x1f5   : > { %v8646_v48 = vadd.f32 %v8502_v15, %v981_v60  ;;  %v983_v59 = vpop.f32.mrb[59].mxu0  ;;  %v7289_v60 = vpack.c.bf16 %v4337_v49, %v4336_v55  ;;  %v4311_v49 = vld [vmem:[#allocation10 + $0x1d8] sm:$0xff] }
 0x1f6   : > { %v8648_v44 = vpop.f32.mrb[74].mxu1  ;;  %7244 = vmatpush1.bf16.msra.mxu1 %v7243_v37  ;;  %v4308_v59 = vld [vmem:[#allocation10 + $0x1c0] sm:$0xff]  ;;  %v4310_v37 = vld [vmem:[#allocation10 + $0x1d0] sm:$0xff] }
 0x1f7   : > { %10018 = vst [vmem:[#allocation21_spill] sm:$0xff] %v8646_v48  ;;  %v1762_v41 = vpop.f32.mrb[75].mxu1  ;;  %7290 = vmatprep.subr.bf16.mxu0 %v7289_v60  ;;  %7245 = vmatprep.subr.bf16.mxu1 %v10010_v43 }
 0x1f8   : > { %v986_v19 = vpop.f32.mrb[60].mxu0  ;;  %7292 = vmatpush3.bf16.msra.mxu0 %v7289_v60 }
 0x1f9   : > { %v8652_v51 = vadd.f32 %v8514_v14, %v986_v19  ;;  %v988_v61 = vpop.f32.mrb[61].mxu0  ;;  %v7246_v19 = vpack.c.bf16 %v4309_v53, %v4308_v59 }
 0x1fa   : > { %v8654_v15 = vpop.f32.mrb[76].mxu1 }
 0x1fb   : > { %10019 = vst [vmem:[#allocation22_spill] sm:$0xff] %v8652_v51  ;;  %v1767_v58 = vpop.f32.mrb[77].mxu1  ;;  %7247 = vmatpush1.bf16.msra.mxu1 %v7246_v19  ;;  %v7249_v51 = vpack.c.bf16 %v4311_v49, %v4310_v37  ;;  %v4313_v19 = vld [vmem:[#allocation10 + $0x1e8] sm:$0xff]  ;;  %v4314_v49 = vld [vmem:[#allocation10 + $0x1f0] sm:$0xff] }
 0x1fc   : > { %v991_v22 = vpop.f32.mrb[62].mxu0  ;;  %7248 = vmatprep.subr.bf16.mxu1 %v10010_v43 }
 0x1fd   : > { %v8658_v41 = vadd.f32 %v8511_v17, %v991_v22  ;;  %v993_v14 = vpop.f32.mrb[63].mxu0 }
 0x1fe   : > { %v8660_v61 = vpop.f32.mrb[78].mxu1  ;;  %v4312_v14 = vld [vmem:[#allocation10 + $0x1e0] sm:$0xff] }
 0x1ff   : > { %v1772_v40 = vpop.f32.mrb[79].mxu1  ;;  %7250 = vmatpush1.bf16.msra.mxu1 %v7249_v51 }
 0x200   : > { %v6547_v25 = vpop.f32.mrb[64].mxu0  ;;  %7251 = vmatprep.subr.bf16.mxu1 %v10010_v43 }
 0x201   : > { %v1886_v55 = vadd.f32 %v6547_v25, %v8529_v5  ;;  %v1880_v58 = vpop.f32.mrb[65].mxu0  ;;  %v7252_v25 = vpack.c.bf16 %v4313_v19, %v4312_v14 }
 0x202   : > { %v1881_v48 = vadd.f32 %v1880_v58, %v8521_v8  ;;  %v8665_v17 = vpop.f32.mrb[80].mxu1 }
 0x203   : > { %v8668_v60 = vadd.f32 %v1886_v55, %v8455_v63  ;;  %v1777_v22 = vpop.f32.mrb[81].mxu1  ;;  %7253 = vmatpush1.bf16.msra.mxu1 %v7252_v25  ;;  %v4315_v55 = vld [vmem:[#allocation10 + $0x1f8] sm:$0xff] }
 0x204   : > { %v8671_v59 = vadd.f32 %v1881_v48, %v8445_v54  ;;  %v6550_v53 = vpop.f32.mrb[66].mxu0  ;;  %7254 = vmatprep.subr.bf16.mxu1 %v10010_v43  ;;  %v4338_v22 = vld [vmem:[#allocation10 + $0x2b0] sm:$0xff] }
 0x205   : > { %v1896_v5 = vadd.f32 %v6550_v53, %v8543_v52  ;;  %v1890_v40 = vpop.f32.mrb[67].mxu0  ;;  %v7255_v53 = vpack.c.bf16 %v4315_v55, %v4314_v49 }
 0x206   : > { %v1891_v8 = vadd.f32 %v1890_v40, %v8536_v24  ;;  %v8676_v37 = vpop.f32.mrb[82].mxu1  ;;  %v4339_v24 = vld [vmem:[#allocation10 + $0x2b8] sm:$0xff] }
 0x207   : > { %v8679_v63 = vadd.f32 %v1896_v5, %v8473_v50  ;;  %v1782_v51 = vpop.f32.mrb[83].mxu1  ;;  %v7293_v19 = vpack.c.bf16 %v4339_v24, %v4338_v22  ;;  %7256 = vmatpush1.bf16.msra.mxu1 %v7255_v53  ;;  %v4318_v22 = vld [vmem:[#allocation10 + $0x210] sm:$0xff] }
 0x208   : > { %v8682_v54 = vadd.f32 %v1891_v8, %v8464_v29  ;;  %v6553_v48 = vpop.f32.mrb[68].mxu0  ;;  %7257 = vmatprep.subr.bf16.mxu1 %v10010_v43  ;;  %v4317_v8 = vld [vmem:[#allocation10 + $0x208] sm:$0xff] }
 0x209   : > { %v1906_v52 = vadd.f32 %v6553_v48, %v8557_v21  ;;  %v1900_v58 = vpop.f32.mrb[69].mxu0  ;;  %7294 = vmatprep.subr.bf16.mxu0 %v7293_v19  ;;  %v4316_v21 = vld [vmem:[#allocation10 + $0x200] sm:$0xff] }
 0x20a   : > { %v1901_v14 = vadd.f32 %v1900_v58, %v8550_v42  ;;  %v8687_v50 = vpop.f32.mrb[84].mxu1  ;;  %7296 = vmatpush3.bf16.msra.mxu0 %v7293_v19  ;;  %v7258_v48 = vpack.c.bf16 %v4317_v8, %v4316_v21  ;;  %v4320_v21 = vld [vmem:[#allocation10 + $0x220] sm:$0xff]  ;;  %v4321_v8 = vld [vmem:[#allocation10 + $0x228] sm:$0xff] }
 0x20b   : > { %v8690_v5 = vadd.f32 %v1906_v52, %v8490_v6  ;;  %v1787_v29 = vpop.f32.mrb[85].mxu1 }
 0x20c   : > { %v8693_v40 = vadd.f32 %v1901_v14, %v8482_v3  ;;  %v6556_v25 = vpop.f32.mrb[70].mxu0  ;;  %7259 = vmatpush1.bf16.msra.mxu1 %v7258_v48 }
 0x20d   : > { %v1916_v51 = vadd.f32 %v6556_v25, %v8571_v27  ;;  %v1910_v42 = vpop.f32.mrb[71].mxu0  ;;  %7260 = vmatprep.subr.bf16.mxu1 %v10010_v43  ;;  %v4319_v27 = vld [vmem:[#allocation10 + $0x218] sm:$0xff] }
 0x20e   : > { %v1911_v49 = vadd.f32 %v1910_v42, %v8564_v13  ;;  %v8698_v6 = vpop.f32.mrb[86].mxu1  ;;  %v7261_v14 = vpack.c.bf16 %v4319_v27, %v4318_v22  ;;  %v7264_v42 = vpack.c.bf16 %v4321_v8, %v4320_v21  ;;  %v4323_v22 = vld [vmem:[#allocation10 + $0x238] sm:$0xff]  ;;  %v4325_v8 = vld [vmem:[#allocation10 + $0x248] sm:$0xff] }
 0x20f   : > { %v8701_v55 = vadd.f32 %v1916_v51, %v8509_v35  ;;  %v1792_v3 = vpop.f32.mrb[87].mxu1 }
 0x210   : > { %v8704_v52 = vadd.f32 %v1911_v49, %v8500_v34  ;;  %v6559_v58 = vpop.f32.mrb[72].mxu0  ;;  %7262 = vmatpush1.bf16.msra.mxu1 %v7261_v14 }
 0x211   : > { %v1926_v24 = vadd.f32 %v6559_v58, %v8585_v23  ;;  %v1920_v53 = vpop.f32.mrb[73].mxu0  ;;  %7263 = vmatprep.subr.bf16.mxu1 %v10010_v43  ;;  %v4322_v58 = vld [vmem:[#allocation10 + $0x230] sm:$0xff] }
 0x212   : > { %v1921_v13 = vadd.f32 %v1920_v53, %v8578_v36  ;;  %v8709_v19 = vpop.f32.mrb[88].mxu1  ;;  %v7267_v53 = vpack.c.bf16 %v4323_v22, %v4322_v58  ;;  %v4326_v58 = vld [vmem:[#allocation10 + $0x250] sm:$0xff] }
 0x213   : > { %v8712_v35 = vadd.f32 %v1926_v24, %v8525_v26  ;;  %v1797_v29 = vpop.f32.mrb[89].mxu1  ;;  %v4340_v24 = vld [vmem:[#allocation10 + $0x2c0] sm:$0xff] }
 0x214   : > { %v8715_v34 = vadd.f32 %v1921_v13, %v8518_v1  ;;  %v6562_v25 = vpop.f32.mrb[74].mxu0  ;;  %7265 = vmatpush1.bf16.msra.mxu1 %v7264_v42 }
 0x215   : > { %v1936_v23 = vadd.f32 %v6562_v25, %v8596_v39  ;;  %v1930_v51 = vpop.f32.mrb[75].mxu0  ;;  %7266 = vmatprep.subr.bf16.mxu1 %v10010_v43 }
 0x216   : > { %v1931_v36 = vadd.f32 %v1930_v51, %v8590_v10  ;;  %v8720_v48 = vpop.f32.mrb[90].mxu1  ;;  %v4341_v10 = vld [vmem:[#allocation10 + $0x2c8] sm:$0xff] }
 0x217   : > { %v8723_v26 = vadd.f32 %v1936_v23, %v8541_v33  ;;  %v1802_v49 = vpop.f32.mrb[91].mxu1  ;;  %v7297_v13 = vpack.c.bf16 %v4341_v10, %v4340_v24 }
 0x218   : > { %v8726_v1 = vadd.f32 %v1931_v36, %v8534_v45  ;;  %v6565_v3 = vpop.f32.mrb[76].mxu0  ;;  %7268 = vmatpush1.bf16.msra.mxu1 %v7267_v53 }
 0x219   : > { %v1946_v39 = vadd.f32 %v6565_v3, %v8606_v16  ;;  %v1940_v27 = vpop.f32.mrb[77].mxu0  ;;  %7298 = vmatprep.subr.bf16.mxu0 %v7297_v13  ;;  %7269 = vmatprep.subr.bf16.mxu1 %v10010_v43  ;;  %v4324_v16 = vld [vmem:[#allocation10 + $0x240] sm:$0xff] }
 0x21a   : > { %v1941_v14 = vadd.f32 %v1940_v27, %v8601_v28  ;;  %v8731_v33 = vpop.f32.mrb[92].mxu1  ;;  %7300 = vmatpush3.bf16.msra.mxu0 %v7297_v13  ;;  %v7270_v51 = vpack.c.bf16 %v4325_v8, %v4324_v16  ;;  %v4329_v13 = vld [vmem:[#allocation10 + $0x268] sm:$0xff] }
 0x21b   : > { %v8734_v29 = vadd.f32 %v1946_v39, %v8554_v18  ;;  %v1807_v45 = vpop.f32.mrb[93].mxu1 }
 0x21c   : > { %v8737_v25 = vadd.f32 %v1941_v14, %v8548_v4  ;;  %v6568_v21 = vpop.f32.mrb[78].mxu0  ;;  %7271 = vmatpush1.bf16.msra.mxu1 %v7270_v51  ;;  %v4328_v14 = vld [vmem:[#allocation10 + $0x260] sm:$0xff]  ;;  %v4331_v51 = vld [vmem:[#allocation10 + $0x278] sm:$0xff] }
 0x21d   : > { %v1956_v23 = vadd.f32 %v6568_v21, %v8616_v57  ;;  %v1950_v28 = vpop.f32.mrb[79].mxu0  ;;  %7272 = vmatprep.subr.bf16.mxu1 %v10010_v43  ;;  %v4327_v57 = vld [vmem:[#allocation10 + $0x258] sm:$0xff]  ;;  %v7276_v21 = vpack.c.bf16 %v4329_v13, %v4328_v14  ;;  %v4345_v14 = vld [vmem:[#allocation10 + $0x2e8] sm:$0xff] }
 0x21e   : > { %v1951_v42 = vadd.f32 %v1950_v28, %v8611_v20  ;;  %v8742_v18 = vpop.f32.mrb[94].mxu1  ;;  %v7273_v27 = vpack.c.bf16 %v4327_v57, %v4326_v58  ;;  %v4330_v28 = vld [vmem:[#allocation10 + $0x270] sm:$0xff] }
 0x21f   : > { %v8745_v36 = vadd.f32 %v1956_v23, %v8568_v2  ;;  %v1812_v4 = vpop.f32.mrb[95].mxu1 }
 0x220   : > { %v8748_v49 = vadd.f32 %v1951_v42, %v8561_v31  ;;  %v6571_v3 = vpop.f32.mrb[80].mxu0  ;;  %7274 = vmatpush1.bf16.msra.mxu1 %v7273_v27  ;;  %v4342_v4 = vld [vmem:[#allocation10 + $0x2d0] sm:$0xff] }
 0x221   : > { %v1966_v22 = vadd.f32 %v6571_v3, %v8626_v47  ;;  %v1960_v39 = vpop.f32.mrb[81].mxu0  ;;  %7275 = vmatprep.subr.bf16.mxu1 %v10010_v43  ;;  %v7279_v3 = vpack.c.bf16 %v4331_v51, %v4330_v28  ;;  %v10022_v51 = vld [vmem:[#allocation16_spill] sm:$0xff] }
 0x222   : > { %v1961_v20 = vadd.f32 %v1960_v39, %v8621_v7  ;;  %v8753_v24 = vpop.f32.mrb[96].mxu1 }
 0x223   : > { %v8756_v2 = vadd.f32 %v1966_v22, %v8582_v30  ;;  %v2541_v10 = vpop.f32.mrb[97].mxu1 }
 0x224   : > { %v8759_v31 = vadd.f32 %v1961_v20, %v8575_v32  ;;  %v6574_v53 = vpop.f32.mrb[82].mxu0  ;;  %7277 = vmatpush1.bf16.msra.mxu1 %v7276_v21 }
 0x225   : > { %v1976_v47 = vadd.f32 %v6574_v53, %v8636_v12  ;;  %v1970_v45 = vpop.f32.mrb[83].mxu0  ;;  %7278 = vmatprep.subr.bf16.mxu1 %v10010_v43  ;;  %v4344_v53 = vld [vmem:[#allocation10 + $0x2e0] sm:$0xff] }
 0x226   : > { %v1971_v7 = vadd.f32 %v1970_v45, %v8631_v11  ;;  %v8764_v16 = vpop.f32.mrb[98].mxu1  ;;  %v4343_v11 = vld [vmem:[#allocation10 + $0x2d8] sm:$0xff]  ;;  %v10020_v45 = vld [vmem:[#allocation15_spill] sm:$0xff] }
 0x227   : > { %v8767_v30 = vadd.f32 %v1976_v47, %v8594_v0  ;;  %v2546_v8 = vpop.f32.mrb[99].mxu1  ;;  %v7301_v57 = vpack.c.bf16 %v4343_v11, %v4342_v4  ;;  %v7305_v47 = vpack.c.bf16 %v4345_v14, %v4344_v53 }
 0x228   : > { %v8770_v32 = vadd.f32 %v1971_v7, %v8588_v62  ;;  %v6577_v23 = vpop.f32.mrb[84].mxu0  ;;  %7280 = vmatpush1.bf16.msra.mxu1 %v7279_v3 }
 0x229   : > { %v1986_v12 = vadd.f32 %v6577_v23, %v8648_v44  ;;  %v1980_v42 = vpop.f32.mrb[85].mxu0  ;;  %7302 = vmatprep.subr.bf16.mxu0 %v7301_v57 }
 0x22a   : > { %v1981_v58 = vadd.f32 %v1980_v42, %v8642_v46  ;;  %v8775_v0 = vpop.f32.mrb[100].mxu1  ;;  %7304 = vmatpush3.bf16.msra.mxu0 %v7301_v57 }
 0x22b   : > { %v8778_v22 = vadd.f32 %v1986_v12, %v8604_v9  ;;  %v2551_v62 = vpop.f32.mrb[101].mxu1  ;;  %7306 = vmatprep.subr.bf16.mxu0 %v7305_v47 }
 0x22c   : > { %v8781_v39 = vadd.f32 %v1981_v58, %v8599_v38  ;;  %v6580_v27 = vpop.f32.mrb[86].mxu0  ;;  %v10023_v58 = vld [vmem:[#allocation19_spill] sm:$0xff]  ;;  %v10024_v62 = vld [vmem:[#allocation18_spill] sm:$0xff] }
 0x22d   : > { %v1996_v44 = vadd.f32 %v6580_v27, %v8660_v61  ;;  %v1990_v20 = vpop.f32.mrb[87].mxu0 }
 0x22e   : > { %v1991_v10 = vadd.f32 %v1990_v20, %v8654_v15  ;;  %v2554_v46 = vpop.f32.mrb[102].mxu1  ;;  %7308 = vmatpush3.bf16.msra.mxu0 %v7305_v47  ;;  %v10021_v15 = vld [vmem:[#allocation17_spill] sm:$0xff]  ;;  %v10026_v47 = vld [vmem:[#allocation20_spill] sm:$0xff] }
 0x22f   : > { %v8786_v13 = vadd.f32 %v1996_v44, %v8614_v56  ;;  %v2556_v9 = vpop.f32.mrb[103].mxu1 }
 0x230   : > { %v8789_v21 = vadd.f32 %v1991_v10, %v10020_v45  ;;  %v6583_v38 = vpop.f32.mrb[88].mxu0 }
 0x231   : > { %v2006_v7 = vadd.f32 %v6583_v38, %v8676_v37  ;;  %v2000_v8 = vpop.f32.mrb[89].mxu0 }
 0x232   : > { %v2001_v61 = vadd.f32 %v2000_v8, %v8665_v17  ;;  %v8793_v23 = vpop.f32.mrb[104].mxu1 }
 0x233   : > { %v8796_v28 = vadd.f32 %v2006_v7, %v10021_v15  ;;  %v2561_v56 = vpop.f32.mrb[105].mxu1 }
 0x234   : > { %v8799_v12 = vadd.f32 %v2001_v61, %v10022_v51  ;;  %v6586_v42 = vpop.f32.mrb[90].mxu0  ;;  %v4347_v56 = vld [vmem:[#allocation10 + $0x2f8] sm:$0xff] }
 0x235   : > { %v2016_v4 = vadd.f32 %v6586_v42, %v8698_v6  ;;  %v2010_v11 = vpop.f32.mrb[91].mxu0  ;;  %v10025_v6 = vld [vmem:[#allocation21_spill] sm:$0xff] }
 0x236   : > { %v2011_v37 = vadd.f32 %v2010_v11, %v8687_v50  ;;  %v2564_v3 = vpop.f32.mrb[106].mxu1 }
 0x237   : > { %v8804_v57 = vadd.f32 %v2016_v4, %v10023_v58  ;;  %v2566_v17 = vpop.f32.mrb[107].mxu1  ;;  %v10027_v4 = vld [vmem:[#allocation22_spill] sm:$0xff] }
 0x238   : > { %v8807_v27 = vadd.f32 %v2011_v37, %v10024_v62  ;;  %v6589_v44 = vpop.f32.mrb[92].mxu0 }
 0x239   : > { %v2026_v20 = vadd.f32 %v6589_v44, %v8720_v48  ;;  %v2020_v10 = vpop.f32.mrb[93].mxu0  ;;  %v4346_v48 = vld [vmem:[#allocation10 + $0x2f0] sm:$0xff] }
 0x23a   : > { %v2021_v53 = vadd.f32 %v2020_v10, %v8709_v19  ;;  %v8811_v14 = vpop.f32.mrb[108].mxu1  ;;  %v7309_v42 = vpack.c.bf16 %v4347_v56, %v4346_v48 }
 0x23b   : > { %v8814_v9 = vadd.f32 %v2026_v20, %v10025_v6  ;;  %v2571_v50 = vpop.f32.mrb[109].mxu1 }
 0x23c   : > { %v8817_v45 = vadd.f32 %v2021_v53, %v10026_v47  ;;  %v6592_v38 = vpop.f32.mrb[94].mxu0  ;;  %7310 = vmatprep.subr.bf16.mxu0 %v7309_v42 }
 0x23d   : > { %v2036_v7 = vadd.f32 %v6592_v38, %v8742_v18  ;;  %v2030_v8 = vpop.f32.mrb[95].mxu0  ;;  %7312 = vmatpush3.bf16.msra.mxu0 %v7309_v42 }
 0x23e   : > { %v2031_v61 = vadd.f32 %v2030_v8, %v8731_v33  ;;  %v2574_v15 = vpop.f32.mrb[110].mxu1  ;;  %v8831_v33 = vld [vmem:[%s9955_s3] ss:$0 sm:$0xff]  ;;  %7313 = vmatprep.subr.bf16.mxu0 %v10010_v43 }
 0x23f   : > { %v8822_v19 = vadd.f32 %v2036_v7, %v8658_v41  ;;  %v2576_v51 = vpop.f32.mrb[111].mxu1 }
 0x240   : > { %v8825_v11 = vadd.f32 %v2031_v61, %v10027_v4  ;;  %v6627_v37 = vpop.f32.mrb[96].mxu0 }
 0x241   : > { %v2770_v58 = vadd.f32 %v6627_v37, %v8764_v16  ;;  %v2764_v17 = vpop.f32.mrb[97].mxu0  ;;  %v8841_v16 = vld [vmem:[%s9956_s4] ss:$0 sm:$0xff] }
 0x242   : > { %v2765_v18 = vadd.f32 %v2764_v17, %v8753_v24  ;;  %v8834_v62 = vpop.f32.mrb[112].mxu1 }
 0x243   : > { %v2956_v41 = vadd.f32 %v2770_v58, %v8668_v60  ;;  %v2581_v44 = vpop.f32.mrb[113].mxu1 }
 0x244   : > { %v2955_v20 = vadd.f32 %v2765_v18, %v8671_v59  ;;  %v6630_v10 = vpop.f32.mrb[98].mxu0  ;;  %v5215_v18 = vld [vmem:[#allocation10 + $0x400] sm:$0xff] }
 0x245   : > { %v3059_v53 = vmul.f32 %v8831_v33, %v2956_v41  ;;  %v2780_v6 = vadd.f32 %v6630_v10, %v2554_v46  ;;  %v2774_v24 = vpop.f32.mrb[99].mxu0  ;;  %v5216_v41 = vld [vmem:[#allocation10 + $0x408] sm:$0xff] }
 0x246   : > { %v3058_v50 = vmul.f32 %v8831_v33, %v2955_v20  ;;  %v2775_v47 = vadd.f32 %v2774_v24, %v8775_v0  ;;  %v2584_v60 = vpop.f32.mrb[114].mxu1  ;;  %v8865_v10 = vpack.c.bf16 %v5216_v41, %v5215_v18 }
 0x247   : > { %v8848_v38 = vadd.f32 %v8841_v16, %v3059_v53  ;;  %v2958_v7 = vadd.f32 %v2780_v6, %v8679_v63  ;;  %v2586_v8 = vpop.f32.mrb[115].mxu1 }
 0x248   : > { %v3097_v61 = vadd.f32 %v8841_v16, %v3058_v50  ;;  %v2957_v59 = vadd.f32 %v2775_v47, %v8682_v54  ;;  %v6633_v48 = vpop.f32.mrb[100].mxu0  ;;  %7362 = vmatprep.subr.bf16.mxu1 %v8865_v10 }
 0x249   : > { %v3130_v56 = vmax.f32 %v8848_v38, 0.0  ;;  %v3061_v46 = vmul.f32 %v8831_v33, %v2958_v7  ;;  %v2790_v51 = vadd.f32 %v6633_v48, %v2564_v3  ;;  %v2784_v42 = vpop.f32.mrb[101].mxu0 }
 0x24a   : > { %v3129_v4 = vmax.f32 %v3097_v61, 0.0  ;;  %v3060_v0 = vmul.f32 %v8831_v33, %v2957_v59  ;;  %v2785_v37 = vadd.f32 %v2784_v42, %v8793_v23  ;;  %v2589_v58 = vpop.f32.mrb[116].mxu1 }
 0x24b   : > { %3162 = vst [vmem:[#allocation2 + $0x21] sm:$0xff] %v3130_v56  ;;  %v8858_v63 = vadd.f32 %v8841_v16, %v3061_v46  ;;  %v2960_v17 = vadd.f32 %v2790_v51, %v8690_v5  ;;  %v2591_v54 = vpop.f32.mrb[117].mxu1 }
 0x24c   : > { %3161 = vst [vmem:[#allocation2 + $0x19] sm:$0xff] %v3129_v4  ;;  %v8862_v44 = vadd.f32 %v8841_v16, %v3060_v0  ;;  %v2959_v3 = vadd.f32 %v2785_v37, %v8693_v40  ;;  %v6636_v20 = vpop.f32.mrb[102].mxu0  ;;  %3603 = vmatprep.mubr.f32.mxu0 %v3129_v4 }
 0x24d   : > { %v3132_v23 = vmax.f32 %v8858_v63, 0.0  ;;  %v3063_v53 = vmul.f32 %v8831_v33, %v2960_v17  ;;  %v2800_v6 = vadd.f32 %v6636_v20, %v2574_v15  ;;  %v2794_v24 = vpop.f32.mrb[103].mxu0 }
 0x24e   : > { %v3131_v5 = vmax.f32 %v8862_v44, 0.0  ;;  %v3062_v50 = vmul.f32 %v8831_v33, %v2959_v3  ;;  %v2795_v47 = vadd.f32 %v2794_v24, %v8811_v14  ;;  %v2594_v38 = vpop.f32.mrb[118].mxu1 }
 0x24f   : > { %3164 = vst [vmem:[#allocation2 + $0x39] sm:$0xff] %v3132_v23  ;;  %v8876_v40 = vadd.f32 %v8841_v16, %v3063_v53  ;;  %v2962_v7 = vadd.f32 %v2800_v6, %v8701_v55  ;;  %v2596_v8 = vpop.f32.mrb[119].mxu1 }
 0x250   : > { %3163 = vst [vmem:[#allocation2 + $0x31] sm:$0xff] %v3131_v5  ;;  %v8880_v15 = vadd.f32 %v8841_v16, %v3062_v50  ;;  %v2961_v61 = vadd.f32 %v2795_v47, %v8704_v52  ;;  %v6639_v59 = vpop.f32.mrb[104].mxu0 }
 0x251   : > { %v3134_v14 = vmax.f32 %v8876_v40, 0.0  ;;  %v3065_v48 = vmul.f32 %v8831_v33, %v2962_v7  ;;  %v2810_v46 = vadd.f32 %v6639_v59, %v2584_v60  ;;  %v2804_v51 = vpop.f32.mrb[105].mxu0 }
 0x252   : > { %v3133_v42 = vmax.f32 %v8880_v15, 0.0  ;;  %v3064_v4 = vmul.f32 %v8831_v33, %v2961_v61  ;;  %v2805_v55 = vadd.f32 %v2804_v51, %v8834_v62  ;;  %v2599_v0 = vpop.f32.mrb[120].mxu1  ;;  %v8903_v44 = vld [vmem:[#allocation2 + $0x22] sm:$0xff] }
 0x253   : > { %3166 = vst [vmem:[#allocation2 + $0x51] sm:$0xff] %v3134_v14  ;;  %v8891_v37 = vadd.f32 %v8841_v16, %v3065_v48  ;;  %v2964_v52 = vadd.f32 %v2810_v46, %v8712_v35  ;;  %v3323_v17 = vld [vmem:[#allocation2 + $0x1a] sm:$0xff]  ;;  %v2601_v60 = vpop.f32.mrb[121].mxu1 }
 0x254   : > { %v8894_v54 = vld [vmem:[#allocation2 + $0x18] sm:$0xff]  ;;  %3165 = vst [vmem:[#allocation2 + $0x49] sm:$0xff] %v3133_v42  ;;  %v8899_v18 = vadd.f32 %v8841_v16, %v3064_v4  ;;  %v2963_v62 = vadd.f32 %v2805_v55, %v8715_v34  ;;  %v6642_v41 = vpop.f32.mrb[106].mxu0  ;;  %6708 = vmatprep.mubr.f32.mxu1 %v3323_v17 }
 0x255   : > { %3604 = vmatmul.mubr.f32.gmra.mrb[132].mxu0 %v8894_v54  ;;  %v3136_v35 = vmax.f32 %v8891_v37, 0.0  ;;  %v3067_v3 = vmul.f32 %v8831_v33, %v2964_v52  ;;  %v2820_v20 = vadd.f32 %v6642_v41, %v2594_v38  ;;  %v2814_v53 = vpop.f32.mrb[107].mxu0  ;;  %6709 = vmatmul.mubr.f32.gmra.mrb[162].mxu1 %v8903_v44  ;;  %v8918_v38 = vld [vmem:[#allocation2 + $0x20] sm:$0xff] }
 0x256   : > { %3608 = vmatprep.mubr.f32.mxu0 %v3130_v56  ;;  %v3135_v6 = vmax.f32 %v8899_v18, 0.0  ;;  %v3066_v24 = vmul.f32 %v8831_v33, %v2963_v62  ;;  %v2815_v34 = vadd.f32 %v2814_v53, %v2589_v58  ;;  %v2604_v50 = vpop.f32.mrb[122].mxu1  ;;  %v8928_v48 = vld [vmem:[#allocation2 + $0x3a] sm:$0xff] }
 0x257   : > { %3168 = vst [vmem:[#allocation2 + $0x69] sm:$0xff] %v3136_v35  ;;  %v8913_v47 = vadd.f32 %v8841_v16, %v3067_v3  ;;  %v2966_v7 = vadd.f32 %v2820_v20, %v8723_v26  ;;  %v8916_v8 = vld [vmem:[#allocation2 + $0x32] sm:$0xff]  ;;  %v2606_v61 = vpop.f32.mrb[123].mxu1 }
 0x258   : > { %3167 = vst [vmem:[#allocation2 + $0x61] sm:$0xff] %v3135_v6  ;;  %v8923_v56 = vadd.f32 %v8841_v16, %v3066_v24  ;;  %v2965_v58 = vadd.f32 %v2815_v34, %v8726_v1  ;;  %v6645_v59 = vpop.f32.mrb[108].mxu0  ;;  %6711 = vmatprep.mubr.f32.mxu1 %v8916_v8  ;;  %v8943_v20 = vld [vmem:[#allocation2 + $0x30] sm:$0xff] }
 0x259   : > { %3609 = vmatmul.mubr.f32.gmra.mrb[134].mxu0 %v8918_v38  ;;  %v9972_v26 = vmax.f32 %v8913_v47, 0.0  ;;  %v3069_v46 = vmul.f32 %v8831_v33, %v2966_v7  ;;  %v2830_v51 = vadd.f32 %v6645_v59, %v2604_v50  ;;  %v2824_v4 = vpop.f32.mrb[109].mxu0  ;;  %6712 = vmatmul.mubr.f32.gmra.mrb[164].mxu1 %v8928_v48 }
 0x25a   : > { %3613 = vmatprep.mubr.f32.mxu0 %v3131_v5  ;;  %v9974_v55 = vmax.f32 %v8923_v56, 0.0  ;;  %v3068_v1 = vmul.f32 %v8831_v33, %v2965_v58  ;;  %v2825_v52 = vadd.f32 %v2824_v4, %v2599_v0  ;;  %v2609_v17 = vpop.f32.mrb[124].mxu1  ;;  %v8953_v24 = vld [vmem:[#allocation2 + $0x52] sm:$0xff] }
 0x25b   : > { %3170 = vst [vmem:[#allocation2 + $0x81] sm:$0xff] %v9972_v26  ;;  %v8938_v60 = vadd.f32 %v8841_v16, %v3069_v46  ;;  %v2968_v62 = vadd.f32 %v2830_v51, %v8734_v29  ;;  %v2611_v41 = vpop.f32.mrb[125].mxu1  ;;  %v8941_v3 = vld [vmem:[#allocation2 + $0x4a] sm:$0xff] }
 0x25c   : > { %3169 = vst [vmem:[#allocation2 + $0x79] sm:$0xff] %v9974_v55  ;;  %v8948_v5 = vadd.f32 %v8841_v16, %v3068_v1  ;;  %v2967_v0 = vadd.f32 %v2825_v52, %v8737_v25  ;;  %v6648_v53 = vpop.f32.mrb[110].mxu0  ;;  %6714 = vmatprep.mubr.f32.mxu1 %v8941_v3  ;;  %v8969_v1 = vld [vmem:[#allocation2 + $0x38] sm:$0xff] }
 0x25d   : > { %3614 = vmatmul.mubr.f32.gmra.mrb[136].mxu0 %v8943_v20  ;;  %v9969_v29 = vmax.f32 %v8938_v60, 0.0  ;;  %v3071_v34 = vmul.f32 %v8831_v33, %v2968_v62  ;;  %v2834_v50 = vpop.f32.mrb[111].mxu0  ;;  %6715 = vmatmul.mubr.f32.gmra.mrb[166].mxu1 %v8953_v24 }
 0x25e   : > { %3618 = vmatprep.mubr.f32.mxu0 %v3132_v23  ;;  %v9971_v7 = vmax.f32 %v8948_v5, 0.0  ;;  %v3070_v25 = vmul.f32 %v8831_v33, %v2967_v0  ;;  %v2614_v61 = vpop.f32.mrb[126].mxu1  ;;  %v2835_v58 = vadd.f32 %v2834_v50, %v2609_v17  ;;  %v8979_v17 = vld [vmem:[#allocation2 + $0x6a] sm:$0xff] }
 0x25f   : > { %3172 = vst [vmem:[#allocation2 + $0x99] sm:$0xff] %v9969_v29  ;;  %v8965_v59 = vadd.f32 %v8841_v16, %v3071_v34  ;;  %v2840_v46 = vadd.f32 %v6648_v53, %v2614_v61  ;;  %v2616_v51 = vpop.f32.mrb[127].mxu1  ;;  %v8967_v4 = vld [vmem:[#allocation2 + $0x62] sm:$0xff] }
 0x260   : > { %3171 = vst [vmem:[#allocation2 + $0x91] sm:$0xff] %v9971_v7  ;;  %v8974_v63 = vadd.f32 %v8841_v16, %v3070_v25  ;;  %v2969_v23 = vadd.f32 %v2835_v58, %v8748_v49  ;;  %v6651_v52 = vpop.f32.mrb[112].mxu0  ;;  %6717 = vmatprep.mubr.f32.mxu1 %v8967_v4 }
 0x261   : > { %3619 = vmatmul.mubr.f32.gmra.mrb[138].mxu0 %v8969_v1  ;;  %v9967_v62 = vmax.f32 %v8965_v59, 0.0  ;;  %v2970_v41 = vadd.f32 %v2840_v46, %v8745_v36  ;;  %v2844_v0 = vpop.f32.mrb[113].mxu0  ;;  %6718 = vmatmul.mubr.f32.gmra.mrb[168].mxu1 %v8979_v17  ;;  %v8993_v36 = vld [vmem:[#allocation2 + $0x48] sm:$0xff] }
 0x262   : > { %3623 = vmatprep.mubr.f32.mxu0 %v3133_v42  ;;  %v9968_v53 = vmax.f32 %v8974_v63, 0.0  ;;  %v3072_v49 = vmul.f32 %v8831_v33, %v2969_v23  ;;  %v2619_v34 = vpop.f32.mrb[128].mxu1  ;;  %v9002_v42 = vld [vmem:[#allocation2 + $0x82] sm:$0xff] }
 0x263   : > { %3174 = vst [vmem:[#allocation2 + $0xb1] sm:$0xff] %v9967_v62  ;;  %v3073_v50 = vmul.f32 %v8831_v33, %v2970_v41  ;;  %v2845_v25 = vadd.f32 %v2844_v0, %v2619_v34  ;;  %v2621_v61 = vpop.f32.mrb[129].mxu1  ;;  %v8991_v58 = vld [vmem:[#allocation2 + $0x7a] sm:$0xff]  ;;  %10028 = vst [vmem:[#allocation15_spill] sm:$0xff] %v9002_v42 }
 0x264   : > { %3173 = vst [vmem:[#allocation2 + $0xa9] sm:$0xff] %v9968_v53  ;;  %v8998_v15 = vadd.f32 %v8841_v16, %v3072_v49  ;;  %6720 = vmatprep.mubr.f32.mxu1 %v8991_v58  ;;  %v6654_v46 = vpop.f32.mrb[114].mxu0 }
 0x265   : > { %3624 = vmatmul.mubr.f32.gmra.mrb[140].mxu0 %v8993_v36  ;;  %v9005_v51 = vadd.f32 %v8841_v16, %v3073_v50  ;;  %v2971_v23 = vadd.f32 %v2845_v25, %v8759_v31  ;;  %6721 = vmatmul.mubr.f32.gmra.mrb[170].mxu1 %v9002_v42  ;;  %v2854_v41 = vpop.f32.mrb[115].mxu0  ;;  %v9016_v50 = vld [vmem:[#allocation2 + $0x50] sm:$0xff] }
 0x266   : > { %3628 = vmatprep.mubr.f32.mxu0 %v3134_v14  ;;  %v9970_v0 = vmax.f32 %v8998_v15, 0.0  ;;  %v2624_v49 = vpop.f32.mrb[130].mxu1  ;;  %v9022_v31 = vld [vmem:[#allocation2 + $0x9a] sm:$0xff] }
 0x267   : > { %v9973_v34 = vmax.f32 %v9005_v51, 0.0  ;;  %v3074_v61 = vmul.f32 %v8831_v33, %v2971_v23  ;;  %v2850_v62 = vadd.f32 %v6651_v52, %v2624_v49  ;;  %v2626_v53 = vpop.f32.mrb[131].mxu1  ;;  %v9014_v29 = vld [vmem:[#allocation2 + $0x92] sm:$0xff]  ;;  %10030 = vst [vmem:[#allocation16_spill] sm:$0xff] %v9022_v31 }
 0x268   : > { %10029 = vst [vmem:[#allocation17_spill] sm:$0xff] %v9014_v29  ;;  %3175 = vst [vmem:[#allocation2 + $0xc1] sm:$0xff] %v9970_v0  ;;  %6723 = vmatprep.mubr.f32.mxu1 %v9014_v29  ;;  %v6657_v40 = vpop.f32.mrb[116].mxu0  ;;  %v9137_v42 = vld [vmem:[#allocation2 + $0x98] sm:$0xff] }
 0x269   : > { %3629 = vmatmul.mubr.f32.gmra.mrb[142].mxu0 %v9016_v50  ;;  %3176 = vst [vmem:[#allocation2 + $0xc9] sm:$0xff] %v9973_v34  ;;  %v9027_v14 = vadd.f32 %v8841_v16, %v3074_v61  ;;  %v2972_v52 = vadd.f32 %v2850_v62, %v8756_v2  ;;  %6724 = vmatmul.mubr.f32.gmra.mrb[172].mxu1 %v9022_v31  ;;  %v2864_v53 = vpop.f32.mrb[117].mxu0  ;;  %v9037_v34 = vld [vmem:[#allocation2 + $0x60] sm:$0xff] }
 0x26a   : > { %3633 = vmatprep.mubr.f32.mxu0 %v3135_v6  ;;  %v2629_v25 = vpop.f32.mrb[132].mxu1  ;;  %v9041_v2 = vld [vmem:[#allocation2 + $0xb2] sm:$0xff]  ;;  %v9096_v31 = vld [vmem:[#allocation2 + $0x80] sm:$0xff] }
 0x26b   : > { %v9976_v23 = vmax.f32 %v9027_v14, 0.0  ;;  %v3075_v49 = vmul.f32 %v8831_v33, %v2972_v52  ;;  %v2855_v0 = vadd.f32 %v2854_v41, %v2629_v25  ;;  %v2631_v7 = vpop.f32.mrb[133].mxu1  ;;  %v9035_v26 = vld [vmem:[#allocation2 + $0xaa] sm:$0xff]  ;;  %10032 = vst [vmem:[#allocation18_spill] sm:$0xff] %v9041_v2 }
 0x26c   : > { %10031 = vst [vmem:[#allocation19_spill] sm:$0xff] %v9035_v26  ;;  %6726 = vmatprep.mubr.f32.mxu1 %v9035_v26  ;;  %v9043_v18 = vpop.f32.mrb[118].mxu0  ;;  %v9056_v26 = vld [vmem:[#allocation2 + $0x68] sm:$0xff] }
 0x26d   : > { %3634 = vmatmul.mubr.f32.gmra.mrb[144].mxu0 %v9037_v34  ;;  %3177 = vst [vmem:[#allocation2 + $0xd9] sm:$0xff] %v9976_v23  ;;  %v9048_v6 = vadd.f32 %v8841_v16, %v3075_v49  ;;  %v2973_v7 = vadd.f32 %v2855_v0, %v8770_v32  ;;  %6727 = vmatmul.mubr.f32.gmra.mrb[174].mxu1 %v9041_v2  ;;  %v2874_v62 = vpop.f32.mrb[119].mxu0 }
 0x26e   : > { %3638 = vmatprep.mubr.f32.mxu0 %v3136_v35  ;;  %v2634_v41 = vpop.f32.mrb[134].mxu1 }
 0x26f   : > { %v9977_v61 = vmax.f32 %v9048_v6, 0.0  ;;  %v3076_v52 = vmul.f32 %v8831_v33, %v2973_v7  ;;  %v2860_v25 = vadd.f32 %v6654_v46, %v2634_v41  ;;  %v2636_v55 = vpop.f32.mrb[135].mxu1 }
 0x270   : > { %v9058_v23 = vld [vmem:[#allocation2 + $0xc2] sm:$0xff]  ;;  %v9061_v32 = vld [vmem:[#allocation2 + $0xca] sm:$0xff]  ;;  %v9063_v0 = vpop.f32.mrb[120].mxu0  ;;  %v10035_v55 = vmax.f32 %v8923_v56, 0.0 }
 0x271   : > { %10033 = vst [vmem:[#allocation21_spill] sm:$0xff] %v9058_v23  ;;  %3639 = vmatmul.mubr.f32.gmra.mrb[146].mxu0 %v9056_v26  ;;  %10034 = vst [vmem:[#allocation20_spill] sm:$0xff] %v9061_v32  ;;  %v9068_v37 = vadd.f32 %v8841_v16, %v3076_v52  ;;  %v2974_v35 = vadd.f32 %v2860_v25, %v8767_v30  ;;  %6729 = vmatprep.mubr.f32.mxu1 %v9058_v23  ;;  %v9074_v46 = vpop.f32.mrb[121].mxu0  ;;  %v9079_v52 = vld [vmem:[#allocation2 + $0x78] sm:$0xff] }
 0x272   : > { %3178 = vst [vmem:[#allocation2 + $0xe1] sm:$0xff] %v9977_v61  ;;  %3643 = vmatprep.mubr.f32.mxu0 %v10035_v55  ;;  %v2639_v49 = vpop.f32.mrb[136].mxu1  ;;  %6730 = vmatmul.mubr.f32.gmra.mrb[176].mxu1 %v9061_v32  ;;  %v10036_v55 = vmax.f32 %v8913_v47, 0.0 }
 0x273   : > { %v9982_v7 = vmax.f32 %v9068_v37, 0.0  ;;  %v3077_v41 = vmul.f32 %v8831_v33, %v2974_v35  ;;  %v2865_v61 = vadd.f32 %v2864_v53, %v2639_v49  ;;  %v2641_v2 = vpop.f32.mrb[137].mxu1 }
 0x274   : > { %v9082_v30 = vpop.f32.mrb[122].mxu0 }
 0x275   : > { %3644 = vmatmul.mubr.f32.gmra.mrb[148].mxu0 %v9079_v52  ;;  %3179 = vst [vmem:[#allocation2 + $0xf1] sm:$0xff] %v9982_v7  ;;  %v9087_v56 = vadd.f32 %v8841_v16, %v3077_v41  ;;  %v2975_v25 = vadd.f32 %v2865_v61, %v8781_v39  ;;  %v9092_v35 = vpop.f32.mrb[123].mxu0 }
 0x276   : > { %3648 = vmatprep.mubr.f32.mxu0 %v10036_v55  ;;  %v2644_v53 = vpop.f32.mrb[138].mxu1 }
 0x277   : > { %v9983_v2 = vmax.f32 %v9087_v56, 0.0  ;;  %v3078_v49 = vmul.f32 %v8831_v33, %v2975_v25  ;;  %v2870_v32 = vadd.f32 %v6657_v40, %v2644_v53  ;;  %v2646_v23 = vpop.f32.mrb[139].mxu1  ;;  %v10039_v40 = vmax.f32 %v8948_v5, 0.0 }
 0x278   : > { %v9103_v39 = vpop.f32.mrb[124].mxu0 }
 0x279   : > { %v9098_v7 = vld [vmem:[#allocation2 + $0xda] sm:$0xff]  ;;  %3649 = vmatmul.mubr.f32.gmra.mrb[150].mxu0 %v9096_v31  ;;  %v9101_v41 = vld [vmem:[#allocation2 + $0xe2] sm:$0xff]  ;;  %3180 = vst [vmem:[#allocation2 + $0xf9] sm:$0xff] %v9983_v2  ;;  %v9108_v47 = vadd.f32 %v8841_v16, %v3078_v49  ;;  %v2976_v61 = vadd.f32 %v2870_v32, %v8778_v22  ;;  %v9114_v23 = vpop.f32.mrb[125].mxu0  ;;  %v9119_v49 = vld [vmem:[#allocation2 + $0x90] sm:$0xff] }
 0x27a   : > { %10037 = vst [vmem:[#allocation22_spill] sm:$0xff] %v9098_v7  ;;  %10038 = vst [vmem:[#allocation23_spill] sm:$0xff] %v9101_v41  ;;  %6732 = vmatprep.mubr.f32.mxu1 %v9098_v7  ;;  %3653 = vmatprep.mubr.f32.mxu0 %v10039_v40  ;;  %v2649_v25 = vpop.f32.mrb[140].mxu1  ;;  %v10040_v40 = vmax.f32 %v8938_v60, 0.0 }
 0x27b   : > { %6733 = vmatmul.mubr.f32.gmra.mrb[178].mxu1 %v9101_v41  ;;  %v9988_v55 = vmax.f32 %v9108_v47, 0.0  ;;  %v3079_v53 = vmul.f32 %v8831_v33, %v2976_v61  ;;  %v2875_v2 = vadd.f32 %v2874_v62, %v2649_v25  ;;  %v2651_v29 = vpop.f32.mrb[141].mxu1 }
 0x27c   : > { %v9122_v22 = vpop.f32.mrb[126].mxu0 }
 0x27d   : > { %3654 = vmatmul.mubr.f32.gmra.mrb[152].mxu0 %v9119_v49  ;;  %3181 = vst [vmem:[#allocation2 + $0x109] sm:$0xff] %v9988_v55  ;;  %v9127_v5 = vadd.f32 %v8841_v16, %v3079_v53  ;;  %v2977_v32 = vadd.f32 %v2875_v2, %v8789_v21  ;;  %v9132_v61 = vpop.f32.mrb[127].mxu0 }
 0x27e   : > { %3658 = vmatprep.mubr.f32.mxu0 %v10040_v40  ;;  %v2654_v29 = vpop.f32.mrb[142].mxu1 }
 0x27f   : > { %v9989_v62 = vmax.f32 %v9127_v5, 0.0  ;;  %v3080_v25 = vmul.f32 %v8831_v33, %v2977_v32  ;;  %v2880_v41 = vadd.f32 %v9043_v18, %v2654_v29  ;;  %v2656_v7 = vpop.f32.mrb[143].mxu1  ;;  %v10041_v18 = vmax.f32 %v8974_v63, 0.0 }
 0x280   : > { %v9139_v55 = vld [vmem:[#allocation2 + $0xf2] sm:$0xff]  ;;  %v9142_v21 = vld [vmem:[#allocation2 + $0xfa] sm:$0xff] }
 0x281   : > { %3659 = vmatmul.mubr.f32.gmra.mrb[154].mxu0 %v9137_v42  ;;  %3182 = vst [vmem:[#allocation2 + $0x111] sm:$0xff] %v9989_v62  ;;  %v3119_v60 = vadd.f32 %v8841_v16, %v3080_v25  ;;  %v2978_v2 = vadd.f32 %v2880_v41, %v8786_v13  ;;  %6735 = vmatprep.mubr.f32.mxu1 %v9139_v55  ;;  %v9156_v62 = vld [vmem:[#allocation2 + $0xa8] sm:$0xff]  ;;  %v10042_v41 = vmax.f32 %v8965_v59, 0.0 }
 0x282   : > { %3663 = vmatprep.mubr.f32.mxu0 %v10041_v18  ;;  %v2659_v7 = vpop.f32.mrb[144].mxu1  ;;  %6736 = vmatmul.mubr.f32.gmra.mrb[180].mxu1 %v9142_v21 }
 0x283   : > { %v9152_v53 = vmax.f32 %v3119_v60, 0.0  ;;  %v3081_v32 = vmul.f32 %v8831_v33, %v2978_v2  ;;  %v2885_v40 = vadd.f32 %v9074_v46, %v2659_v7  ;;  %v2661_v29 = vpop.f32.mrb[145].mxu1  ;;  %v9168_v7 = vld [vmem:[#allocation2 + $0xb0] sm:$0xff] }
 0x285   : > { %3664 = vmatmul.mubr.f32.gmra.mrb[156].mxu0 %v9156_v62  ;;  %3183 = vst [vmem:[#allocation2 + $0x121] sm:$0xff] %v9152_v53  ;;  %v3120_v13 = vadd.f32 %v8841_v16, %v3081_v32  ;;  %v2979_v63 = vadd.f32 %v2885_v40, %v8799_v12  ;;  %v10043_v40 = vmax.f32 %v8998_v15, 0.0 }
 0x286   : > { %3668 = vmatprep.mubr.f32.mxu0 %v10042_v41  ;;  %v2664_v25 = vpop.f32.mrb[146].mxu1 }
 0x287   : > { %v9164_v60 = vmax.f32 %v3120_v13, 0.0  ;;  %v3082_v2 = vmul.f32 %v8831_v33, %v2979_v63  ;;  %v2890_v46 = vadd.f32 %v9063_v0, %v2664_v25  ;;  %v2666_v18 = vpop.f32.mrb[147].mxu1 }
 0x288   : > { %v9170_v29 = vld [vmem:[#allocation2 + $0x10a] sm:$0xff]  ;;  %v9173_v32 = vld [vmem:[#allocation2 + $0x112] sm:$0xff]  ;;  %v9186_v18 = vld [vmem:[#allocation2 + $0xc0] sm:$0xff] }
 0x289   : > { %3669 = vmatmul.mubr.f32.gmra.mrb[158].mxu0 %v9168_v7  ;;  %3184 = vst [vmem:[#allocation2 + $0x129] sm:$0xff] %v9164_v60  ;;  %v3121_v12 = vadd.f32 %v8841_v16, %v3082_v2  ;;  %v2980_v59 = vadd.f32 %v2890_v46, %v8796_v28  ;;  %6738 = vmatprep.mubr.f32.mxu1 %v9170_v29  ;;  %v10044_v2 = vmax.f32 %v9005_v51, 0.0 }
 0x28a   : > { %3673 = vmatprep.mubr.f32.mxu0 %v10043_v40  ;;  %v2669_v0 = vpop.f32.mrb[148].mxu1  ;;  %6739 = vmatmul.mubr.f32.gmra.mrb[182].mxu1 %v9173_v32 }
 0x28b   : > { %v9182_v13 = vmax.f32 %v3121_v12, 0.0  ;;  %v3083_v63 = vmul.f32 %v8831_v33, %v2980_v59  ;;  %v2895_v41 = vadd.f32 %v9092_v35, %v2669_v0  ;;  %v2671_v25 = vpop.f32.mrb[149].mxu1  ;;  %v9198_v0 = vld [vmem:[#allocation2 + $0xc8] sm:$0xff] }
 0x28d   : > { %3674 = vmatmul.mubr.f32.gmra.mrb[160].mxu0 %v9186_v18  ;;  %3185 = vst [vmem:[#allocation2 + $0x139] sm:$0xff] %v9182_v13  ;;  %v3122_v28 = vadd.f32 %v8841_v16, %v3083_v63  ;;  %v2981_v15 = vadd.f32 %v2895_v41, %v8807_v27  ;;  %v10045_v41 = vmax.f32 %v9027_v14, 0.0 }
 0x28e   : > { %3678 = vmatprep.mubr.f32.mxu0 %v10044_v2  ;;  %v2674_v46 = vpop.f32.mrb[150].mxu1 }
 0x28f   : > { %v9194_v12 = vmax.f32 %v3122_v28, 0.0  ;;  %v3084_v59 = vmul.f32 %v8831_v33, %v2981_v15  ;;  %v2900_v35 = vadd.f32 %v9082_v30, %v2674_v46  ;;  %v2676_v40 = vpop.f32.mrb[151].mxu1 }
 0x290   : > { %v9200_v25 = vld [vmem:[#allocation2 + $0x122] sm:$0xff]  ;;  %v9203_v63 = vld [vmem:[#allocation2 + $0x12a] sm:$0xff]  ;;  %v9216_v40 = vld [vmem:[#allocation2 + $0xd8] sm:$0xff] }
 0x291   : > { %3679 = vmatmul.mubr.f32.gmra.mrb[162].mxu0 %v9198_v0  ;;  %3186 = vst [vmem:[#allocation2 + $0x141] sm:$0xff] %v9194_v12  ;;  %v3123_v27 = vadd.f32 %v8841_v16, %v3084_v59  ;;  %v2982_v51 = vadd.f32 %v2900_v35, %v8804_v57  ;;  %6741 = vmatprep.mubr.f32.mxu1 %v9200_v25  ;;  %v10046_v59 = vmax.f32 %v9048_v6, 0.0 }
 0x292   : > { %3683 = vmatprep.mubr.f32.mxu0 %v10045_v41  ;;  %v2679_v30 = vpop.f32.mrb[152].mxu1  ;;  %6742 = vmatmul.mubr.f32.gmra.mrb[184].mxu1 %v9203_v63 }
 0x293   : > { %v9212_v28 = vmax.f32 %v3123_v27, 0.0  ;;  %v3085_v15 = vmul.f32 %v8831_v33, %v2982_v51  ;;  %v2905_v2 = vadd.f32 %v9114_v23, %v2679_v30  ;;  %v2681_v46 = vpop.f32.mrb[153].mxu1  ;;  %v9228_v30 = vld [vmem:[#allocation2 + $0xe0] sm:$0xff] }
 0x295   : > { %3684 = vmatmul.mubr.f32.gmra.mrb[164].mxu0 %v9216_v40  ;;  %3187 = vst [vmem:[#allocation2 + $0x151] sm:$0xff] %v9212_v28  ;;  %v3124_v57 = vadd.f32 %v8841_v16, %v3085_v15  ;;  %v2983_v14 = vadd.f32 %v2905_v2, %v8817_v45  ;;  %v10048_v2 = vmax.f32 %v9068_v37, 0.0 }
 0x296   : > { %3688 = vmatprep.mubr.f32.mxu0 %v10046_v59  ;;  %v2684_v35 = vpop.f32.mrb[154].mxu1 }
 0x297   : > { %v9224_v27 = vmax.f32 %v3124_v57, 0.0  ;;  %v3086_v51 = vmul.f32 %v8831_v33, %v2983_v14  ;;  %v2910_v23 = vadd.f32 %v9103_v39, %v2684_v35  ;;  %v2686_v41 = vpop.f32.mrb[155].mxu1 }
 0x298   : > { %v9230_v46 = vld [vmem:[#allocation2 + $0x13a] sm:$0xff]  ;;  %v9233_v15 = vld [vmem:[#allocation2 + $0x142] sm:$0xff]  ;;  %v9246_v41 = vld [vmem:[#allocation2 + $0xf0] sm:$0xff] }
 0x299   : > { %3689 = vmatmul.mubr.f32.gmra.mrb[166].mxu0 %v9228_v30  ;;  %10047 = vst [vmem:[#allocation24_spill] sm:$0xff] %v9233_v15  ;;  %3188 = vst [vmem:[#allocation2 + $0x159] sm:$0xff] %v9224_v27  ;;  %v3125_v45 = vadd.f32 %v8841_v16, %v3086_v51  ;;  %v2984_v6 = vadd.f32 %v2910_v23, %v8814_v9  ;;  %6744 = vmatprep.mubr.f32.mxu1 %v9230_v46  ;;  %v10049_v51 = vmax.f32 %v9087_v56, 0.0 }
 0x29a   : > { %3693 = vmatprep.mubr.f32.mxu0 %v10048_v2  ;;  %v2689_v39 = vpop.f32.mrb[156].mxu1  ;;  %6745 = vmatmul.mubr.f32.gmra.mrb[186].mxu1 %v9233_v15  ;;  %v9258_v2 = vld [vmem:[#allocation2 + $0xf8] sm:$0xff] }
 0x29b   : > { %v9242_v57 = vmax.f32 %v3125_v45, 0.0  ;;  %v3087_v14 = vmul.f32 %v8831_v33, %v2984_v6  ;;  %v2915_v59 = vadd.f32 %v9132_v61, %v2689_v39  ;;  %v2691_v35 = vpop.f32.mrb[157].mxu1 }
 0x29c   : > { %v3595_v35 = vpop.f32.mrb[128].mxu0 }
 0x29d   : > { %3694 = vmatmul.mubr.f32.gmra.mrb[168].mxu0 %v9246_v41  ;;  %3189 = vst [vmem:[#allocation2 + $0x169] sm:$0xff] %v9242_v57  ;;  %v3126_v9 = vadd.f32 %v8841_v16, %v3087_v14  ;;  %v2985_v37 = vadd.f32 %v2915_v59, %v8825_v11  ;;  %v3597_v11 = vpop.f32.mrb[129].mxu0 }
 0x29e   : > { %3698 = vmatprep.mubr.f32.mxu0 %v10049_v51  ;;  %v2694_v23 = vpop.f32.mrb[158].mxu1  ;;  %v3600_v11 = vpop.f32.mrb[130].mxu0 }
 0x29f   : > { %v9254_v45 = vmax.f32 %v3126_v9, 0.0  ;;  %v3088_v6 = vmul.f32 %v8831_v33, %v2985_v37  ;;  %v2920_v61 = vadd.f32 %v9122_v22, %v2694_v23  ;;  %v2696_v39 = vpop.f32.mrb[159].mxu1  ;;  %v10052_v22 = vmax.f32 %v9108_v47, 0.0  ;;  %v9276_v23 = vld [vmem:[#allocation2 + $0x108] sm:$0xff] }
 0x2a0   : > { %v9260_v15 = vld [vmem:[#allocation2 + $0x152] sm:$0xff]  ;;  %v9263_v14 = vld [vmem:[#allocation2 + $0x15a] sm:$0xff] }
 0x2a1   : > { %3699 = vmatmul.mubr.f32.gmra.mrb[170].mxu0 %v9258_v2  ;;  %10050 = vst [vmem:[#allocation25_spill] sm:$0xff] %v9263_v14  ;;  %3190 = vst [vmem:[#allocation2 + $0x171] sm:$0xff] %v9254_v45  ;;  %v9267_v56 = vadd.f32 %v8841_v16, %v3088_v6  ;;  %v2986_v59 = vadd.f32 %v2920_v61, %v8822_v19  ;;  %6747 = vmatprep.mubr.f32.mxu1 %v9260_v15  ;;  %v3602_v61 = vpop.f32.mrb[131].mxu0 }
 0x2a2   : > { %3703 = vmatprep.mubr.f32.mxu0 %v10052_v22  ;;  %6748 = vmatmul.mubr.f32.gmra.mrb[188].mxu1 %v9263_v14  ;;  %v6707_v9 = vpop.f32.mrb[160].mxu1  ;;  %v10056_v22 = vmax.f32 %v9127_v5, 0.0  ;;  %v5218_v5 = vld [vmem:[#allocation10 + $0x418] sm:$0xff]  ;;  %v5220_v61 = vld [vmem:[#allocation10 + $0x428] sm:$0xff] }
 0x2a3   : > { %10051 = vst [vmem:[#allocation26_spill] sm:$0xff] %v9267_v56  ;;  %v9993_v37 = vmax.f32 %v9267_v56, 0.0  ;;  %v3089_v51 = vmul.f32 %v8831_v33, %v2986_v59  ;;  %v3820_v39 = vpop.f32.mrb[161].mxu1  ;;  %v9281_v19 = vadd.f32 %v6707_v9, %v3600_v11  ;;  %v9291_v59 = vld [vmem:[#allocation2 + $0x110] sm:$0xff]  ;;  %v4075_v9 = vld [vmem:[#allocation2 + $0x19] sm:$0xff] }
 0x2a4   : > { %v9279_v6 = vadd.f32 %v3820_v39, %v3595_v35  ;;  %v5219_v11 = vld [vmem:[#allocation10 + $0x420] sm:$0xff]  ;;  %v5184_v56 = vld [vmem:[#allocation10 + $0x308] sm:$0xff] }
 0x2a5   : > { %3704 = vmatmul.mubr.f32.gmra.mrb[172].mxu0 %v9276_v23  ;;  %10054 = vst [vmem:[#allocation28_spill] sm:$0xff] %v9281_v19  ;;  %3191 = vst [vmem:[#allocation2 + $0x181] sm:$0xff] %v9993_v37  ;;  %v9286_v47 = vadd.f32 %v8841_v16, %v3089_v51  ;;  %v5217_v16 = vld [vmem:[#allocation10 + $0x410] sm:$0xff]  ;;  %v9338_v19 = vld [vmem:[#allocation2 + $0x51] sm:$0xff] }
 0x2a6   : > { %10053 = vst [vmem:[#allocation27_spill] sm:$0xff] %v9279_v6  ;;  %3708 = vmatprep.mubr.f32.mxu0 %v10056_v22  ;;  %v9303_v51 = vld [vmem:[#allocation2 + $0x120] sm:$0xff]  ;;  %v7365_v39 = vpack.c.bf16 %v5218_v5, %v5217_v16  ;;  %v5222_v16 = vld [vmem:[#allocation10 + $0x438] sm:$0xff]  ;;  %v9314_v5 = vld [vmem:[#allocation2 + $0x31] sm:$0xff] }
 0x2a7   : > { %10055 = vst [vmem:[#allocation29_spill] sm:$0xff] %v9286_v47  ;;  %v9992_v33 = vmax.f32 %v9286_v47, 0.0  ;;  %v4076_v22 = vld [vmem:[#allocation2 + $0x21] sm:$0xff]  ;;  %v9330_v6 = vld [vmem:[#allocation2 + $0x49] sm:$0xff] }
 0x2a8   : > { %v9293_v14 = vld [vmem:[#allocation2 + $0x16a] sm:$0xff]  ;;  %v9296_v35 = vld [vmem:[#allocation2 + $0x172] sm:$0xff]  ;;  %v5221_v37 = vld [vmem:[#allocation10 + $0x430] sm:$0xff] }
 0x2a9   : > { %3709 = vmatmul.mubr.f32.gmra.mrb[174].mxu0 %v9291_v59  ;;  %3192 = vst [vmem:[#allocation2 + $0x189] sm:$0xff] %v9992_v33  ;;  %6750 = vmatprep.mubr.f32.mxu1 %v9293_v14  ;;  %v9308_v33 = vld [vmem:[#allocation2 + $0x128] sm:$0xff] }
 0x2aa   : > { %3713 = vmatprep.mubr.f32.mxu0 %v9152_v53  ;;  %6751 = vmatmul.mubr.f32.gmra.mrb[190].mxu1 %v9296_v35  ;;  %v9346_v47 = vld [vmem:[#allocation2 + $0x61] sm:$0xff] }
 0x2ab   : > { %4412 = vmatprep.mubr.f32.mxu1 %v4075_v9  ;;  %v7369_v9 = vpack.c.bf16 %v5220_v61, %v5219_v11  ;;  %v5223_v11 = vld [vmem:[#allocation10 + $0x440] sm:$0xff]  ;;  %v5224_v61 = vld [vmem:[#allocation10 + $0x448] sm:$0xff] }
 0x2ad   : > { %3714 = vmatmul.mubr.f32.gmra.mrb[176].mxu0 %v9303_v51 }
 0x2ae   : > { %3718 = vmatprep.mubr.f32.mxu0 %v9164_v60  ;;  %4413 = vmatmul.mubr.f32.vlgmr.msra.gmra.mrb[192].mxu1 %v8894_v54  ;;  %v9317_v54 = vld [vmem:[#allocation2 + $0x138] sm:$0xff] }
 0x2af   : > { %4417 = vmatprep.mubr.f32.mxu1 %v4076_v22  ;;  %7364 = vmatpush3.bf16.msra.mxu1 %v8865_v10  ;;  %v7373_v10 = vpack.c.bf16 %v5222_v16, %v5221_v37  ;;  %v9322_v22 = vld [vmem:[#allocation2 + $0x39] sm:$0xff]  ;;  %v5226_v16 = vld [vmem:[#allocation10 + $0x458] sm:$0xff] }
 0x2b0   : > { %7366 = vmatprep.subr.bf16.mxu1 %v7365_v39  ;;  %v5225_v37 = vld [vmem:[#allocation10 + $0x450] sm:$0xff] }
 0x2b1   : > { %3719 = vmatmul.mubr.f32.gmra.mrb[178].mxu0 %v9308_v33 }
 0x2b2   : > { %3723 = vmatprep.mubr.f32.mxu0 %v9182_v13  ;;  %4418 = vmatmul.mubr.f32.gmra.mrb[194].mxu1 %v8918_v38  ;;  %v9325_v38 = vld [vmem:[#allocation2 + $0x140] sm:$0xff] }
 0x2b3   : > { %4422 = vmatprep.mubr.f32.mxu1 %v9314_v5  ;;  %7368 = vmatpush3.bf16.msra.mxu1 %v7365_v39  ;;  %v7377_v39 = vpack.c.bf16 %v5224_v61, %v5223_v11  ;;  %v5227_v11 = vld [vmem:[#allocation10 + $0x460] sm:$0xff]  ;;  %v5228_v61 = vld [vmem:[#allocation10 + $0x468] sm:$0xff] }
 0x2b4   : > { %7370 = vmatprep.subr.bf16.mxu1 %v7369_v9 }
 0x2b5   : > { %3724 = vmatmul.mubr.f32.gmra.mrb[180].mxu0 %v9317_v54 }
 0x2b6   : > { %3728 = vmatprep.mubr.f32.mxu0 %v9194_v12  ;;  %4423 = vmatmul.mubr.f32.gmra.mrb[196].mxu1 %v8943_v20  ;;  %v9333_v20 = vld [vmem:[#allocation2 + $0x150] sm:$0xff] }
 0x2b7   : > { %4427 = vmatprep.mubr.f32.mxu1 %v9322_v22  ;;  %7372 = vmatpush3.bf16.msra.mxu1 %v7369_v9  ;;  %v7381_v9 = vpack.c.bf16 %v5226_v16, %v5225_v37  ;;  %v5229_v37 = vld [vmem:[#allocation10 + $0x470] sm:$0xff]  ;;  %v5230_v16 = vld [vmem:[#allocation10 + $0x478] sm:$0xff] }
 0x2b8   : > { %7374 = vmatprep.subr.bf16.mxu1 %v7373_v10 }
 0x2b9   : > { %3729 = vmatmul.mubr.f32.gmra.mrb[182].mxu0 %v9325_v38 }
 0x2ba   : > { %3733 = vmatprep.mubr.f32.mxu0 %v9212_v28  ;;  %4428 = vmatmul.mubr.f32.gmra.mrb[198].mxu1 %v8969_v1  ;;  %v9341_v1 = vld [vmem:[#allocation2 + $0x158] sm:$0xff] }
 0x2bb   : > { %4432 = vmatprep.mubr.f32.mxu1 %v9330_v6  ;;  %7376 = vmatpush3.bf16.msra.mxu1 %v7373_v10  ;;  %v7385_v10 = vpack.c.bf16 %v5228_v61, %v5227_v11  ;;  %v9354_v11 = vld [vmem:[#allocation2 + $0x69] sm:$0xff] }
 0x2bc   : > { %7378 = vmatprep.subr.bf16.mxu1 %v7377_v39  ;;  %v5183_v61 = vld [vmem:[#allocation10 + $0x300] sm:$0xff] }
 0x2bd   : > { %3734 = vmatmul.mubr.f32.gmra.mrb[184].mxu0 %v9333_v20 }
 0x2be   : > { %3738 = vmatprep.mubr.f32.mxu0 %v9224_v27  ;;  %4433 = vmatmul.mubr.f32.gmra.mrb[200].mxu1 %v8993_v36  ;;  %v9349_v36 = vld [vmem:[#allocation2 + $0x168] sm:$0xff] }
 0x2bf   : > { %4437 = vmatprep.mubr.f32.mxu1 %v9338_v19  ;;  %7380 = vmatpush3.bf16.msra.mxu1 %v7377_v39  ;;  %10057 = vst [vmem:[#allocation30_spill] sm:$0xff] %v9349_v36  ;;  %v7389_v39 = vpack.c.bf16 %v5230_v16, %v5229_v37  ;;  %v9361_v37 = vld [vmem:[#allocation2 + $0x79] sm:$0xff]  ;;  %v5186_v16 = vld [vmem:[#allocation10 + $0x318] sm:$0xff] }
 0x2c0   : > { %7382 = vmatprep.subr.bf16.mxu1 %v7381_v9 }
 0x2c1   : > { %3739 = vmatmul.mubr.f32.gmra.mrb[186].mxu0 %v9341_v1 }
 0x2c2   : > { %3743 = vmatprep.mubr.f32.mxu0 %v9242_v57  ;;  %4438 = vmatmul.mubr.f32.gmra.mrb[202].mxu1 %v9016_v50  ;;  %v9357_v50 = vld [vmem:[#allocation2 + $0x170] sm:$0xff] }
 0x2c3   : > { %4442 = vmatprep.mubr.f32.mxu1 %v9346_v47  ;;  %7384 = vmatpush3.bf16.msra.mxu1 %v7381_v9  ;;  %10058 = vst [vmem:[#allocation31_spill] sm:$0xff] %v9357_v50  ;;  %v4139_v9 = vld [vmem:[#allocation2 + $0x1a] sm:$0xff] }
 0x2c4   : > { %7386 = vmatprep.subr.bf16.mxu1 %v7385_v10 }
 0x2c5   : > { %3744 = vmatmul.mubr.f32.gmra.mrb[188].mxu0 %v9349_v36  ;;  %v7314_v36 = vpack.c.bf16 %v5184_v56, %v5183_v61  ;;  %v5188_v56 = vld [vmem:[#allocation10 + $0x328] sm:$0xff]  ;;  %v5194_v61 = vld [vmem:[#allocation10 + $0x358] sm:$0xff] }
 0x2c6   : > { %3748 = vmatprep.mubr.f32.mxu0 %v9254_v45  ;;  %4443 = vmatmul.mubr.f32.gmra.mrb[204].mxu1 %v9037_v34  ;;  %v5185_v34 = vld [vmem:[#allocation10 + $0x310] sm:$0xff] }
 0x2c7   : > { %4447 = vmatprep.mubr.f32.mxu1 %v9354_v11  ;;  %7388 = vmatpush3.bf16.msra.mxu1 %v7385_v10  ;;  %v7317_v10 = vpack.c.bf16 %v5186_v16, %v5185_v34  ;;  %v10060_v34 = vld [vmem:[#allocation17_spill] sm:$0xff]  ;;  %v5196_v16 = vld [vmem:[#allocation10 + $0x368] sm:$0xff] }
 0x2c8   : > { %7390 = vmatprep.subr.bf16.mxu1 %v7389_v39 }
 0x2c9   : > { %3749 = vmatmul.mubr.f32.gmra.mrb[190].mxu0 %v9357_v50  ;;  %v9367_v50 = vld [vmem:[#allocation2 + $0x81] sm:$0xff] }
 0x2ca   : > { %6785 = vmatprep.mubr.f32.mxu0 %v4139_v9  ;;  %4448 = vmatmul.mubr.f32.gmra.mrb[206].mxu1 %v9056_v26  ;;  %v5187_v26 = vld [vmem:[#allocation10 + $0x320] sm:$0xff] }
 0x2cb   : > { %4452 = vmatprep.mubr.f32.mxu1 %v9361_v37  ;;  %7392 = vmatpush3.bf16.msra.mxu1 %v7389_v39  ;;  %v5192_v39 = vld [vmem:[#allocation10 + $0x348] sm:$0xff]  ;;  %v10059_v9 = vld [vmem:[#allocation15_spill] sm:$0xff] }
 0x2cd   : > { %6786 = vmatmul.mubr.f32.vlgmr.msra.gmra.mrb[192].mxu0 %v8903_v44  ;;  %v7320_v44 = vpack.c.bf16 %v5188_v56, %v5187_v26  ;;  %v10062_v26 = vld [vmem:[#allocation19_spill] sm:$0xff] }
 0x2ce   : > { %6788 = vmatprep.mubr.f32.mxu0 %v8916_v8  ;;  %7315 = vmatpush1.bf16.msra.mxu0 %v7314_v36  ;;  %v9374_v8 = vld [vmem:[#allocation2 + $0x91] sm:$0xff]  ;;  %v5190_v36 = vld [vmem:[#allocation10 + $0x338] sm:$0xff] }
 0x2cf   : > { %4453 = vmatmul.mubr.f32.gmra.mrb[208].mxu1 %v9079_v52  ;;  %7316 = vmatprep.subr.bf16.mxu0 %v10010_v43  ;;  %v5189_v52 = vld [vmem:[#allocation10 + $0x330] sm:$0xff] }
 0x2d0   : > { %4457 = vmatprep.mubr.f32.mxu1 %v9367_v50 }
 0x2d1   : > { %6789 = vmatmul.mubr.f32.gmra.mrb[194].mxu0 %v8928_v48  ;;  %v7323_v48 = vpack.c.bf16 %v5190_v36, %v5189_v52  ;;  %v5198_v52 = vld [vmem:[#allocation10 + $0x378] sm:$0xff] }
 0x2d2   : > { %6791 = vmatprep.mubr.f32.mxu0 %v8941_v3  ;;  %7318 = vmatpush1.bf16.msra.mxu0 %v7317_v10  ;;  %v9381_v3 = vld [vmem:[#allocation2 + $0x99] sm:$0xff]  ;;  %v10063_v36 = vld [vmem:[#allocation18_spill] sm:$0xff] }
 0x2d3   : > { %4458 = vmatmul.mubr.f32.gmra.mrb[210].mxu1 %v9096_v31  ;;  %7319 = vmatprep.subr.bf16.mxu0 %v10010_v43  ;;  %v5191_v31 = vld [vmem:[#allocation10 + $0x340] sm:$0xff]  ;;  %v10061_v10 = vld [vmem:[#allocation16_spill] sm:$0xff] }
 0x2d4   : > { %4462 = vmatprep.mubr.f32.mxu1 %v9374_v8 }
 0x2d5   : > { %6792 = vmatmul.mubr.f32.gmra.mrb[196].mxu0 %v8953_v24  ;;  %v7326_v24 = vpack.c.bf16 %v5192_v39, %v5191_v31  ;;  %v9409_v39 = vld [vmem:[#allocation2 + $0xc9] sm:$0xff] }
 0x2d6   : > { %6794 = vmatprep.mubr.f32.mxu0 %v8967_v4  ;;  %7321 = vmatpush1.bf16.msra.mxu0 %v7320_v44  ;;  %v9388_v4 = vld [vmem:[#allocation2 + $0xa9] sm:$0xff]  ;;  %v9402_v44 = vld [vmem:[#allocation2 + $0xc1] sm:$0xff] }
 0x2d7   : > { %4463 = vmatmul.mubr.f32.gmra.mrb[212].mxu1 %v9119_v49  ;;  %7322 = vmatprep.subr.bf16.mxu0 %v10010_v43  ;;  %v5193_v49 = vld [vmem:[#allocation10 + $0x350] sm:$0xff] }
 0x2d8   : > { %4467 = vmatprep.mubr.f32.mxu1 %v9381_v3 }
 0x2d9   : > { %6795 = vmatmul.mubr.f32.gmra.mrb[198].mxu0 %v8979_v17  ;;  %v7329_v17 = vpack.c.bf16 %v5194_v61, %v5193_v49  ;;  %v10065_v49 = vld [vmem:[#allocation20_spill] sm:$0xff]  ;;  %v10066_v61 = vld [vmem:[#allocation22_spill] sm:$0xff] }
 0x2da   : > { %6797 = vmatprep.mubr.f32.mxu0 %v8991_v58  ;;  %7324 = vmatpush1.bf16.msra.mxu0 %v7323_v48  ;;  %v9395_v58 = vld [vmem:[#allocation2 + $0xb1] sm:$0xff]  ;;  %v10064_v48 = vld [vmem:[#allocation21_spill] sm:$0xff] }
 0x2db   : > { %4468 = vmatmul.mubr.f32.gmra.mrb[214].mxu1 %v9137_v42  ;;  %7325 = vmatprep.subr.bf16.mxu0 %v10010_v43  ;;  %v5195_v42 = vld [vmem:[#allocation10 + $0x360] sm:$0xff] }
 0x2dc   : > { %4472 = vmatprep.mubr.f32.mxu1 %v9388_v4  ;;  %v7332_v56 = vpack.c.bf16 %v5196_v16, %v5195_v42  ;;  %v10067_v42 = vld [vmem:[#allocation23_spill] sm:$0xff] }
 0x2dd   : > { %6798 = vmatmul.mubr.f32.gmra.mrb[200].mxu0 %v10059_v9 }
 0x2de   : > { %6800 = vmatprep.mubr.f32.mxu0 %v10060_v34  ;;  %7327 = vmatpush1.bf16.msra.mxu0 %v7326_v24  ;;  %v5200_v24 = vld [vmem:[#allocation10 + $0x388] sm:$0xff] }
 0x2df   : > { %4473 = vmatmul.mubr.f32.gmra.mrb[216].mxu1 %v9156_v62  ;;  %7328 = vmatprep.subr.bf16.mxu0 %v10010_v43  ;;  %v5197_v62 = vld [vmem:[#allocation10 + $0x370] sm:$0xff] }
 0x2e0   : > { %4477 = vmatprep.mubr.f32.mxu1 %v9395_v58  ;;  %v7335_v31 = vpack.c.bf16 %v5198_v52, %v5197_v62  ;;  %v9416_v34 = vld [vmem:[#allocation2 + $0xd9] sm:$0xff]  ;;  %v5206_v62 = vld [vmem:[#allocation10 + $0x3b8] sm:$0xff] }
 0x2e1   : > { %6801 = vmatmul.mubr.f32.gmra.mrb[202].mxu0 %v10061_v10  ;;  %v9423_v10 = vld [vmem:[#allocation2 + $0xe1] sm:$0xff]  ;;  %v5208_v52 = vld [vmem:[#allocation10 + $0x3c8] sm:$0xff] }
 0x2e2   : > { %6803 = vmatprep.mubr.f32.mxu0 %v10062_v26  ;;  %7330 = vmatpush1.bf16.msra.mxu0 %v7329_v17  ;;  %v5202_v17 = vld [vmem:[#allocation10 + $0x398] sm:$0xff]  ;;  %v5204_v26 = vld [vmem:[#allocation10 + $0x3a8] sm:$0xff] }
 0x2e3   : > { %4478 = vmatmul.mubr.f32.gmra.mrb[218].mxu1 %v9168_v7  ;;  %7331 = vmatprep.subr.bf16.mxu0 %v10010_v43  ;;  %v5199_v7 = vld [vmem:[#allocation10 + $0x380] sm:$0xff] }
 0x2e4   : > { %4482 = vmatprep.mubr.f32.mxu1 %v9402_v44  ;;  %v7338_v9 = vpack.c.bf16 %v5200_v24, %v5199_v7  ;;  %v10069_v7 = vld [vmem:[#allocation25_spill] sm:$0xff] }
 0x2e5   : > { %6804 = vmatmul.mubr.f32.gmra.mrb[204].mxu0 %v10063_v36  ;;  %v5210_v36 = vld [vmem:[#allocation10 + $0x3d8] sm:$0xff] }
 0x2e6   : > { %6806 = vmatprep.mubr.f32.mxu0 %v10064_v48  ;;  %7333 = vmatpush1.bf16.msra.mxu0 %v7332_v56  ;;  %v10068_v48 = vld [vmem:[#allocation24_spill] sm:$0xff] }
 0x2e7   : > { %4483 = vmatmul.mubr.f32.gmra.mrb[220].mxu1 %v9186_v18  ;;  %7334 = vmatprep.subr.bf16.mxu0 %v10010_v43  ;;  %v5201_v18 = vld [vmem:[#allocation10 + $0x390] sm:$0xff] }
 0x2e8   : > { %4487 = vmatprep.mubr.f32.mxu1 %v9409_v39  ;;  %v7341_v16 = vpack.c.bf16 %v5202_v17, %v5201_v18 }
 0x2e9   : > { %6807 = vmatmul.mubr.f32.gmra.mrb[206].mxu0 %v10065_v49  ;;  %v9461_v49 = vld [vmem:[#allocation2 + $0x182] sm:$0xff] }
 0x2ea   : > { %6809 = vmatprep.mubr.f32.mxu0 %v10066_v61  ;;  %7336 = vmatpush1.bf16.msra.mxu0 %v7335_v31  ;;  %v5212_v31 = vld [vmem:[#allocation10 + $0x3e8] sm:$0xff] }
 0x2eb   : > { %4488 = vmatmul.mubr.f32.gmra.mrb[222].mxu1 %v9198_v0  ;;  %7337 = vmatprep.subr.bf16.mxu0 %v10010_v43  ;;  %v5203_v0 = vld [vmem:[#allocation10 + $0x3a0] sm:$0xff] }
 0x2ec   : > { %4492 = vmatprep.mubr.f32.mxu1 %v9416_v34  ;;  %v7344_v56 = vpack.c.bf16 %v5204_v26, %v5203_v0  ;;  %v4903_v0 = vld [vmem:[#allocation2 + $0x98] sm:$0xff] }
 0x2ed   : > { %6810 = vmatmul.mubr.f32.gmra.mrb[208].mxu0 %v10067_v42  ;;  %v5023_v42 = vld [vmem:[#allocation2 + $0x3a] sm:$0xff] }
 0x2ee   : > { %6812 = vmatprep.mubr.f32.mxu0 %v9139_v55  ;;  %7339 = vmatpush1.bf16.msra.mxu0 %v7338_v9  ;;  %v9430_v55 = vld [vmem:[#allocation2 + $0xf1] sm:$0xff] }
 0x2ef   : > { %4493 = vmatmul.mubr.f32.gmra.mrb[224].mxu1 %v9216_v40  ;;  %7340 = vmatprep.subr.bf16.mxu0 %v10010_v43  ;;  %v5205_v40 = vld [vmem:[#allocation10 + $0x3b0] sm:$0xff] }
 0x2f0   : > { %4497 = vmatprep.mubr.f32.mxu1 %v9423_v10 }
 0x2f1   : > { %6813 = vmatmul.mubr.f32.gmra.mrb[210].mxu0 %v9142_v21  ;;  %v7347_v21 = vpack.c.bf16 %v5206_v62, %v5205_v40 }
 0x2f2   : > { %6815 = vmatprep.mubr.f32.mxu0 %v9170_v29  ;;  %7342 = vmatpush1.bf16.msra.mxu0 %v7341_v16  ;;  %v9437_v29 = vld [vmem:[#allocation2 + $0xf9] sm:$0xff]  ;;  %v5024_v16 = vld [vmem:[#allocation2 + $0x4a] sm:$0xff] }
 0x2f3   : > { %4498 = vmatmul.mubr.f32.gmra.mrb[226].mxu1 %v9228_v30  ;;  %7343 = vmatprep.subr.bf16.mxu0 %v10010_v43  ;;  %v5207_v30 = vld [vmem:[#allocation10 + $0x3c0] sm:$0xff] }
 0x2f4   : > { %4502 = vmatprep.mubr.f32.mxu1 %v9430_v55 }
 0x2f5   : > { %6816 = vmatmul.mubr.f32.gmra.mrb[212].mxu0 %v9173_v32  ;;  %v7350_v32 = vpack.c.bf16 %v5208_v52, %v5207_v30  ;;  %v5026_v30 = vld [vmem:[#allocation2 + $0x62] sm:$0xff] }
 0x2f6   : > { %6818 = vmatprep.mubr.f32.mxu0 %v9200_v25  ;;  %7345 = vmatpush1.bf16.msra.mxu0 %v7344_v56  ;;  %v9444_v25 = vld [vmem:[#allocation2 + $0x109] sm:$0xff] }
 0x2f7   : > { %4503 = vmatmul.mubr.f32.gmra.mrb[228].mxu1 %v9246_v41  ;;  %7346 = vmatprep.subr.bf16.mxu0 %v10010_v43  ;;  %v5209_v41 = vld [vmem:[#allocation10 + $0x3d0] sm:$0xff] }
 0x2f8   : > { %4507 = vmatprep.mubr.f32.mxu1 %v9437_v29 }
 0x2f9   : > { %6819 = vmatmul.mubr.f32.gmra.mrb[214].mxu0 %v9203_v63  ;;  %v7353_v63 = vpack.c.bf16 %v5210_v36, %v5209_v41 }
 0x2fa   : > { %6821 = vmatprep.mubr.f32.mxu0 %v9230_v46  ;;  %7348 = vmatpush1.bf16.msra.mxu0 %v7347_v21  ;;  %v9451_v46 = vld [vmem:[#allocation2 + $0x111] sm:$0xff] }
 0x2fb   : > { %4508 = vmatmul.mubr.f32.gmra.mrb[230].mxu1 %v9258_v2  ;;  %7349 = vmatprep.subr.bf16.mxu0 %v10010_v43  ;;  %v5211_v2 = vld [vmem:[#allocation10 + $0x3e0] sm:$0xff] }
 0x2fc   : > { %4512 = vmatprep.mubr.f32.mxu1 %v9444_v25  ;;  %v7356_v24 = vpack.c.bf16 %v5212_v31, %v5211_v2  ;;  %v5025_v21 = vld [vmem:[#allocation2 + $0x52] sm:$0xff]  ;;  %v5028_v2 = vld [vmem:[#allocation2 + $0x7a] sm:$0xff] }
 0x2fd   : > { %6822 = vmatmul.mubr.f32.gmra.mrb[216].mxu0 %v10068_v48 }
 0x2fe   : > { %6824 = vmatprep.mubr.f32.mxu0 %v9260_v15  ;;  %7351 = vmatpush1.bf16.msra.mxu0 %v7350_v32  ;;  %v5213_v15 = vld [vmem:[#allocation10 + $0x3f0] sm:$0xff]  ;;  %v4904_v32 = vld [vmem:[#allocation2 + $0xa8] sm:$0xff] }
 0x2ff   : > { %4513 = vmatmul.mubr.f32.gmra.mrb[232].mxu1 %v9276_v23  ;;  %7352 = vmatprep.subr.bf16.mxu0 %v10010_v43  ;;  %v5214_v23 = vld [vmem:[#allocation10 + $0x3f8] sm:$0xff] }
 0x300   : > { %4517 = vmatprep.mubr.f32.mxu1 %v9451_v46  ;;  %v7359_v61 = vpack.c.bf16 %v5214_v23, %v5213_v15 }
 0x301   : > { %6825 = vmatmul.mubr.f32.gmra.mrb[218].mxu0 %v10069_v7  ;;  %v4905_v7 = vld [vmem:[#allocation2 + $0xb0] sm:$0xff] }
 0x302   : > { %6827 = vmatprep.mubr.f32.mxu0 %v9293_v14  ;;  %7354 = vmatpush1.bf16.msra.mxu0 %v7353_v63  ;;  %v9467_v14 = vld [vmem:[#allocation2 + $0x18a] sm:$0xff] }
 0x303   : > { %4518 = vmatmul.mubr.f32.gmra.mrb[234].mxu1 %v9291_v59  ;;  %7355 = vmatprep.subr.bf16.mxu0 %v10010_v43  ;;  %v10074_v59 = vld [vmem:[#allocation29_spill] sm:$0xff]  ;;  %v5027_v63 = vld [vmem:[#allocation2 + $0x6a] sm:$0xff] }
 0x304   : > { %4522 = vmatprep.mubr.f32.mxu1 %v9152_v53  ;;  %v4894_v53 = vld [vmem:[#allocation2 + $0x30] sm:$0xff] }
 0x305   : > { %6828 = vmatmul.mubr.f32.gmra.mrb[220].mxu0 %v9296_v35  ;;  %v10075_v35 = vmax.f32 %v10074_v59, 0.0 }
 0x306   : > { %6830 = vmatprep.mubr.f32.mxu0 %v9461_v49  ;;  %7357 = vmatpush1.bf16.msra.mxu0 %v7356_v24 }
 0x307   : > { %4523 = vmatmul.mubr.f32.gmra.mrb[236].mxu1 %v9303_v51  ;;  %7358 = vmatprep.subr.bf16.mxu0 %v10010_v43  ;;  %v4895_v43 = vld [vmem:[#allocation2 + $0x38] sm:$0xff]  ;;  %v4901_v51 = vld [vmem:[#allocation2 + $0x80] sm:$0xff] }
 0x308   : > { %4527 = vmatprep.mubr.f32.mxu1 %v9164_v60  ;;  %v4896_v60 = vld [vmem:[#allocation2 + $0x48] sm:$0xff] }
 0x309   : > { %6831 = vmatmul.mubr.f32.gmra.mrb[222].mxu0 %v9467_v14 }
 0x30a   : > { %7360 = vmatpush1.bf16.msra.mxu0 %v7359_v61  ;;  %5295 = vmatprep.mubr.f32.mxu0 %v9314_v5  ;;  %v5029_v61 = vld [vmem:[#allocation2 + $0x82] sm:$0xff] }
 0x30b   : > { %4528 = vmatmul.mubr.f32.gmra.mrb[238].mxu1 %v9308_v33  ;;  %v4900_v33 = vld [vmem:[#allocation2 + $0x78] sm:$0xff] }
 0x30c   : > { %4532 = vmatprep.mubr.f32.mxu1 %v9182_v13  ;;  %v4897_v13 = vld [vmem:[#allocation2 + $0x50] sm:$0xff] }
 0x30d   : > { %5296 = vmatmul.mubr.f32.vlgmr.msra.gmra.mrb[224].mxu0 %v4894_v53  ;;  %v5030_v53 = vld [vmem:[#allocation2 + $0x92] sm:$0xff] }
 0x30e   : > { %5300 = vmatprep.mubr.f32.mxu0 %v9322_v22 }
 0x30f   : > { %4533 = vmatmul.mubr.f32.gmra.mrb[240].mxu1 %v9317_v54 }
 0x310   : > { %4537 = vmatprep.mubr.f32.mxu1 %v9194_v12  ;;  %v4898_v12 = vld [vmem:[#allocation2 + $0x60] sm:$0xff] }
 0x311   : > { %5301 = vmatmul.mubr.f32.gmra.mrb[226].mxu0 %v4895_v43 }
 0x312   : > { %5305 = vmatprep.mubr.f32.mxu0 %v9330_v6  ;;  %v4899_v6 = vld [vmem:[#allocation2 + $0x68] sm:$0xff] }
 0x313   : > { %4538 = vmatmul.mubr.f32.gmra.mrb[242].mxu1 %v9325_v38  ;;  %v9498_v38 = vld [vmem:[#allocation2 + $0x188] sm:$0xff] }
 0x314   : > { %4542 = vmatprep.mubr.f32.mxu1 %v9212_v28  ;;  %v10070_v28 = vld [vmem:[#allocation30_spill] sm:$0xff] }
 0x315   : > { %5306 = vmatmul.mubr.f32.gmra.mrb[228].mxu0 %v4896_v60  ;;  %v4906_v60 = vld [vmem:[#allocation2 + $0xc0] sm:$0xff] }
 0x316   : > { %5310 = vmatprep.mubr.f32.mxu0 %v9338_v19  ;;  %v10072_v19 = vld [vmem:[#allocation26_spill] sm:$0xff] }
 0x317   : > { %4543 = vmatmul.mubr.f32.gmra.mrb[244].mxu1 %v9333_v20 }
 0x318   : > { %4547 = vmatprep.mubr.f32.mxu1 %v9224_v27  ;;  %v10071_v27 = vld [vmem:[#allocation31_spill] sm:$0xff] }
 0x319   : > { %5311 = vmatmul.mubr.f32.gmra.mrb[230].mxu0 %v4897_v13 }
 0x31a   : > { %5315 = vmatprep.mubr.f32.mxu0 %v9346_v47  ;;  %v10073_v47 = vmax.f32 %v10072_v19, 0.0 }
 0x31b   : > { %4548 = vmatmul.mubr.f32.gmra.mrb[246].mxu1 %v9341_v1  ;;  %v5022_v1 = vld [vmem:[#allocation2 + $0x32] sm:$0xff] }
 0x31c   : > { %4552 = vmatprep.mubr.f32.mxu1 %v9242_v57  ;;  %v9492_v57 = vld [vmem:[#allocation2 + $0x180] sm:$0xff] }
 0x31d   : > { %5316 = vmatmul.mubr.f32.gmra.mrb[232].mxu0 %v4898_v12 }
 0x31e   : > { %5320 = vmatprep.mubr.f32.mxu0 %v9354_v11 }
 0x31f   : > { %4553 = vmatmul.mubr.f32.gmra.mrb[248].mxu1 %v10070_v28 }
 0x320   : > { %4557 = vmatprep.mubr.f32.mxu1 %v9254_v45 }
 0x321   : > { %5321 = vmatmul.mubr.f32.gmra.mrb[234].mxu0 %v4899_v6  ;;  %v5031_v6 = vld [vmem:[#allocation2 + $0x9a] sm:$0xff] }
 0x322   : > { %5325 = vmatprep.mubr.f32.mxu0 %v9361_v37 }
 0x323   : > { %4558 = vmatmul.mubr.f32.gmra.mrb[250].mxu1 %v10071_v27  ;;  %v5032_v27 = vld [vmem:[#allocation2 + $0xaa] sm:$0xff] }
 0x324   : > { %4562 = vmatprep.mubr.f32.mxu1 %v10073_v47 }
 0x325   : > { %5326 = vmatmul.mubr.f32.gmra.mrb[236].mxu0 %v4900_v33 }
 0x326   : > { %5330 = vmatprep.mubr.f32.mxu0 %v9367_v50  ;;  %v4902_v50 = vld [vmem:[#allocation2 + $0x90] sm:$0xff] }
 0x327   : > { %4563 = vmatmul.mubr.f32.gmra.mrb[252].mxu1 %v9492_v57 }
 0x328   : > { %4567 = vmatprep.mubr.f32.mxu1 %v10075_v35  ;;  %v3605_v45 = vpop.f32.mrb[132].mxu0  ;;  %v6710_v5 = vpop.f32.mrb[162].mxu1 }
 0x329   : > { %v3607_v54 = vpop.f32.mrb[133].mxu0  ;;  %5331 = vmatmul.mubr.f32.gmra.mrb[238].mxu0 %v4901_v51  ;;  %v3830_v22 = vpop.f32.mrb[163].mxu1  ;;  %v5034_v51 = vld [vmem:[#allocation2 + $0xc2] sm:$0xff] }
 0x32a   : > { %5335 = vmatprep.mubr.f32.mxu0 %v9374_v8  ;;  %v9501_v20 = vadd.f32 %v3830_v22, %v3605_v45  ;;  %v5033_v45 = vld [vmem:[#allocation2 + $0xb2] sm:$0xff] }
 0x32b   : > { %4568 = vmatmul.mubr.f32.gmra.mrb[254].mxu1 %v9498_v38 }
 0x32c   : > { %6865 = vmatprep.mubr.f32.mxu1 %v5022_v1  ;;  %v3610_v11 = vpop.f32.mrb[134].mxu0  ;;  %v6713_v9 = vpop.f32.mrb[164].mxu1 }
 0x32d   : > { %v9504_v37 = vadd.f32 %v6710_v5, %v3610_v11  ;;  %v3612_v18 = vpop.f32.mrb[135].mxu0  ;;  %5336 = vmatmul.mubr.f32.gmra.mrb[240].mxu0 %v4902_v50  ;;  %v3840_v17 = vpop.f32.mrb[165].mxu1  ;;  %v4908_v5 = vld [vmem:[#allocation2 + $0xd8] sm:$0xff]  ;;  %v5035_v11 = vld [vmem:[#allocation2 + $0xca] sm:$0xff] }
 0x32e   : > { %5340 = vmatprep.mubr.f32.mxu0 %v9381_v3  ;;  %v4909_v18 = vld [vmem:[#allocation2 + $0xe0] sm:$0xff] }
 0x32f   : > { %6866 = vmatmul.mubr.f32.vlgmr.msra.gmra.mrb[0].mxu1 %v5023_v42 }
 0x330   : > { %6868 = vmatprep.mubr.f32.mxu1 %v5024_v16  ;;  %v3615_v8 = vpop.f32.mrb[136].mxu0  ;;  %v6716_v56 = vpop.f32.mrb[166].mxu1  ;;  %v5037_v16 = vld [vmem:[#allocation2 + $0xe2] sm:$0xff] }
 0x331   : > { %v9507_v26 = vadd.f32 %v3840_v17, %v3615_v8  ;;  %v3617_v40 = vpop.f32.mrb[137].mxu0  ;;  %5341 = vmatmul.mubr.f32.gmra.mrb[242].mxu0 %v4903_v0  ;;  %v3850_v62 = vpop.f32.mrb[167].mxu1  ;;  %v5038_v8 = vld [vmem:[#allocation2 + $0xf2] sm:$0xff] }
 0x332   : > { %5345 = vmatprep.mubr.f32.mxu0 %v9388_v4 }
 0x333   : > { %6869 = vmatmul.mubr.f32.gmra.mrb[2].mxu1 %v5025_v21  ;;  %v5039_v21 = vld [vmem:[#allocation2 + $0xfa] sm:$0xff] }
 0x334   : > { %6871 = vmatprep.mubr.f32.mxu1 %v5026_v30  ;;  %v3620_v52 = vpop.f32.mrb[138].mxu0  ;;  %v6719_v41 = vpop.f32.mrb[168].mxu1 }
 0x335   : > { %v9510_v3 = vadd.f32 %v6713_v9, %v3620_v52  ;;  %v3622_v36 = vpop.f32.mrb[139].mxu0  ;;  %5346 = vmatmul.mubr.f32.gmra.mrb[244].mxu0 %v4904_v32  ;;  %v3860_v48 = vpop.f32.mrb[169].mxu1  ;;  %v5036_v9 = vld [vmem:[#allocation2 + $0xda] sm:$0xff]  ;;  %v5040_v52 = vld [vmem:[#allocation2 + $0x10a] sm:$0xff] }
 0x336   : > { %5350 = vmatprep.mubr.f32.mxu0 %v9395_v58  ;;  %v4911_v32 = vld [vmem:[#allocation2 + $0xf8] sm:$0xff] }
 0x337   : > { %6872 = vmatmul.mubr.f32.gmra.mrb[4].mxu1 %v5027_v63  ;;  %v5042_v63 = vld [vmem:[#allocation2 + $0x122] sm:$0xff] }
 0x338   : > { %6874 = vmatprep.mubr.f32.mxu1 %v5028_v2  ;;  %v3625_v31 = vpop.f32.mrb[140].mxu0  ;;  %v6722_v24 = vpop.f32.mrb[170].mxu1 }
 0x339   : > { %v9513_v4 = vadd.f32 %v3850_v62, %v3625_v31  ;;  %v3627_v15 = vpop.f32.mrb[141].mxu0  ;;  %5351 = vmatmul.mubr.f32.gmra.mrb[246].mxu0 %v4905_v7  ;;  %v3870_v23 = vpop.f32.mrb[171].mxu1  ;;  %v4912_v31 = vld [vmem:[#allocation2 + $0x108] sm:$0xff] }
 0x33a   : > { %5355 = vmatprep.mubr.f32.mxu0 %v9402_v44  ;;  %v4907_v44 = vld [vmem:[#allocation2 + $0xc8] sm:$0xff] }
 0x33b   : > { %6875 = vmatmul.mubr.f32.gmra.mrb[6].mxu1 %v5029_v61  ;;  %v5043_v15 = vld [vmem:[#allocation2 + $0x12a] sm:$0xff]  ;;  %v5044_v61 = vld [vmem:[#allocation2 + $0x13a] sm:$0xff] }
 0x33c   : > { %6877 = vmatprep.mubr.f32.mxu1 %v5030_v53  ;;  %v3630_v43 = vpop.f32.mrb[142].mxu0  ;;  %v9518_v13 = vpop.f32.mrb[172].mxu1  ;;  %v4913_v53 = vld [vmem:[#allocation2 + $0x110] sm:$0xff] }
 0x33d   : > { %v9516_v58 = vadd.f32 %v6716_v56, %v3630_v43  ;;  %v3632_v12 = vpop.f32.mrb[143].mxu0  ;;  %5356 = vmatmul.mubr.f32.gmra.mrb[248].mxu0 %v4906_v60  ;;  %v3880_v28 = vpop.f32.mrb[173].mxu1  ;;  %v4910_v56 = vld [vmem:[#allocation2 + $0xf0] sm:$0xff] }
 0x33e   : > { %5360 = vmatprep.mubr.f32.mxu0 %v9409_v39  ;;  %v5045_v12 = vld [vmem:[#allocation2 + $0x142] sm:$0xff] }
 0x33f   : > { %6878 = vmatmul.mubr.f32.gmra.mrb[8].mxu1 %v5031_v6 }
 0x340   : > { %6880 = vmatprep.mubr.f32.mxu1 %v5032_v27  ;;  %v3635_v19 = vpop.f32.mrb[144].mxu0  ;;  %v9523_v33 = vpop.f32.mrb[174].mxu1 }
 0x341   : > { %v9521_v47 = vadd.f32 %v3860_v48, %v3635_v19  ;;  %v3637_v59 = vpop.f32.mrb[145].mxu0  ;;  %5361 = vmatmul.mubr.f32.gmra.mrb[250].mxu0 %v4907_v44  ;;  %v9525_v35 = vpop.f32.mrb[175].mxu1  ;;  %v5041_v48 = vld [vmem:[#allocation2 + $0x112] sm:$0xff]  ;;  %v4979_v44 = vld [vmem:[#allocation2 + $0x129] sm:$0xff] }
 0x342   : > { %5365 = vmatprep.mubr.f32.mxu0 %v9416_v34 }
 0x343   : > { %6881 = vmatmul.mubr.f32.gmra.mrb[10].mxu1 %v5033_v45 }
 0x344   : > { %6883 = vmatprep.mubr.f32.mxu1 %v5034_v51  ;;  %v3640_v39 = vpop.f32.mrb[146].mxu0  ;;  %v5048_v51 = vld [vmem:[#allocation2 + $0x16a] sm:$0xff] }
 0x345   : > { %v9528_v54 = vadd.f32 %v6719_v41, %v3640_v39  ;;  %v3642_v22 = vpop.f32.mrb[147].mxu0  ;;  %5366 = vmatmul.mubr.f32.gmra.mrb[252].mxu0 %v4908_v5  ;;  %v9530_v1 = vpop.f32.mrb[176].mxu1  ;;  %v4915_v5 = vld [vmem:[#allocation2 + $0x128] sm:$0xff] }
 0x346   : > { %5370 = vmatprep.mubr.f32.mxu0 %v9423_v10  ;;  %v9533_v50 = vpop.f32.mrb[177].mxu1 }
 0x347   : > { %6884 = vmatmul.mubr.f32.gmra.mrb[12].mxu1 %v5035_v11 }
 0x348   : > { %6886 = vmatprep.mubr.f32.mxu1 %v5036_v9  ;;  %v3645_v34 = vpop.f32.mrb[148].mxu0  ;;  %v5049_v9 = vld [vmem:[#allocation2 + $0x172] sm:$0xff] }
 0x349   : > { %v9535_v17 = vadd.f32 %v3870_v23, %v3645_v34  ;;  %v3647_v42 = vpop.f32.mrb[149].mxu0  ;;  %5371 = vmatmul.mubr.f32.gmra.mrb[254].mxu0 %v4909_v18  ;;  %v4916_v18 = vld [vmem:[#allocation2 + $0x138] sm:$0xff] }
 0x34a   : > { %5375 = vmatprep.mubr.f32.mxu0 %v9430_v55 }
 0x34b   : > { %6887 = vmatmul.mubr.f32.gmra.mrb[14].mxu1 %v5037_v16 }
 0x34c   : > { %6889 = vmatprep.mubr.f32.mxu1 %v5038_v8  ;;  %v3650_v0 = vpop.f32.mrb[150].mxu0  ;;  %v4981_v8 = vld [vmem:[#allocation2 + $0x141] sm:$0xff] }
 0x34d   : > { %v9538_v10 = vadd.f32 %v6722_v24, %v3650_v0  ;;  %v3652_v40 = vpop.f32.mrb[151].mxu0  ;;  %5376 = vmatmul.mubr.f32.gmra.mrb[0].mxu0 %v4910_v56  ;;  %v5052_v0 = vld [vmem:[#allocation2 + $0x19a] sm:$0xff] }
 0x34e   : > { %v9540_v62 = vpop.f32.mrb[178].mxu1  ;;  %5380 = vmatprep.mubr.f32.mxu0 %v9437_v29 }
 0x34f   : > { %v9543_v30 = vpop.f32.mrb[179].mxu1  ;;  %6890 = vmatmul.mubr.f32.gmra.mrb[16].mxu1 %v5039_v21  ;;  %v4917_v21 = vld [vmem:[#allocation2 + $0x140] sm:$0xff] }
 0x350   : > { %6892 = vmatprep.mubr.f32.mxu1 %v5040_v52  ;;  %v3655_v55 = vpop.f32.mrb[152].mxu0  ;;  %v5053_v52 = vld [vmem:[#allocation2 + $0x1a2] sm:$0xff] }
 0x351   : > { %v9545_v41 = vadd.f32 %v3880_v28, %v3655_v55  ;;  %v3657_v36 = vpop.f32.mrb[153].mxu0  ;;  %5381 = vmatmul.mubr.f32.gmra.mrb[2].mxu0 %v4911_v32  ;;  %v5046_v28 = vld [vmem:[#allocation2 + $0x152] sm:$0xff] }
 0x352   : > { %5385 = vmatprep.mubr.f32.mxu0 %v9444_v25  ;;  %v4918_v36 = vld [vmem:[#allocation2 + $0x150] sm:$0xff] }
 0x353   : > { %6893 = vmatmul.mubr.f32.gmra.mrb[18].mxu1 %v5041_v48 }
 0x354   : > { %6895 = vmatprep.mubr.f32.mxu1 %v5042_v63  ;;  %v3660_v2 = vpop.f32.mrb[154].mxu0 }
 0x355   : > { %v9549_v29 = vadd.f32 %v9518_v13, %v3660_v2  ;;  %v3662_v7 = vpop.f32.mrb[155].mxu0  ;;  %5386 = vmatmul.mubr.f32.gmra.mrb[4].mxu0 %v4912_v31  ;;  %v9551_v24 = vpop.f32.mrb[180].mxu1  ;;  %v4978_v13 = vld [vmem:[#allocation2 + $0x121] sm:$0xff] }
 0x356   : > { %5390 = vmatprep.mubr.f32.mxu0 %v9451_v46  ;;  %v9554_v23 = vpop.f32.mrb[181].mxu1  ;;  %v4914_v46 = vld [vmem:[#allocation2 + $0x120] sm:$0xff] }
 0x357   : > { %6896 = vmatmul.mubr.f32.gmra.mrb[20].mxu1 %v5043_v15  ;;  %v4919_v15 = vld [vmem:[#allocation2 + $0x158] sm:$0xff] }
 0x358   : > { %6898 = vmatprep.mubr.f32.mxu1 %v5044_v61  ;;  %v3665_v25 = vpop.f32.mrb[156].mxu0 }
 0x359   : > { %v9557_v43 = vadd.f32 %v9525_v35, %v3665_v25  ;;  %v3667_v60 = vpop.f32.mrb[157].mxu0  ;;  %5391 = vmatmul.mubr.f32.gmra.mrb[6].mxu0 %v4913_v53  ;;  %v5047_v35 = vld [vmem:[#allocation2 + $0x15a] sm:$0xff]  ;;  %v4984_v25 = vld [vmem:[#allocation2 + $0x169] sm:$0xff] }
 0x35a   : > { %5395 = vmatprep.mubr.f32.mxu0 %v4978_v13  ;;  %v4920_v60 = vld [vmem:[#allocation2 + $0x168] sm:$0xff] }
 0x35b   : > { %6899 = vmatmul.mubr.f32.gmra.mrb[22].mxu1 %v5045_v12  ;;  %v4985_v12 = vld [vmem:[#allocation2 + $0x171] sm:$0xff] }
 0x35c   : > { %6901 = vmatprep.mubr.f32.mxu1 %v5046_v28  ;;  %v3670_v6 = vpop.f32.mrb[158].mxu0 }
 0x35d   : > { %v9560_v27 = vadd.f32 %v9523_v33, %v3670_v6  ;;  %v3672_v19 = vpop.f32.mrb[159].mxu0  ;;  %5396 = vmatmul.mubr.f32.gmra.mrb[8].mxu0 %v4914_v46  ;;  %v9562_v59 = vpop.f32.mrb[182].mxu1  ;;  %v4980_v33 = vld [vmem:[#allocation2 + $0x139] sm:$0xff] }
 0x35e   : > { %5400 = vmatprep.mubr.f32.mxu0 %v4979_v44  ;;  %v3930_v45 = vpop.f32.mrb[183].mxu1  ;;  %v4921_v19 = vld [vmem:[#allocation2 + $0x170] sm:$0xff] }
 0x35f   : > { %6902 = vmatmul.mubr.f32.gmra.mrb[24].mxu1 %v5047_v35  ;;  %v4986_v35 = vld [vmem:[#allocation2 + $0x181] sm:$0xff] }
 0x360   : > { %6904 = vmatprep.mubr.f32.mxu1 %v5048_v51  ;;  %v3675_v39 = vpop.f32.mrb[160].mxu0 }
 0x361   : > { %v9565_v22 = vadd.f32 %v9533_v50, %v3675_v39  ;;  %v3677_v11 = vpop.f32.mrb[161].mxu0  ;;  %5401 = vmatmul.mubr.f32.gmra.mrb[10].mxu0 %v4915_v5  ;;  %v4987_v5 = vld [vmem:[#allocation2 + $0x189] sm:$0xff] }
 0x362   : > { %5405 = vmatprep.mubr.f32.mxu0 %v4980_v33 }
 0x363   : > { %6905 = vmatmul.mubr.f32.gmra.mrb[26].mxu1 %v5049_v9  ;;  %v4988_v9 = vld [vmem:[#allocation2 + $0x199] sm:$0xff] }
 0x364   : > { %6907 = vmatprep.mubr.f32.mxu1 %v9461_v49  ;;  %v3680_v34 = vpop.f32.mrb[162].mxu0 }
 0x365   : > { %v9569_v42 = vadd.f32 %v9530_v1, %v3680_v34  ;;  %v3682_v16 = vpop.f32.mrb[163].mxu0  ;;  %5406 = vmatmul.mubr.f32.gmra.mrb[12].mxu0 %v4916_v18  ;;  %v9571_v56 = vpop.f32.mrb[184].mxu1  ;;  %v4982_v1 = vld [vmem:[#allocation2 + $0x151] sm:$0xff] }
 0x366   : > { %5410 = vmatprep.mubr.f32.mxu0 %v4981_v8  ;;  %v3940_v50 = vpop.f32.mrb[185].mxu1  ;;  %v4924_v8 = vld [vmem:[#allocation2 + $0x198] sm:$0xff] }
 0x367   : > { %6908 = vmatmul.mubr.f32.gmra.mrb[28].mxu1 %v9467_v14  ;;  %v4983_v14 = vld [vmem:[#allocation2 + $0x159] sm:$0xff] }
 0x368   : > { %v3685_v40 = vpop.f32.mrb[164].mxu0  ;;  %6910 = vmatprep.mubr.f32.mxu1 %v5052_v0 }
 0x369   : > { %v9575_v49 = vadd.f32 %v9543_v30, %v3685_v40  ;;  %v3687_v55 = vpop.f32.mrb[165].mxu0  ;;  %5411 = vmatmul.mubr.f32.gmra.mrb[14].mxu0 %v4917_v21 }
 0x36a   : > { %5415 = vmatprep.mubr.f32.mxu0 %v4982_v1 }
 0x36b   : > { %6911 = vmatmul.mubr.f32.gmra.mrb[30].mxu1 %v5053_v52 }
 0x36c   : > { %v3690_v32 = vpop.f32.mrb[166].mxu0 }
 0x36d   : > { %v9578_v48 = vadd.f32 %v9540_v62, %v3690_v32  ;;  %v3692_v63 = vpop.f32.mrb[167].mxu0  ;;  %5416 = vmatmul.mubr.f32.gmra.mrb[16].mxu0 %v4918_v36  ;;  %v6746_v2 = vpop.f32.mrb[186].mxu1  ;;  %v7469_v36 = vld [vmem:[#allocation2 + $0x8] sm:$0xff] }
 0x36e   : > { %5420 = vmatprep.mubr.f32.mxu0 %v4983_v14  ;;  %v3950_v31 = vpop.f32.mrb[187].mxu1 }
 0x370   : > { %v3695_v7 = vpop.f32.mrb[168].mxu0 }
 0x371   : > { %v9581_v30 = vadd.f32 %v9554_v23, %v3695_v7  ;;  %v3697_v61 = vpop.f32.mrb[169].mxu0  ;;  %5421 = vmatmul.mubr.f32.gmra.mrb[18].mxu0 %v4919_v15 }
 0x372   : > { %5425 = vmatprep.mubr.f32.mxu0 %v4984_v25 }
 0x374   : > { %v3700_v53 = vpop.f32.mrb[170].mxu0 }
 0x375   : > { %v9584_v62 = vadd.f32 %v9551_v24, %v3700_v53  ;;  %v3702_v13 = vpop.f32.mrb[171].mxu0  ;;  %5426 = vmatmul.mubr.f32.gmra.mrb[20].mxu0 %v4920_v60  ;;  %v6749_v28 = vpop.f32.mrb[188].mxu1 }
 0x376   : > { %5430 = vmatprep.mubr.f32.mxu0 %v4985_v12  ;;  %v3960_v6 = vpop.f32.mrb[189].mxu1 }
 0x378   : > { %v3705_v46 = vpop.f32.mrb[172].mxu0 }
 0x379   : > { %v9586_v44 = vadd.f32 %v3930_v45, %v3705_v46  ;;  %v3707_v23 = vpop.f32.mrb[173].mxu0  ;;  %5431 = vmatmul.mubr.f32.gmra.mrb[22].mxu0 %v4921_v19 }
 0x37a   : > { %5435 = vmatprep.mubr.f32.mxu0 %v4986_v35 }
 0x37c   : > { %v3710_v51 = vpop.f32.mrb[174].mxu0 }
 0x37d   : > { %v9589_v39 = vadd.f32 %v9562_v59, %v3710_v51  ;;  %v3712_v24 = vpop.f32.mrb[175].mxu0  ;;  %5436 = vmatmul.mubr.f32.gmra.mrb[24].mxu0 %v9492_v57  ;;  %v6752_v11 = vpop.f32.mrb[190].mxu1  ;;  %v4989_v59 = vld [vmem:[#allocation2 + $0x1a1] sm:$0xff] }
 0x37e   : > { %5440 = vmatprep.mubr.f32.mxu0 %v4987_v5  ;;  %v3970_v33 = vpop.f32.mrb[191].mxu1 }
 0x380   : > { %v3715_v34 = vpop.f32.mrb[176].mxu0 }
 0x381   : > { %v9592_v18 = vadd.f32 %v3940_v50, %v3715_v34  ;;  %v3717_v45 = vpop.f32.mrb[177].mxu0  ;;  %5441 = vmatmul.mubr.f32.gmra.mrb[26].mxu0 %v9498_v38  ;;  %v4414_v16 = vpop.f32.mrb[192].mxu1 }
 0x382   : > { %5445 = vmatprep.mubr.f32.mxu0 %v4988_v9  ;;  %v4416_v0 = vpop.f32.mrb[193].mxu1 }
 0x384   : > { %v3720_v40 = vpop.f32.mrb[178].mxu0 }
 0x385   : > { %v9596_v21 = vadd.f32 %v9571_v56, %v3720_v40  ;;  %v3722_v57 = vpop.f32.mrb[179].mxu0  ;;  %5446 = vmatmul.mubr.f32.gmra.mrb[28].mxu0 %v4924_v8  ;;  %v4419_v52 = vpop.f32.mrb[194].mxu1 }
 0x386   : > { %5450 = vmatprep.mubr.f32.mxu0 %v4989_v59  ;;  %v4421_v55 = vpop.f32.mrb[195].mxu1 }
 0x388   : > { %v3725_v1 = vpop.f32.mrb[180].mxu0 }
 0x389   : > { %v9598_v50 = vadd.f32 %v3950_v31, %v3725_v1  ;;  %v3727_v32 = vpop.f32.mrb[181].mxu0  ;;  %5451 = vmatmul.mubr.f32.gmra.mrb[30].mxu0 %v7469_v36  ;;  %v4424_v38 = vpop.f32.mrb[196].mxu1  ;;  %v10076_v1 = vld [vmem:[#allocation28_spill] sm:$0xff] }
 0x38a   : > { %v4426_v63 = vpop.f32.mrb[197].mxu1 }
 0x38c   : > { %v3730_v14 = vpop.f32.mrb[182].mxu0 }
 0x38d   : > { %v9600_v7 = vadd.f32 %v6746_v2, %v3730_v14  ;;  %v3732_v15 = vpop.f32.mrb[183].mxu0  ;;  %v4429_v61 = vpop.f32.mrb[198].mxu1 }
 0x38e   : > { %v4431_v56 = vpop.f32.mrb[199].mxu1 }
 0x390   : > { %v3735_v25 = vpop.f32.mrb[184].mxu0 }
 0x391   : > { %v9602_v53 = vadd.f32 %v3960_v6, %v3735_v25  ;;  %v3737_v60 = vpop.f32.mrb[185].mxu0  ;;  %v4434_v13 = vpop.f32.mrb[200].mxu1 }
 0x392   : > { %v4436_v12 = vpop.f32.mrb[201].mxu1 }
 0x394   : > { %v3740_v46 = vpop.f32.mrb[186].mxu0 }
 0x395   : > { %v9604_v31 = vadd.f32 %v6749_v28, %v3740_v46  ;;  %v3742_v19 = vpop.f32.mrb[187].mxu0  ;;  %v4439_v23 = vpop.f32.mrb[202].mxu1 }
 0x396   : > { %v4441_v35 = vpop.f32.mrb[203].mxu1 }
 0x398   : > { %v3745_v51 = vpop.f32.mrb[188].mxu0 }
 0x399   : > { %v9606_v24 = vadd.f32 %v3970_v33, %v3745_v51  ;;  %v3747_v2 = vpop.f32.mrb[189].mxu0  ;;  %v4444_v5 = vpop.f32.mrb[204].mxu1  ;;  %v10077_v33 = vld [vmem:[#allocation27_spill] sm:$0xff] }
 0x39a   : > { %v4446_v9 = vpop.f32.mrb[205].mxu1 }
 0x39c   : > { %v3750_v34 = vpop.f32.mrb[190].mxu0 }
 0x39d   : > { %v9608_v45 = vadd.f32 %v6752_v11, %v3750_v34  ;;  %v3752_v6 = vpop.f32.mrb[191].mxu0  ;;  %v4449_v8 = vpop.f32.mrb[206].mxu1 }
 0x39e   : > { %v4451_v0 = vpop.f32.mrb[207].mxu1 }
 0x3a0   : > { %v6787_v59 = vpop.f32.mrb[192].mxu0 }
 0x3a1   : > { %v4645_v40 = vadd.f32 %v6787_v59, %v4419_v52  ;;  %v4639_v57 = vpop.f32.mrb[193].mxu0 }
 0x3a2   : > { %v4454_v28 = vpop.f32.mrb[208].mxu1  ;;  %v4640_v55 = vadd.f32 %v4639_v57, %v4414_v16 }
 0x3a3   : > { %v9611_v32 = vadd.f32 %v4645_v40, %v10076_v1  ;;  %v4456_v36 = vpop.f32.mrb[209].mxu1 }
 0x3a4   : > { %v9614_v63 = vadd.f32 %v4640_v55, %v10077_v33  ;;  %v6790_v14 = vpop.f32.mrb[194].mxu0 }
 0x3a5   : > { %v4655_v15 = vadd.f32 %v6790_v14, %v4429_v61  ;;  %v4649_v56 = vpop.f32.mrb[195].mxu0 }
 0x3a6   : > { %v4459_v11 = vpop.f32.mrb[210].mxu1  ;;  %v4650_v25 = vadd.f32 %v4649_v56, %v4424_v38 }
 0x3a7   : > { %v9617_v60 = vadd.f32 %v4655_v15, %v9504_v37  ;;  %v4461_v12 = vpop.f32.mrb[211].mxu1 }
 0x3a8   : > { %v9620_v52 = vadd.f32 %v4650_v25, %v9501_v20  ;;  %v6793_v16 = vpop.f32.mrb[196].mxu0 }
 0x3a9   : > { %v4665_v46 = vadd.f32 %v6793_v16, %v4439_v23  ;;  %v4659_v19 = vpop.f32.mrb[197].mxu0 }
 0x3aa   : > { %v4464_v35 = vpop.f32.mrb[212].mxu1  ;;  %v4660_v51 = vadd.f32 %v4659_v19, %v4434_v13 }
 0x3ab   : > { %v9623_v2 = vadd.f32 %v4665_v46, %v9510_v3  ;;  %v4466_v9 = vpop.f32.mrb[213].mxu1 }
 0x3ac   : > { %v9626_v61 = vadd.f32 %v4660_v51, %v9507_v26  ;;  %v6796_v38 = vpop.f32.mrb[198].mxu0 }
 0x3ad   : > { %v4675_v34 = vadd.f32 %v6796_v38, %v4449_v8  ;;  %v4669_v37 = vpop.f32.mrb[199].mxu0 }
 0x3ae   : > { %v4469_v6 = vpop.f32.mrb[214].mxu1  ;;  %v4670_v0 = vadd.f32 %v4669_v37, %v4444_v5 }
 0x3af   : > { %v9629_v20 = vadd.f32 %v4675_v34, %v9516_v58  ;;  %v4471_v59 = vpop.f32.mrb[215].mxu1 }
 0x3b0   : > { %v9632_v23 = vadd.f32 %v4670_v0, %v9513_v4  ;;  %v6799_v13 = vpop.f32.mrb[200].mxu0 }
 0x3b1   : > { %v4685_v40 = vadd.f32 %v6799_v13, %v4459_v11  ;;  %v4679_v3 = vpop.f32.mrb[201].mxu0 }
 0x3b2   : > { %v4474_v57 = vpop.f32.mrb[216].mxu1  ;;  %v4680_v55 = vadd.f32 %v4679_v3, %v4454_v28 }
 0x3b3   : > { %v9635_v26 = vadd.f32 %v4685_v40, %v9528_v54  ;;  %v4476_v1 = vpop.f32.mrb[217].mxu1 }
 0x3b4   : > { %v9638_v8 = vadd.f32 %v4680_v55, %v9521_v47  ;;  %v6802_v5 = vpop.f32.mrb[202].mxu0 }
 0x3b5   : > { %v4695_v36 = vadd.f32 %v6802_v5, %v4469_v6  ;;  %v4689_v58 = vpop.f32.mrb[203].mxu0 }
 0x3b6   : > { %v4479_v33 = vpop.f32.mrb[218].mxu1  ;;  %v4690_v14 = vadd.f32 %v4689_v58, %v4464_v35 }
 0x3b7   : > { %v9641_v4 = vadd.f32 %v4695_v36, %v9538_v10  ;;  %v4481_v15 = vpop.f32.mrb[219].mxu1 }
 0x3b8   : > { %v9644_v56 = vadd.f32 %v4690_v14, %v9535_v17  ;;  %v6805_v28 = vpop.f32.mrb[204].mxu0 }
 0x3b9   : > { %v4705_v11 = vadd.f32 %v6805_v28, %v4479_v33  ;;  %v4699_v54 = vpop.f32.mrb[205].mxu0 }
 0x3ba   : > { %v4484_v25 = vpop.f32.mrb[220].mxu1  ;;  %v4700_v12 = vadd.f32 %v4699_v54, %v4474_v57 }
 0x3bb   : > { %v9647_v47 = vadd.f32 %v4705_v11, %v9549_v29  ;;  %v4486_v16 = vpop.f32.mrb[221].mxu1 }
 0x3bc   : > { %v9650_v46 = vadd.f32 %v4700_v12, %v9545_v41  ;;  %v6808_v19 = vpop.f32.mrb[206].mxu0 }
 0x3bd   : > { %v4709_v35 = vpop.f32.mrb[207].mxu0 }
 0x3be   : > { %v4489_v10 = vpop.f32.mrb[222].mxu1  ;;  %v4710_v51 = vadd.f32 %v4709_v35, %v4484_v25 }
 0x3bf   : > { %v4715_v9 = vadd.f32 %v6808_v19, %v4489_v10  ;;  %v4491_v38 = vpop.f32.mrb[223].mxu1 }
 0x3c0   : > { %v9653_v17 = vadd.f32 %v4710_v51, %v9557_v43  ;;  %v6811_v34 = vpop.f32.mrb[208].mxu0 }
 0x3c1   : > { %v9656_v37 = vadd.f32 %v4715_v9, %v9560_v27  ;;  %v4719_v6 = vpop.f32.mrb[209].mxu0 }
 0x3c2   : > { %v4494_v29 = vpop.f32.mrb[224].mxu1 }
 0x3c3   : > { %v4496_v0 = vpop.f32.mrb[225].mxu1  ;;  %v4720_v59 = vadd.f32 %v4719_v6, %v4494_v29 }
 0x3c4   : > { %v6814_v13 = vpop.f32.mrb[210].mxu0 }
 0x3c5   : > { %v9659_v41 = vadd.f32 %v4720_v59, %v9565_v22  ;;  %v4729_v40 = vpop.f32.mrb[211].mxu0 }
 0x3c6   : > { %v4499_v3 = vpop.f32.mrb[226].mxu1 }
 0x3c7   : > { %v4725_v57 = vadd.f32 %v6811_v34, %v4499_v3  ;;  %v4501_v55 = vpop.f32.mrb[227].mxu1 }
 0x3c8   : > { %v6817_v1 = vpop.f32.mrb[212].mxu0 }
 0x3c9   : > { %v9662_v43 = vadd.f32 %v4725_v57, %v9569_v42  ;;  %v4739_v5 = vpop.f32.mrb[213].mxu0 }
 0x3ca   : > { %v4504_v36 = vpop.f32.mrb[228].mxu1 }
 0x3cb   : > { %v4730_v27 = vadd.f32 %v4729_v40, %v4504_v36  ;;  %v4506_v58 = vpop.f32.mrb[229].mxu1 }
 0x3cc   : > { %v6820_v33 = vpop.f32.mrb[214].mxu0 }
 0x3cd   : > { %v9665_v14 = vadd.f32 %v4730_v27, %v9575_v49  ;;  %v4749_v15 = vpop.f32.mrb[215].mxu0 }
 0x3ce   : > { %v4509_v28 = vpop.f32.mrb[230].mxu1 }
 0x3cf   : > { %v4735_v22 = vadd.f32 %v6814_v13, %v4509_v28  ;;  %v4511_v11 = vpop.f32.mrb[231].mxu1 }
 0x3d0   : > { %v6823_v54 = vpop.f32.mrb[216].mxu0 }
 0x3d1   : > { %v9668_v25 = vadd.f32 %v4735_v22, %v9578_v48  ;;  %v4759_v12 = vpop.f32.mrb[217].mxu0 }
 0x3d2   : > { %v4514_v16 = vpop.f32.mrb[232].mxu1 }
 0x3d3   : > { %v4740_v42 = vadd.f32 %v4739_v5, %v4514_v16  ;;  %v4516_v19 = vpop.f32.mrb[233].mxu1 }
 0x3d4   : > { %v6826_v35 = vpop.f32.mrb[218].mxu0 }
 0x3d5   : > { %v9671_v10 = vadd.f32 %v4740_v42, %v9581_v30  ;;  %v4769_v51 = vpop.f32.mrb[219].mxu0 }
 0x3d6   : > { %v4519_v9 = vpop.f32.mrb[234].mxu1 }
 0x3d7   : > { %v4745_v49 = vadd.f32 %v6817_v1, %v4519_v9  ;;  %v4521_v38 = vpop.f32.mrb[235].mxu1 }
 0x3d8   : > { %v6829_v34 = vpop.f32.mrb[220].mxu0 }
 0x3d9   : > { %v9674_v6 = vadd.f32 %v4745_v49, %v9584_v62  ;;  %v4779_v29 = vpop.f32.mrb[221].mxu0 }
 0x3da   : > { %v4524_v0 = vpop.f32.mrb[236].mxu1 }
 0x3db   : > { %v4750_v48 = vadd.f32 %v4749_v15, %v4524_v0  ;;  %v4526_v59 = vpop.f32.mrb[237].mxu1 }
 0x3dc   : > { %v6832_v13 = vpop.f32.mrb[222].mxu0 }
 0x3dd   : > { %v9677_v40 = vadd.f32 %v4750_v48, %v9586_v44  ;;  %v4789_v3 = vpop.f32.mrb[223].mxu0 }
 0x3de   : > { %v4529_v57 = vpop.f32.mrb[238].mxu1 }
 0x3df   : > { %v4755_v30 = vadd.f32 %v6820_v33, %v4529_v57  ;;  %v4531_v55 = vpop.f32.mrb[239].mxu1 }
 0x3e0   : > { %v5297_v5 = vpop.f32.mrb[224].mxu0 }
 0x3e1   : > { %v9680_v1 = vadd.f32 %v4755_v30, %v9589_v39  ;;  %v5299_v36 = vpop.f32.mrb[225].mxu0 }
 0x3e2   : > { %v4534_v27 = vpop.f32.mrb[240].mxu1 }
 0x3e3   : > { %v4760_v62 = vadd.f32 %v4759_v12, %v4534_v27  ;;  %v4536_v58 = vpop.f32.mrb[241].mxu1 }
 0x3e4   : > { %v5302_v28 = vpop.f32.mrb[226].mxu0 }
 0x3e5   : > { %v9683_v15 = vadd.f32 %v4760_v62, %v9592_v18  ;;  %v5304_v22 = vpop.f32.mrb[227].mxu0 }
 0x3e6   : > { %v4539_v11 = vpop.f32.mrb[242].mxu1 }
 0x3e7   : > { %v4765_v44 = vadd.f32 %v6823_v54, %v4539_v11  ;;  %v4541_v16 = vpop.f32.mrb[243].mxu1 }
 0x3e8   : > { %v5307_v42 = vpop.f32.mrb[228].mxu0 }
 0x3e9   : > { %v9686_v33 = vadd.f32 %v4765_v44, %v9596_v21  ;;  %v5309_v19 = vpop.f32.mrb[229].mxu0 }
 0x3ea   : > { %v4544_v9 = vpop.f32.mrb[244].mxu1 }
 0x3eb   : > { %v4770_v39 = vadd.f32 %v4769_v51, %v4544_v9  ;;  %v4546_v49 = vpop.f32.mrb[245].mxu1 }
 0x3ec   : > { %v5312_v38 = vpop.f32.mrb[230].mxu0 }
 0x3ed   : > { %v9689_v12 = vadd.f32 %v4770_v39, %v9598_v50  ;;  %v5314_v0 = vpop.f32.mrb[231].mxu0 }
 0x3ee   : > { %v4549_v48 = vpop.f32.mrb[246].mxu1 }
 0x3ef   : > { %v4775_v18 = vadd.f32 %v6826_v35, %v4549_v48  ;;  %v4551_v59 = vpop.f32.mrb[247].mxu1 }
 0x3f0   : > { %v5317_v57 = vpop.f32.mrb[232].mxu0 }
 0x3f1   : > { %v9692_v54 = vadd.f32 %v4775_v18, %v9600_v7  ;;  %v5319_v30 = vpop.f32.mrb[233].mxu0 }
 0x3f2   : > { %v4554_v55 = vpop.f32.mrb[248].mxu1 }
 0x3f3   : > { %v4780_v21 = vadd.f32 %v4779_v29, %v4554_v55  ;;  %v4556_v36 = vpop.f32.mrb[249].mxu1 }
 0x3f4   : > { %v5322_v27 = vpop.f32.mrb[234].mxu0 }
 0x3f5   : > { %v9695_v51 = vadd.f32 %v4780_v21, %v9602_v53  ;;  %v5324_v62 = vpop.f32.mrb[235].mxu0 }
 0x3f6   : > { %v4559_v58 = vpop.f32.mrb[250].mxu1 }
 0x3f7   : > { %v4785_v50 = vadd.f32 %v6829_v34, %v4559_v58  ;;  %v4561_v22 = vpop.f32.mrb[251].mxu1 }
 0x3f8   : > { %v9697_v11 = vpop.f32.mrb[236].mxu0  ;;  %v5888_v22 = vld [vmem:[%s7865_s13 + $0x8] sm:$0xff] }
 0x3f9   : > { %v9700_v35 = vadd.f32 %v4785_v50, %v9604_v31  ;;  %v5329_v44 = vpop.f32.mrb[237].mxu0 }
 0x3fa   : > { %v4564_v7 = vpop.f32.mrb[252].mxu1 }
 0x3fb   : > { %v4790_v16 = vadd.f32 %v4789_v3, %v4564_v7  ;;  %v4566_v19 = vpop.f32.mrb[253].mxu1  ;;  %v9713_v3 = vld [vmem:[%s9957_s5] ss:$0 sm:$0xff] }
 0x3fc   : > { %v5332_v9 = vpop.f32.mrb[238].mxu0 }
 0x3fd   : > { %v9703_v29 = vadd.f32 %v4790_v16, %v9606_v24  ;;  %v5334_v39 = vpop.f32.mrb[239].mxu0  ;;  %v5887_v16 = vld [vmem:[%s7865_s13] sm:$0xff] }
 0x3fe   : > { %v4569_v53 = vpop.f32.mrb[254].mxu1 }
 0x3ff   : > { %v4795_v49 = vadd.f32 %v6832_v13, %v4569_v53  ;;  %v4571_v0 = vpop.f32.mrb[255].mxu1 }
 0x400   : > { %v9705_v48 = vpop.f32.mrb[240].mxu0 }
 0x401   : > { %v9708_v34 = vadd.f32 %v4795_v49, %v9608_v45  ;;  %v5339_v31 = vpop.f32.mrb[241].mxu0  ;;  %v9719_v45 = vld [vmem:[%s9958_s6] ss:$0 sm:$0xff] }
 0x402   : > { %v6867_v18 = vpop.f32.mrb[0].mxu1 }
 0x403   : > { %v5528_v59 = vadd.f32 %v6867_v18, %v5302_v28  ;;  %v5522_v30 = vpop.f32.mrb[1].mxu1 }
 0x404   : > { %v5523_v24 = vadd.f32 %v5522_v30, %v5297_v5  ;;  %v5342_v55 = vpop.f32.mrb[242].mxu0 }
 0x405   : > { %v5714_v13 = vadd.f32 %v5528_v59, %v9611_v32  ;;  %v5344_v21 = vpop.f32.mrb[243].mxu0  ;;  %v5890_v59 = vld [vmem:[%s7865_s13 + $0x18] sm:$0xff] }
 0x406   : > { %v5713_v36 = vadd.f32 %v5523_v24, %v9614_v63  ;;  %v6870_v28 = vpop.f32.mrb[2].mxu1 }
 0x407   : > { %v5817_v62 = vmul.f32 %v9713_v3, %v5714_v13  ;;  %v5538_v58 = vadd.f32 %v6870_v28, %v5312_v38  ;;  %v5532_v50 = vpop.f32.mrb[3].mxu1 }
 0x408   : > { %v5816_v5 = vmul.f32 %v9713_v3, %v5713_v36  ;;  %v5533_v44 = vadd.f32 %v5532_v50, %v5307_v42  ;;  %v9725_v7 = vpop.f32.mrb[244].mxu0  ;;  %v5889_v36 = vld [vmem:[%s7865_s13 + $0x10] sm:$0xff] }
 0x409   : > { %v5856_v32 = vadd.f32 %v9719_v45, %v5817_v62  ;;  %v5716_v19 = vadd.f32 %v5538_v58, %v9617_v60  ;;  %v5349_v39 = vpop.f32.mrb[245].mxu0 }
 0x40a   : > { %v5855_v63 = vadd.f32 %v9719_v45, %v5816_v5  ;;  %v5715_v53 = vadd.f32 %v5533_v44, %v9620_v52  ;;  %v6873_v38 = vpop.f32.mrb[4].mxu1 }
 0x40b   : > { %v5920_v49 = vadd.f32 %v5888_v22, %v5856_v32  ;;  %v5819_v0 = vmul.f32 %v9713_v3, %v5716_v19  ;;  %v5548_v31 = vadd.f32 %v6873_v38, %v5322_v27  ;;  %v5542_v42 = vpop.f32.mrb[5].mxu1  ;;  %v5892_v32 = vld [vmem:[%s7865_s13 + $0x28] sm:$0xff] }
 0x40c   : > { %v5919_v18 = vadd.f32 %v5887_v16, %v5855_v63  ;;  %v5818_v30 = vmul.f32 %v9713_v3, %v5715_v53  ;;  %v5543_v24 = vadd.f32 %v5542_v42, %v5317_v57  ;;  %v5352_v13 = vpop.f32.mrb[246].mxu0  ;;  %v5891_v53 = vld [vmem:[%s7865_s13 + $0x20] sm:$0xff] }
 0x40d   : > { %v5952_v60 = vmax.f32 %v5920_v49, 0.0  ;;  %v5858_v21 = vadd.f32 %v9719_v45, %v5819_v0  ;;  %v5718_v52 = vadd.f32 %v5548_v31, %v9623_v2  ;;  %v5354_v28 = vpop.f32.mrb[247].mxu0 }
 0x40e   : > { %v5951_v62 = vmax.f32 %v5919_v18, 0.0  ;;  %v5857_v58 = vadd.f32 %v9719_v45, %v5818_v30  ;;  %v5717_v27 = vadd.f32 %v5543_v24, %v9626_v61  ;;  %v6876_v50 = vpop.f32.mrb[6].mxu1  ;;  %v5893_v28 = vld [vmem:[%s7865_s13 + $0x30] sm:$0xff] }
 0x40f   : > { %5984 = vst [vmem:[%s9742_s21 + $0x8] sm:$0xff] %v5952_v60  ;;  %v5922_v57 = vadd.f32 %v5890_v59, %v5858_v21  ;;  %v5821_v22 = vmul.f32 %v9713_v3, %v5718_v52  ;;  %v5558_v5 = vadd.f32 %v6876_v50, %v5332_v9  ;;  %v5552_v44 = vpop.f32.mrb[7].mxu1  ;;  %v5894_v60 = vld [vmem:[%s7865_s13 + $0x38] sm:$0xff] }
 0x410   : > { %5983 = vst [vmem:[%s9742_s21] sm:$0xff] %v5951_v62  ;;  %v5921_v2 = vadd.f32 %v5889_v36, %v5857_v58  ;;  %v5820_v16 = vmul.f32 %v9713_v3, %v5717_v27  ;;  %v5553_v61 = vadd.f32 %v5552_v44, %v9697_v11  ;;  %v5357_v19 = vpop.f32.mrb[248].mxu0 }
 0x411   : > { %v5954_v39 = vmax.f32 %v5922_v57, 0.0  ;;  %v5860_v63 = vadd.f32 %v9719_v45, %v5821_v22  ;;  %v5720_v38 = vadd.f32 %v5558_v5, %v9629_v20  ;;  %v5359_v49 = vpop.f32.mrb[249].mxu0 }
 0x412   : > { %v5953_v9 = vmax.f32 %v5921_v2, 0.0  ;;  %v5859_v0 = vadd.f32 %v9719_v45, %v5820_v16  ;;  %v5719_v31 = vadd.f32 %v5553_v61, %v9632_v23  ;;  %v6879_v42 = vpop.f32.mrb[8].mxu1 }
 0x413   : > { %5986 = vst [vmem:[%s9742_s21 + $0x18] sm:$0xff] %v5954_v39  ;;  %v5924_v18 = vadd.f32 %v5892_v32, %v5860_v63  ;;  %v5823_v11 = vmul.f32 %v9713_v3, %v5720_v38  ;;  %v5568_v59 = vadd.f32 %v6879_v42, %v5342_v55  ;;  %v5562_v30 = vpop.f32.mrb[9].mxu1  ;;  %v5896_v32 = vld [vmem:[%s7865_s13 + $0x48] sm:$0xff]  ;;  %v5895_v63 = vld [vmem:[%s7865_s13 + $0x40] sm:$0xff] }
 0x414   : > { %5985 = vst [vmem:[%s9742_s21 + $0x10] sm:$0xff] %v5953_v9  ;;  %v5923_v24 = vadd.f32 %v5891_v53, %v5859_v0  ;;  %v5822_v20 = vmul.f32 %v9713_v3, %v5719_v31  ;;  %v5563_v21 = vadd.f32 %v5562_v30, %v9705_v48  ;;  %v5362_v36 = vpop.f32.mrb[250].mxu0 }
 0x415   : > { %v5956_v52 = vmax.f32 %v5924_v18, 0.0  ;;  %v5862_v23 = vadd.f32 %v9719_v45, %v5823_v11  ;;  %v5722_v62 = vadd.f32 %v5568_v59, %v9635_v26  ;;  %v5364_v58 = vpop.f32.mrb[251].mxu0  ;;  %v5898_v59 = vld [vmem:[%s7865_s13 + $0x58] sm:$0xff] }
 0x416   : > { %v5955_v55 = vmax.f32 %v5923_v24, 0.0  ;;  %v5861_v27 = vadd.f32 %v9719_v45, %v5822_v20  ;;  %v5721_v50 = vadd.f32 %v5563_v21, %v9638_v8  ;;  %v6882_v57 = vpop.f32.mrb[10].mxu1  ;;  %v5897_v20 = vld [vmem:[%s7865_s13 + $0x50] sm:$0xff] }
 0x417   : > { %5988 = vst [vmem:[%s9742_s21 + $0x28] sm:$0xff] %v5956_v52  ;;  %v5926_v22 = vadd.f32 %v5894_v60, %v5862_v23  ;;  %v5825_v48 = vmul.f32 %v9713_v3, %v5722_v62  ;;  %v5578_v5 = vadd.f32 %v6882_v57, %v5352_v13  ;;  %v5572_v44 = vpop.f32.mrb[11].mxu1  ;;  %v5900_v57 = vld [vmem:[%s7865_s13 + $0x68] sm:$0xff] }
 0x418   : > { %5987 = vst [vmem:[%s9742_s21 + $0x20] sm:$0xff] %v5955_v55  ;;  %v5925_v2 = vadd.f32 %v5893_v28, %v5861_v27  ;;  %v5824_v26 = vmul.f32 %v9713_v3, %v5721_v50  ;;  %v5573_v16 = vadd.f32 %v5572_v44, %v9725_v7  ;;  %v5367_v61 = vpop.f32.mrb[252].mxu0  ;;  %v5899_v44 = vld [vmem:[%s7865_s13 + $0x60] sm:$0xff] }
 0x419   : > { %v5958_v39 = vmax.f32 %v5926_v22, 0.0  ;;  %v5864_v8 = vadd.f32 %v9719_v45, %v5825_v48  ;;  %v5724_v53 = vadd.f32 %v5578_v5, %v9641_v4  ;;  %v5369_v38 = vpop.f32.mrb[253].mxu0 }
 0x41a   : > { %v5957_v13 = vmax.f32 %v5925_v2, 0.0  ;;  %v5863_v49 = vadd.f32 %v9719_v45, %v5824_v26  ;;  %v5723_v9 = vadd.f32 %v5573_v16, %v9644_v56  ;;  %v6885_v0 = vpop.f32.mrb[12].mxu1 }
 0x41b   : > { %5990 = vst [vmem:[%s9742_s21 + $0x38] sm:$0xff] %v5958_v39  ;;  %v5928_v31 = vadd.f32 %v5896_v32, %v5864_v8  ;;  %v5827_v7 = vmul.f32 %v9713_v3, %v5724_v53  ;;  %v5588_v42 = vadd.f32 %v6885_v0, %v5362_v36  ;;  %v5582_v18 = vpop.f32.mrb[13].mxu1 }
 0x41c   : > { %5989 = vst [vmem:[%s9742_s21 + $0x30] sm:$0xff] %v5957_v13  ;;  %v5927_v11 = vadd.f32 %v5895_v63, %v5863_v49  ;;  %v5826_v4 = vmul.f32 %v9713_v3, %v5723_v9  ;;  %v5583_v30 = vadd.f32 %v5582_v18, %v5357_v19  ;;  %v5372_v24 = vpop.f32.mrb[254].mxu0  ;;  %v5902_v13 = vld [vmem:[%s7865_s13 + $0x78] sm:$0xff] }
 0x41d   : > { %v5960_v60 = vmax.f32 %v5928_v31, 0.0  ;;  %v5866_v56 = vadd.f32 %v9719_v45, %v5827_v7  ;;  %v5726_v21 = vadd.f32 %v5588_v42, %v9647_v47  ;;  %v5374_v52 = vpop.f32.mrb[255].mxu0  ;;  %v5901_v7 = vld [vmem:[%s7865_s13 + $0x70] sm:$0xff] }
 0x41e   : > { %v5959_v23 = vmax.f32 %v5927_v11, 0.0  ;;  %v5865_v36 = vadd.f32 %v9719_v45, %v5826_v4  ;;  %v5725_v28 = vadd.f32 %v5583_v30, %v9650_v46  ;;  %v6888_v62 = vpop.f32.mrb[14].mxu1 }
 0x41f   : > { %5992 = vst [vmem:[%s9742_s21 + $0x48] sm:$0xff] %v5960_v60  ;;  %v5930_v58 = vadd.f32 %v5898_v59, %v5866_v56  ;;  %v5829_v19 = vmul.f32 %v9713_v3, %v5726_v21  ;;  %v5598_v55 = vadd.f32 %v6888_v62, %v5372_v24  ;;  %v5592_v27 = vpop.f32.mrb[15].mxu1 }
 0x420   : > { %5991 = vst [vmem:[%s9742_s21 + $0x40] sm:$0xff] %v5959_v23  ;;  %v5929_v50 = vadd.f32 %v5897_v20, %v5865_v36  ;;  %v5828_v47 = vmul.f32 %v9713_v3, %v5725_v28  ;;  %v5593_v22 = vadd.f32 %v5592_v27, %v5367_v61  ;;  %v5377_v48 = vpop.f32.mrb[0].mxu0  ;;  %v5903_v23 = vld [vmem:[%s7865_s13 + $0x80] sm:$0xff] }
 0x421   : > { %v5962_v5 = vmax.f32 %v5930_v58, 0.0  ;;  %v5868_v46 = vadd.f32 %v9719_v45, %v5829_v19  ;;  %v5728_v2 = vadd.f32 %v5598_v55, %v9656_v37  ;;  %v5379_v32 = vpop.f32.mrb[1].mxu0  ;;  %v5904_v19 = vld [vmem:[%s7865_s13 + $0x88] sm:$0xff] }
 0x422   : > { %v5961_v26 = vmax.f32 %v5929_v50, 0.0  ;;  %v5867_v16 = vadd.f32 %v9719_v45, %v5828_v47  ;;  %v5727_v39 = vadd.f32 %v5593_v22, %v9653_v17  ;;  %v6891_v8 = vpop.f32.mrb[16].mxu1 }
 0x423   : > { %5994 = vst [vmem:[%s9742_s21 + $0x58] sm:$0xff] %v5962_v5  ;;  %v5932_v63 = vadd.f32 %v5900_v57, %v5868_v46  ;;  %v5831_v61 = vmul.f32 %v9713_v3, %v5728_v2  ;;  %v5602_v53 = vpop.f32.mrb[17].mxu1  ;;  %v5905_v2 = vld [vmem:[%s7865_s13 + $0x90] sm:$0xff] }
 0x424   : > { %5993 = vst [vmem:[%s9742_s21 + $0x50] sm:$0xff] %v5961_v26  ;;  %v5931_v38 = vadd.f32 %v5899_v44, %v5867_v16  ;;  %v5830_v49 = vmul.f32 %v9713_v3, %v5727_v39  ;;  %v5603_v37 = vadd.f32 %v5602_v53, %v5377_v48  ;;  %v5382_v9 = vpop.f32.mrb[2].mxu0 }
 0x425   : > { %v5964_v0 = vmax.f32 %v5932_v63, 0.0  ;;  %v5870_v31 = vadd.f32 %v9719_v45, %v5831_v61  ;;  %v5608_v17 = vadd.f32 %v6891_v8, %v5382_v9  ;;  %v5384_v42 = vpop.f32.mrb[3].mxu0 }
 0x426   : > { %v5963_v18 = vmax.f32 %v5931_v38, 0.0  ;;  %v5869_v11 = vadd.f32 %v9719_v45, %v5830_v49  ;;  %v5729_v59 = vadd.f32 %v5603_v37, %v9659_v41  ;;  %v6894_v4 = vpop.f32.mrb[18].mxu1 }
 0x427   : > { %5996 = vst [vmem:[%s9742_s21 + $0x68] sm:$0xff] %v5964_v0  ;;  %v5934_v30 = vadd.f32 %v5902_v13, %v5870_v31  ;;  %v5730_v24 = vadd.f32 %v5608_v17, %v9662_v43  ;;  %v5612_v60 = vpop.f32.mrb[19].mxu1  ;;  %v5906_v13 = vld [vmem:[%s7865_s13 + $0x98] sm:$0xff] }
 0x428   : > { %5995 = vst [vmem:[%s9742_s21 + $0x60] sm:$0xff] %v5963_v18  ;;  %v5933_v56 = vadd.f32 %v5901_v7, %v5869_v11  ;;  %v5832_v20 = vmul.f32 %v9713_v3, %v5729_v59  ;;  %v5387_v21 = vpop.f32.mrb[4].mxu0  ;;  %v5907_v11 = vld [vmem:[%s7865_s13 + $0xa0] sm:$0xff] }
 0x429   : > { %v5966_v52 = vmax.f32 %v5934_v30, 0.0  ;;  %v5833_v36 = vmul.f32 %v9713_v3, %v5730_v24  ;;  %v5613_v28 = vadd.f32 %v5612_v60, %v5387_v21  ;;  %v5389_v41 = vpop.f32.mrb[5].mxu0 }
 0x42a   : > { %v5965_v62 = vmax.f32 %v5933_v56, 0.0  ;;  %v5871_v58 = vadd.f32 %v9719_v45, %v5832_v20  ;;  %v6897_v55 = vpop.f32.mrb[20].mxu1 }
 0x42b   : > { %5998 = vst [vmem:[%s9742_s21 + $0x78] sm:$0xff] %v5966_v52  ;;  %v5872_v43 = vadd.f32 %v9719_v45, %v5833_v36  ;;  %v5731_v27 = vadd.f32 %v5613_v28, %v9665_v14  ;;  %v5622_v50 = vpop.f32.mrb[21].mxu1 }
 0x42c   : > { %5997 = vst [vmem:[%s9742_s21 + $0x70] sm:$0xff] %v5965_v62  ;;  %v5935_v57 = vadd.f32 %v5903_v23, %v5871_v58  ;;  %v5392_v47 = vpop.f32.mrb[6].mxu0  ;;  %v5908_v23 = vld [vmem:[%s7865_s13 + $0xa8] sm:$0xff] }
 0x42d   : > { %v5936_v22 = vadd.f32 %v5904_v19, %v5872_v43  ;;  %v5834_v48 = vmul.f32 %v9713_v3, %v5731_v27  ;;  %v5618_v5 = vadd.f32 %v6894_v4, %v5392_v47  ;;  %v5394_v46 = vpop.f32.mrb[7].mxu0 }
 0x42e   : > { %v5967_v44 = vmax.f32 %v5935_v57, 0.0  ;;  %v6900_v32 = vpop.f32.mrb[22].mxu1 }
 0x42f   : > { %v5968_v26 = vmax.f32 %v5936_v22, 0.0  ;;  %v5873_v16 = vadd.f32 %v9719_v45, %v5834_v48  ;;  %v5732_v14 = vadd.f32 %v5618_v5, %v9668_v25  ;;  %v5632_v39 = vpop.f32.mrb[23].mxu1 }
 0x430   : > { %5999 = vst [vmem:[%s9742_s21 + $0x80] sm:$0xff] %v5967_v44  ;;  %v5397_v8 = vpop.f32.mrb[8].mxu0 }
 0x431   : > { %6000 = vst [vmem:[%s9742_s21 + $0x88] sm:$0xff] %v5968_v26  ;;  %v5937_v63 = vadd.f32 %v5905_v2, %v5873_v16  ;;  %v5835_v61 = vmul.f32 %v9713_v3, %v5732_v14  ;;  %v5623_v53 = vadd.f32 %v5622_v50, %v5397_v8  ;;  %v5399_v38 = vpop.f32.mrb[9].mxu0  ;;  %v5909_v50 = vld [vmem:[%s7865_s13 + $0xb0] sm:$0xff]  ;;  %v5910_v26 = vld [vmem:[%s7865_s13 + $0xb8] sm:$0xff] }
 0x432   : > { %v6903_v49 = vpop.f32.mrb[24].mxu1  ;;  %v5911_v38 = vld [vmem:[%s7865_s13 + $0xc0] sm:$0xff] }
 0x433   : > { %v5969_v37 = vmax.f32 %v5937_v63, 0.0  ;;  %v5874_v9 = vadd.f32 %v9719_v45, %v5835_v61  ;;  %v5733_v0 = vadd.f32 %v5623_v53, %v9671_v10  ;;  %v5642_v25 = vpop.f32.mrb[25].mxu1 }
 0x434   : > { %v5402_v31 = vpop.f32.mrb[10].mxu0 }
 0x435   : > { %6001 = vst [vmem:[%s9742_s21 + $0x90] sm:$0xff] %v5969_v37  ;;  %v5938_v7 = vadd.f32 %v5906_v13, %v5874_v9  ;;  %v5836_v17 = vmul.f32 %v9713_v3, %v5733_v0  ;;  %v5628_v42 = vadd.f32 %v6897_v55, %v5402_v31  ;;  %v5404_v18 = vpop.f32.mrb[11].mxu0 }
 0x436   : > { %v9831_v59 = vpop.f32.mrb[26].mxu1 }
 0x437   : > { %v5970_v4 = vmax.f32 %v5938_v7, 0.0  ;;  %v5875_v30 = vadd.f32 %v9719_v45, %v5836_v17  ;;  %v5734_v24 = vadd.f32 %v5628_v42, %v9674_v6  ;;  %v5652_v60 = vpop.f32.mrb[27].mxu1  ;;  %v5912_v17 = vld [vmem:[%s7865_s13 + $0xc8] sm:$0xff] }
 0x438   : > { %v5407_v10 = vpop.f32.mrb[12].mxu0 }
 0x439   : > { %6002 = vst [vmem:[%s9742_s21 + $0x98] sm:$0xff] %v5970_v4  ;;  %v5939_v56 = vadd.f32 %v5907_v11, %v5875_v30  ;;  %v5837_v20 = vmul.f32 %v9713_v3, %v5734_v24  ;;  %v5633_v21 = vadd.f32 %v5632_v39, %v5407_v10  ;;  %v5409_v52 = vpop.f32.mrb[13].mxu0  ;;  %v5913_v10 = vld [vmem:[%s7865_s13 + $0xd0] sm:$0xff] }
 0x43a   : > { %v9838_v36 = vpop.f32.mrb[28].mxu1 }
 0x43b   : > { %v5971_v28 = vmax.f32 %v5939_v56, 0.0  ;;  %v5876_v41 = vadd.f32 %v9719_v45, %v5837_v20  ;;  %v5735_v62 = vadd.f32 %v5633_v21, %v9677_v40  ;;  %v5662_v58 = vpop.f32.mrb[29].mxu1 }
 0x43c   : > { %v5412_v6 = vpop.f32.mrb[14].mxu0 }
 0x43d   : > { %6003 = vst [vmem:[%s9742_s21 + $0xa0] sm:$0xff] %v5971_v28  ;;  %v5940_v19 = vadd.f32 %v5908_v23, %v5876_v41  ;;  %v5838_v55 = vmul.f32 %v9713_v3, %v5735_v62  ;;  %v5638_v43 = vadd.f32 %v6900_v32, %v5412_v6  ;;  %v5414_v27 = vpop.f32.mrb[15].mxu0  ;;  %v5914_v41 = vld [vmem:[%s7865_s13 + $0xd8] sm:$0xff] }
 0x43e   : > { %v9845_v57 = vpop.f32.mrb[30].mxu1 }
 0x43f   : > { %v5972_v47 = vmax.f32 %v5940_v19, 0.0  ;;  %v5877_v22 = vadd.f32 %v9719_v45, %v5838_v55  ;;  %v5736_v48 = vadd.f32 %v5638_v43, %v9680_v1  ;;  %v9849_v5 = vpop.f32.mrb[31].mxu1 }
 0x440   : > { %v5417_v40 = vpop.f32.mrb[16].mxu0 }
 0x441   : > { %6004 = vst [vmem:[%s9742_s21 + $0xa8] sm:$0xff] %v5972_v47  ;;  %v5941_v46 = vadd.f32 %v5909_v50, %v5877_v22  ;;  %v5839_v44 = vmul.f32 %v9713_v3, %v5736_v48  ;;  %v5643_v2 = vadd.f32 %v5642_v25, %v5417_v40  ;;  %v5419_v32 = vpop.f32.mrb[17].mxu0  ;;  %v5915_v50 = vld [vmem:[%s7865_s13 + $0xe0] sm:$0xff] }
 0x443   : > { %v5973_v16 = vmax.f32 %v5941_v46, 0.0  ;;  %v5878_v14 = vadd.f32 %v9719_v45, %v5839_v44  ;;  %v5737_v39 = vadd.f32 %v5643_v2, %v9683_v15  ;;  %v5916_v2 = vld [vmem:[%s7865_s13 + $0xe8] sm:$0xff] }
 0x444   : > { %v5422_v8 = vpop.f32.mrb[18].mxu0 }
 0x445   : > { %6005 = vst [vmem:[%s9742_s21 + $0xb0] sm:$0xff] %v5973_v16  ;;  %v5942_v1 = vadd.f32 %v5910_v26, %v5878_v14  ;;  %v5840_v63 = vmul.f32 %v9713_v3, %v5737_v39  ;;  %v5648_v61 = vadd.f32 %v6903_v49, %v5422_v8  ;;  %v5424_v53 = vpop.f32.mrb[19].mxu0  ;;  %v5917_v8 = vld [vmem:[%s7865_s13 + $0xf0] sm:$0xff] }
 0x447   : > { %v5974_v13 = vmax.f32 %v5942_v1, 0.0  ;;  %v5879_v37 = vadd.f32 %v9719_v45, %v5840_v63  ;;  %v5738_v9 = vadd.f32 %v5648_v61, %v9686_v33 }
 0x448   : > { %v5427_v0 = vpop.f32.mrb[20].mxu0 }
 0x449   : > { %6006 = vst [vmem:[%s9742_s21 + $0xb8] sm:$0xff] %v5974_v13  ;;  %v5943_v25 = vadd.f32 %v5911_v38, %v5879_v37  ;;  %v5841_v15 = vmul.f32 %v9713_v3, %v5738_v9  ;;  %v5653_v31 = vadd.f32 %v5652_v60, %v5427_v0  ;;  %v5429_v7 = vpop.f32.mrb[21].mxu0  ;;  %v5918_v38 = vld [vmem:[%s7865_s13 + $0xf8] sm:$0xff]  ;;  %s6016_s13 = scalar_lea.sflag [#allocation7], %s7859_s20 }
 0x44b   : > { %v5975_v42 = vmax.f32 %v5943_v25, 0.0  ;;  %v5880_v49 = vadd.f32 %v9719_v45, %v5841_v15  ;;  %v5739_v18 = vadd.f32 %v5653_v31, %v9689_v12 }
 0x44c   : > { %v5432_v11 = vpop.f32.mrb[22].mxu0 }
 0x44d   : > { %6007 = vst [vmem:[%s9742_s21 + $0xc0] sm:$0xff] %v5975_v42  ;;  %v5944_v4 = vadd.f32 %v5912_v17, %v5880_v49  ;;  %v5842_v33 = vmul.f32 %v9713_v3, %v5739_v18  ;;  %v5658_v30 = vadd.f32 %v9831_v59, %v5432_v11  ;;  %v5434_v24 = vpop.f32.mrb[23].mxu0 }
 0x44f   : > { %v5976_v60 = vmax.f32 %v5944_v4, 0.0  ;;  %v5881_v56 = vadd.f32 %v9719_v45, %v5842_v33  ;;  %v5740_v20 = vadd.f32 %v5658_v30, %v9692_v54 }
 0x450   : > { %v5437_v21 = vpop.f32.mrb[24].mxu0 }
 0x451   : > { %6008 = vst [vmem:[%s9742_s21 + $0xc8] sm:$0xff] %v5976_v60  ;;  %v5945_v12 = vadd.f32 %v5913_v10, %v5881_v56  ;;  %v5843_v52 = vmul.f32 %v9713_v3, %v5740_v20  ;;  %v5663_v23 = vadd.f32 %v5662_v58, %v5437_v21  ;;  %v5439_v28 = vpop.f32.mrb[25].mxu0 }
 0x453   : > { %v5977_v62 = vmax.f32 %v5945_v12, 0.0  ;;  %v5882_v59 = vadd.f32 %v9719_v45, %v5843_v52  ;;  %v5741_v6 = vadd.f32 %v5663_v23, %v9695_v51 }
 0x454   : > { %v5442_v19 = vpop.f32.mrb[26].mxu0 }
 0x455   : > { %6009 = vst [vmem:[%s9742_s21 + $0xd0] sm:$0xff] %v5977_v62  ;;  %v5946_v55 = vadd.f32 %v5914_v41, %v5882_v59  ;;  %v5844_v54 = vmul.f32 %v9713_v3, %v5741_v6  ;;  %v5668_v43 = vadd.f32 %v9838_v36, %v5442_v19  ;;  %v5444_v27 = vpop.f32.mrb[27].mxu0 }
 0x457   : > { %v5978_v58 = vmax.f32 %v5946_v55, 0.0  ;;  %v5883_v47 = vadd.f32 %v9719_v45, %v5844_v54  ;;  %v5742_v22 = vadd.f32 %v5668_v43, %v9700_v35 }
 0x458   : > { %v5447_v48 = vpop.f32.mrb[28].mxu0 }
 0x459   : > { %6010 = vst [vmem:[%s9742_s21 + $0xd8] sm:$0xff] %v5978_v58  ;;  %v5947_v51 = vadd.f32 %v5915_v50, %v5883_v47  ;;  %v5845_v40 = vmul.f32 %v9713_v3, %v5742_v22  ;;  %v5673_v46 = vadd.f32 %v9849_v5, %v5447_v48  ;;  %v5449_v44 = vpop.f32.mrb[29].mxu0 }
 0x45b   : > { %v5979_v36 = vmax.f32 %v5947_v51, 0.0  ;;  %v5884_v32 = vadd.f32 %v9719_v45, %v5845_v40  ;;  %v5743_v26 = vadd.f32 %v5673_v46, %v9703_v29 }
 0x45c   : > { %v5452_v16 = vpop.f32.mrb[30].mxu0 }
 0x45d   : > { %6011 = vst [vmem:[%s9742_s21 + $0xe0] sm:$0xff] %v5979_v36  ;;  %v5948_v35 = vadd.f32 %v5916_v2, %v5884_v32  ;;  %v5846_v14 = vmul.f32 %v9713_v3, %v5743_v26  ;;  %v5678_v39 = vadd.f32 %v9845_v57, %v5452_v16  ;;  %v5454_v5 = vpop.f32.mrb[31].mxu0 }
 0x45f   : > { %v5980_v1 = vmax.f32 %v5948_v35, 0.0  ;;  %v5885_v63 = vadd.f32 %v9719_v45, %v5846_v14  ;;  %v5744_v61 = vadd.f32 %v5678_v39, %v9708_v34 }
 0x461   : > { %6012 = vst [vmem:[%s9742_s21 + $0xe8] sm:$0xff] %v5980_v1  ;;  %v5949_v29 = vadd.f32 %v5917_v8, %v5885_v63  ;;  %v5847_v53 = vmul.f32 %v9713_v3, %v5744_v61 }
 0x463   : > { %v5981_v13 = vmax.f32 %v5949_v29, 0.0  ;;  %v5886_v37 = vadd.f32 %v9719_v45, %v5847_v53 }
 0x465   : > { %6013 = vst [vmem:[%s9742_s21 + $0xf0] sm:$0xff] %v5981_v13  ;;  %v5950_v57 = vadd.f32 %v5918_v38, %v5886_v37 }
 0x467   : > { %v5982_v34 = vmax.f32 %v5950_v57, 0.0 }
 0x469   : > { %6014 = vst [vmem:[%s9742_s21 + $0xf8] sm:$0xff] %v5982_v34 }
 0x46a   : > { %7569 = shalt.err (!%p7566_p1)
}
 0x46b   : > { %s7570_s15 = scalar_lea.hbm %s9905_s9, 4096  ;;  %s7574_s21 = scalar_lea.hbm %s9959_s7, 8192 }
 0x46c   : > { %p7571_p13 = scmp.ne.s32.totalorder %s9905_s9, %s7570_s15  ;;  %p7575_p4 = scmp.lt.u32.totalorder %s9905_s9, %s9959_s7 }
 0x46d   : > { %p7576_p5 = scmp.lt.u32.totalorder %s7574_s21, %s7570_s15  ;;  %p7578_p11 = scmp.lt.u32.totalorder %s7570_s15, %s9905_s9 }
 0x46e   : > { %p7572_p6 = pnand %p7571_p13, %p10078_p0 }
 0x46f   : > { %p7577_p8 = por %p7576_p5, %p7575_p4 }
 0x470   : > { %p7573_p10 = pneg %p7572_p6 }
 0x471   : > { %p7579_p2 = por %p7578_p11, %p7577_p8 }
 0x473   : > { %p7580_p3 = pnand %p7579_p2, %p7573_p10 }
 0x475   : > { %7583 = shalt.err (!%p7580_p3)
}
 0x476   : > { %s7636_s30 = smov 128   ;;  %s7637_s29 = smov 8  }
 0x477   : > { %7403 = dma.vmem_to_hbm [thread:$0]  (%p10078_p0), %s9907_s22, 4096, %s9905_s9, %s6016_s13, %s7636_s30, %s7636_s30, %s7637_s29  }
 0x478 PF: > { %s6044_s28 = sand.u32 1, %s7614_s24   ;;  %p10079_p7 = scmp.ne.s32.totalorder %s9999_s8, 0 }
 0x479   : > { %p10080_p9 = scmp.ge.s32.totalorder %s7626_s27, 2  ;;  %s6045_s11 = scalar_lea.sflag [#allocation7], %s6044_s28 }
 0x47b   : > { %p7417_p12 = pnand %p10080_p9, %p10079_p7 }
 0x47d   : > { %7609 = dma.done.wait (!%p7417_p12), %s6045_s11, 4096  }
 0x47e   : > { %7611 = vsyncadd (!%p7417_p12), %s6045_s11, 4294963200  ;;  %p21_p1 = scmp.ge.s32.totalorder %s7794_s12, 4   ;;  %s10081_s24 = smov %s7618_s25 }
 0x47f   : > { %s10082_s25 = smov %s7622_s26  ;;  %s10083_s26 = smov %s7810_s17 }
 0x480   : > { %s10084_s27 = smov %s7794_s12  ;;  %23 = sbr.rel (!%p21_p1) target bundleno = 6 (0x6), region = 108 }
 0x487   :  { %6050 = vsyncpa [#allocation6], 1 }
 0x488   :  { %6052 = vsyncpa [#allocation6 + $0x1], 1 }
 0x489   :  { %6053 = vsyncpa [#allocation9], 1 }
 0x48a   :  { %6054 = vsyncpa [#allocation7], 1 }
 0x48b   :  { %6056 = vsyncpa [#allocation7 + $0x1], 1 }

</bundles_post_ra>
